<compile_context>
chip_gen: v7x
topology: tpu7x:2x2x1
jax: 0.10.0
libtpu: 0.0.40
codegen_flags: <defaults>
</compile_context>

<pallas_src>
import jax
import jax.numpy as jnp
from jax import lax
from jax.experimental import pallas as pl
from jax.experimental.pallas import tpu as pltpu


# ----------------------------------------------------------------------------
# Fused kernel factory (all shapes static).
# ----------------------------------------------------------------------------
def _make_kernel(B_TILE: int, Cskip: int, Cin: int, Cout: int,
                 H2: int, W2: int, compute_dtype):
    S2 = H2 * W2
    PAD = W2 + 1          # zero extension absorbing any +-1 coarse row/col shift

    def kernel(skip_ref, x2_ref, wup_ref, bup_ref, cmask_ref,
               w1s_ref, w1u_ref, b1_ref, w2_ref, b2_ref, o_ref):
        dt = compute_dtype

        mask_m1 = cmask_ref[0]            # (1, S2): source column j-1 exists
        mask_p1 = cmask_ref[1]            # (1, S2): source column j+1 exists

        wup = wup_ref[...]                # (4*Cout, Cin)
        bup = bup_ref[...]                # (Cout, 1) f32
        w1s = w1s_ref[...]                # (9, Cout, Cskip)
        w1u = w1u_ref[...]                # (9, Cout, Cout)
        b1 = b1_ref[...]                  # (Cout, 1) f32
        w2 = w2_ref[...]                  # (9, Cout, Cout)
        b2 = b2_ref[...]                  # (Cout, 1) f32

        def extend(img):                  # zero-extend a flat coarse plane (lanes)
            z = jnp.zeros((img.shape[0], PAD), img.dtype)
            return jnp.concatenate([z, img, z], axis=1)

        def shifted(ext_plane, di, dj):
            # value at coarse (i+di, j+dj); rows out of range fall in the zero
            # pad, column wraps are killed by the validity masks.
            off = di * W2 + dj
            s = ext_plane[:, PAD + off: PAD + off + S2]
            if dj == -1:
                s = s * mask_m1
            elif dj == 1:
                s = s * mask_p1
            return s

        def conv3x3_relu(groups, bias):
            # groups: list of (ext_phases [4 x (C, S2+2*PAD)], taps (9, Cout, C)).
            # Returns the 4 output phase planes (Cout, S2), f32, after bias+ReLU.
            cache = {}

            def src(g, ph, di, dj):
                key = (g, ph, di, dj)
                if key not in cache:
                    cache[key] = shifted(groups[g][0][ph], di, dj)
                return cache[key]

            outs = []
            for a in (0, 1):              # output row parity
                for b in (0, 1):          # output column parity
                    acc = jnp.zeros((Cout, S2), jnp.float32)
                    for dy in range(3):
                        t = a + dy - 1
                        ps, di = t % 2, t // 2
                        for dx in range(3):
                            u = b + dx - 1
                            qs, dj = u % 2, u // 2
                            k = dy * 3 + dx
                            for g, (_, taps) in enumerate(groups):
                                acc = acc + jnp.dot(
                                    taps[k], src(g, 2 * ps + qs, di, dj),
                                    preferred_element_type=jnp.float32)
                    outs.append(jnp.maximum(acc + bias, 0.0))
            return outs

        for bi in range(B_TILE):
            skip = skip_ref[bi]           # (4*Cskip, S2), phase-major rows
            x2f = x2_ref[bi]              # (Cin, S2)

            # ConvTranspose2d(k=2,s=2): one fused matmul; its row groups ARE the
            # 4 output phases, so no spatial interleave is needed at all.
            wall = jnp.dot(wup, x2f, preferred_element_type=jnp.float32)
            up_ext = [extend((wall[p * Cout:(p + 1) * Cout] + bup).astype(dt))
                      for p in range(4)]
            skip_ext = [extend(skip[p * Cskip:(p + 1) * Cskip]) for p in range(4)]

            # conv1 + ReLU: skip half and up half of w1 accumulated tap-by-tap
            # (no cat / im2col buffer is materialised).
            h1 = conv3x3_relu([(skip_ext, w1s), (up_ext, w1u)], b1)
            h1_ext = [extend(h.astype(dt)) for h in h1]

            # conv2 + ReLU
            h2 = conv3x3_relu([(h1_ext, w2)], b2)

            # one dense (4*Cout, S2) store per image (16 sublanes, 128k lanes)
            o_ref[bi] = jnp.concatenate(h2, axis=0).astype(o_ref.dtype)

    return kernel


# ----------------------------------------------------------------------------
# One-time weight re-layout (hoisted out of the per-call path).
# ----------------------------------------------------------------------------
def prepare_params(params, compute_dtype=jnp.float32):
    up_w = jnp.asarray(params["up_w"])            # (Cin, Cout, 2, 2)
    Cout = up_w.shape[1]
    c1_w = jnp.asarray(params["c1_w"])            # (Cout, Cskip+Cout, 3, 3)
    Cskip = c1_w.shape[1] - Cout
    c2_w = jnp.asarray(params["c2_w"])            # (Cout, Cout, 3, 3)

    def conv_taps(w):                             # (O, I, 3, 3) -> (9, O, I)
        return jnp.transpose(w, (2, 3, 0, 1)).reshape(9, w.shape[0], w.shape[1])

    return {
        # ConvTranspose2d weight -> (4*Cout, Cin), row = (a*2+b)*Cout + co
        "wup": jnp.transpose(up_w, (2, 3, 1, 0)).reshape(4 * Cout, up_w.shape[0])
                  .astype(compute_dtype),
        "bup": jnp.asarray(params["up_b"]).reshape(Cout, 1).astype(jnp.float32),
        "w1s": conv_taps(c1_w[:, :Cskip]).astype(compute_dtype),
        "w1u": conv_taps(c1_w[:, Cskip:]).astype(compute_dtype),
        "b1": jnp.asarray(params["c1_b"]).reshape(Cout, 1).astype(jnp.float32),
        "w2": conv_taps(c2_w).astype(compute_dtype),
        "b2": jnp.asarray(params["c2_b"]).reshape(Cout, 1).astype(jnp.float32),
    }


# ----------------------------------------------------------------------------
# unetUp forward (wrapper: input phase-split, one pallas_call, output de-phase)
# ----------------------------------------------------------------------------
def unet_up_forward(prepared, inputs1, inputs2):
    dt = prepared["w1s"].dtype
    N, Cskip, H1, W1 = inputs1.shape
    _, Cin, H2, W2 = inputs2.shape
    Cout = prepared["wup"].shape[0] // 4
    H, W = 2 * H2, 2 * W2
    S2 = H2 * W2

    # Skip connection: F.pad to the up-sampled size, then 2x2 phase split
    # (layout plumbing done once per call in XLA, outside the kernel).
    off_y, off_x = H - H1, W - W1
    x1 = jnp.pad(inputs1, ((0, 0), (0, 0),
                           (off_y // 2, off_y - off_y // 2),
                           (off_x // 2, off_x - off_x // 2)))
    skip_ph = (x1.reshape(N, Cskip, H2, 2, W2, 2)
                 .transpose(0, 3, 5, 1, 2, 4)
                 .reshape(N, 4 * Cskip, S2).astype(dt))
    x2 = inputs2.reshape(N, Cin, S2).astype(dt)

    # Column-validity masks for +-1 coarse column shifts (constant-folded).
    col = jnp.arange(S2, dtype=jnp.int32) % W2
    cmask = jnp.stack([(col >= 1), (col <= W2 - 2)]).astype(dt).reshape(2, 1, S2)

    # Pack 2 images per grid step only if that still leaves >=2 steps (v7x TCs).
    B_TILE = 2 if (N % 2 == 0 and N >= 4) else 1
    grid = (N // B_TILE,)

    kernel = _make_kernel(B_TILE, Cskip, Cin, Cout, H2, W2, dt)

    out = pl.pallas_call(
        kernel,
        out_shape=jax.ShapeDtypeStruct((N, 4 * Cout, S2), jnp.float32),
        grid=grid,
        in_specs=[
            pl.BlockSpec((B_TILE, 4 * Cskip, S2), lambda n: (n, 0, 0)),
            pl.BlockSpec((B_TILE, Cin, S2), lambda n: (n, 0, 0)),
            pl.BlockSpec((4 * Cout, Cin), lambda n: (0, 0)),
            pl.BlockSpec((Cout, 1), lambda n: (0, 0)),
            pl.BlockSpec((2, 1, S2), lambda n: (0, 0, 0)),
            pl.BlockSpec((9, Cout, Cskip), lambda n: (0, 0, 0)),
            pl.BlockSpec((9, Cout, Cout), lambda n: (0, 0, 0)),
            pl.BlockSpec((Cout, 1), lambda n: (0, 0)),
            pl.BlockSpec((9, Cout, Cout), lambda n: (0, 0, 0)),
            pl.BlockSpec((Cout, 1), lambda n: (0, 0)),
        ],
        out_specs=pl.BlockSpec((B_TILE, 4 * Cout, S2), lambda n: (n, 0, 0)),
        compiler_params=pltpu.CompilerParams(
            dimension_semantics=("parallel",),
            vmem_limit_bytes=32 * 1024 * 1024,
        ),
    )(skip_ph, x2, prepared["wup"], prepared["bup"], cmask,
      prepared["w1s"], prepared["w1u"], prepared["b1"],
      prepared["w2"], prepared["b2"])

    # De-interleave the 4 output phases back to NCHW (layout plumbing).
    out = (out.reshape(N, 2, 2, Cout, H2, W2)
              .transpose(0, 3, 4, 1, 5, 2)
              .reshape(N, Cout, H, W))
    return out


# ----------------------------------------------------------------------------
# Pure-JAX reference (correctness check only)
# ----------------------------------------------------------------------------
def _ref_forward(params, inputs1_nchw, inputs2_nchw):
    x1 = jnp.transpose(inputs1_nchw, (0, 2, 3, 1))
    x2 = jnp.transpose(inputs2_nchw, (0, 2, 3, 1))
    N, H2, W2, _ = x2.shape
    Cout = params["up_w"].shape[1]
    t = jnp.einsum("nhwi,ioab->nhwabo", x2, params["up_w"])
    out2 = (jnp.transpose(t, (0, 1, 3, 2, 4, 5)).reshape(N, 2 * H2, 2 * W2, Cout)
            + params["up_b"])
    off_y = out2.shape[1] - x1.shape[1]
    off_x = out2.shape[2] - x1.shape[2]
    out1 = jnp.pad(x1, ((0, 0),
                        (off_y // 2, off_y - off_y // 2),
                        (off_x // 2, off_x - off_x // 2),
                        (0, 0)))
    cat = jnp.concatenate([out1, out2], axis=-1)

    def conv(x, w_oihw, b):
        w = jnp.transpose(w_oihw, (2, 3, 1, 0))
        y = lax.conv_general_dilated(x, w, (1, 1), "SAME",
                                     dimension_numbers=("NHWC", "HWIO", "NHWC"))
        return jnp.maximum(y + b, 0.0)

    h = conv(cat, params["c1_w"], params["c1_b"])
    h = conv(h, params["c2_w"], params["c2_b"])
    return jnp.transpose(h, (0, 3, 1, 2))


# ----------------------------------------------------------------------------
if __name__ == "__main__":
    in_size, out_size = 8, 4          # in_size = Cskip + out_size (UNet usage)
    N = 2
    H2 = W2 = 16                      # inputs2 spatial (coarse) size
    H1 = W1 = 2 * H2                  # inputs1 spatial size (S2 = 256 lanes)

    key = jax.random.PRNGKey(0)
    ks = jax.random.split(key, 8)

    params = {
        # ConvTranspose2d(in_size, out_size, 2, 2): weight (Cin, Cout, 2, 2)
        "up_w": 0.1 * jax.random.normal(ks[0], (in_size, out_size, 2, 2), jnp.float32),
        "up_b": 0.1 * jax.random.normal(ks[1], (out_size,), jnp.float32),
        # unetConv2 conv1: Conv2d(in_size, out_size, 3, 1, 1)
        "c1_w": 0.1 * jax.random.normal(ks[2], (out_size, in_size, 3, 3), jnp.float32),
        "c1_b": 0.1 * jax.random.normal(ks[3], (out_size,), jnp.float32),
        # unetConv2 conv2: Conv2d(out_size, out_size, 3, 1, 1)
        "c2_w": 0.1 * jax.random.normal(ks[4], (out_size, out_size, 3, 3), jnp.float32),
        "c2_b": 0.1 * jax.random.normal(ks[5], (out_size,), jnp.float32),
    }

    inputs1 = jax.random.normal(ks[6], (N, in_size - out_size, H1, W1), jnp.float32)
    inputs2 = jax.random.normal(ks[7], (N, in_size, H2, W2), jnp.float32)

    # One-time weight relayout (outside jit / per-call path).
    # (use compute_dtype=jnp.bfloat16 on v6e/v7x; f32 here for the 1e-4 check)
    prepared = prepare_params(params, compute_dtype=jnp.float32)

    fwd = jax.jit(unet_up_forward)
    out = jax.block_until_ready(fwd(prepared, inputs1, inputs2))

    ref = _ref_forward(params, inputs1, inputs2)
    assert out.shape == (N, out_size, H1, W1), out.shape
    err = float(jnp.max(jnp.abs(out - ref)))
    assert jnp.allclose(out, ref, atol=1e-4, rtol=1e-4), err

    print("KERNEL_OK")
</pallas_src>

<mosaic_0001>
module attributes {stable_mosaic.version = 11 : i64} {
  func.func @kernel(%arg0: i32, %arg1: memref<1x16x256xf32, #tpu.memory_space<vmem>>, %arg2: memref<1x8x256xf32, #tpu.memory_space<vmem>>, %arg3: memref<16x8xf32, #tpu.memory_space<vmem>>, %arg4: memref<4x1xf32, #tpu.memory_space<vmem>>, %arg5: memref<2x1x256xf32, #tpu.memory_space<vmem>>, %arg6: memref<9x4x4xf32, #tpu.memory_space<vmem>>, %arg7: memref<9x4x4xf32, #tpu.memory_space<vmem>>, %arg8: memref<4x1xf32, #tpu.memory_space<vmem>>, %arg9: memref<9x4x4xf32, #tpu.memory_space<vmem>>, %arg10: memref<4x1xf32, #tpu.memory_space<vmem>>, %arg11: memref<1x16x256xf32, #tpu.memory_space<vmem>>) attributes {dimension_semantics = [#tpu.dimension_semantics<parallel>], iteration_bounds = array<i64: 2>, scalar_prefetch = 0 : i64, scratch_operands = 0 : i64, tpu.core_type = #tpu.core_type<tc>, window_params = [{transform_indices = @transform_0, window_bounds = array<i64: 1, 16, 256>}, {transform_indices = @transform_1, window_bounds = array<i64: 1, 8, 256>}, {pipeline_mode = #tpu.pipeline_mode<synchronous>, transform_indices = @transform_2, window_bounds = array<i64: 16, 8>}, {pipeline_mode = #tpu.pipeline_mode<synchronous>, transform_indices = @transform_3, window_bounds = array<i64: 4, 1>}, {pipeline_mode = #tpu.pipeline_mode<synchronous>, transform_indices = @transform_4, window_bounds = array<i64: 2, 1, 256>}, {pipeline_mode = #tpu.pipeline_mode<synchronous>, transform_indices = @transform_5, window_bounds = array<i64: 9, 4, 4>}, {pipeline_mode = #tpu.pipeline_mode<synchronous>, transform_indices = @transform_6, window_bounds = array<i64: 9, 4, 4>}, {pipeline_mode = #tpu.pipeline_mode<synchronous>, transform_indices = @transform_7, window_bounds = array<i64: 4, 1>}, {pipeline_mode = #tpu.pipeline_mode<synchronous>, transform_indices = @transform_8, window_bounds = array<i64: 9, 4, 4>}, {pipeline_mode = #tpu.pipeline_mode<synchronous>, transform_indices = @transform_9, window_bounds = array<i64: 4, 1>}, {transform_indices = @transform_10, window_bounds = array<i64: 1, 16, 256>}]} {
    %c0 = arith.constant 0 : index
    %c0_0 = arith.constant 0 : index
    %c0_1 = arith.constant 0 : index
    %0 = vector.load %arg5[%c0, %c0_0, %c0_1] : memref<2x1x256xf32, #tpu.memory_space<vmem>>, vector<1x1x256xf32>
    %1 = vector.shape_cast %0 : vector<1x1x256xf32> to vector<1x256xf32>
    %c1 = arith.constant 1 : index
    %c0_2 = arith.constant 0 : index
    %c0_3 = arith.constant 0 : index
    %2 = vector.load %arg5[%c1, %c0_2, %c0_3] : memref<2x1x256xf32, #tpu.memory_space<vmem>>, vector<1x1x256xf32>
    %3 = vector.shape_cast %2 : vector<1x1x256xf32> to vector<1x256xf32>
    %c0_4 = arith.constant 0 : index
    %c0_5 = arith.constant 0 : index
    %4 = vector.load %arg3[%c0_4, %c0_5] : memref<16x8xf32, #tpu.memory_space<vmem>>, vector<16x8xf32>
    %c0_6 = arith.constant 0 : index
    %c0_7 = arith.constant 0 : index
    %5 = vector.load %arg4[%c0_6, %c0_7] : memref<4x1xf32, #tpu.memory_space<vmem>>, vector<4x1xf32>
    %c0_8 = arith.constant 0 : index
    %c0_9 = arith.constant 0 : index
    %c0_10 = arith.constant 0 : index
    %6 = vector.load %arg6[%c0_8, %c0_9, %c0_10] : memref<9x4x4xf32, #tpu.memory_space<vmem>>, vector<9x4x4xf32>
    %c0_11 = arith.constant 0 : index
    %c0_12 = arith.constant 0 : index
    %c0_13 = arith.constant 0 : index
    %7 = vector.load %arg7[%c0_11, %c0_12, %c0_13] : memref<9x4x4xf32, #tpu.memory_space<vmem>>, vector<9x4x4xf32>
    %c0_14 = arith.constant 0 : index
    %c0_15 = arith.constant 0 : index
    %8 = vector.load %arg8[%c0_14, %c0_15] : memref<4x1xf32, #tpu.memory_space<vmem>>, vector<4x1xf32>
    %c0_16 = arith.constant 0 : index
    %c0_17 = arith.constant 0 : index
    %c0_18 = arith.constant 0 : index
    %9 = vector.load %arg9[%c0_16, %c0_17, %c0_18] : memref<9x4x4xf32, #tpu.memory_space<vmem>>, vector<9x4x4xf32>
    %c0_19 = arith.constant 0 : index
    %c0_20 = arith.constant 0 : index
    %10 = vector.load %arg10[%c0_19, %c0_20] : memref<4x1xf32, #tpu.memory_space<vmem>>, vector<4x1xf32>
    %c0_21 = arith.constant 0 : index
    %c0_22 = arith.constant 0 : index
    %c0_23 = arith.constant 0 : index
    %11 = vector.load %arg1[%c0_21, %c0_22, %c0_23] : memref<1x16x256xf32, #tpu.memory_space<vmem>>, vector<1x16x256xf32>
    %12 = vector.shape_cast %11 : vector<1x16x256xf32> to vector<16x256xf32>
    %c0_24 = arith.constant 0 : index
    %c0_25 = arith.constant 0 : index
    %c0_26 = arith.constant 0 : index
    %13 = vector.load %arg2[%c0_24, %c0_25, %c0_26] : memref<1x8x256xf32, #tpu.memory_space<vmem>>, vector<1x8x256xf32>
    %14 = vector.shape_cast %13 : vector<1x8x256xf32> to vector<8x256xf32>
    %cst = arith.constant dense<0.000000e+00> : vector<16x256xf32>
    %15 = tpu.matmul %4, %14, %cst {dimension_numbers = #tpu.dot_dimension_numbers<[1], [0], [0], [1], [0, 0, 1, 1], [], []>} : vector<16x8xf32>, vector<8x256xf32>, vector<16x256xf32> -> vector<16x256xf32>
    %16 = vector.extract_strided_slice %15 {offsets = [0, 0], sizes = [4, 256], strides = [1, 1]} : vector<16x256xf32> to vector<4x256xf32>
    %17 = vector.broadcast %5 : vector<4x1xf32> to vector<4x256xf32>
    %18 = arith.addf %16, %17 : vector<4x256xf32>
    %cst_27 = arith.constant 0.000000e+00 : f32
    %19 = vector.broadcast %cst_27 : f32 to vector<4x17xf32>
    %20 = tpu.concatenate %19, %18, %19 in 1 : vector<4x17xf32>, vector<4x256xf32>, vector<4x17xf32> -> vector<4x290xf32>
    %21 = vector.extract_strided_slice %15 {offsets = [4, 0], sizes = [4, 256], strides = [1, 1]} : vector<16x256xf32> to vector<4x256xf32>
    %22 = vector.broadcast %5 : vector<4x1xf32> to vector<4x256xf32>
    %23 = arith.addf %21, %22 : vector<4x256xf32>
    %cst_28 = arith.constant 0.000000e+00 : f32
    %24 = vector.broadcast %cst_28 : f32 to vector<4x17xf32>
    %25 = tpu.concatenate %24, %23, %24 in 1 : vector<4x17xf32>, vector<4x256xf32>, vector<4x17xf32> -> vector<4x290xf32>
    %26 = vector.extract_strided_slice %15 {offsets = [8, 0], sizes = [4, 256], strides = [1, 1]} : vector<16x256xf32> to vector<4x256xf32>
    %27 = vector.broadcast %5 : vector<4x1xf32> to vector<4x256xf32>
    %28 = arith.addf %26, %27 : vector<4x256xf32>
    %cst_29 = arith.constant 0.000000e+00 : f32
    %29 = vector.broadcast %cst_29 : f32 to vector<4x17xf32>
    %30 = tpu.concatenate %29, %28, %29 in 1 : vector<4x17xf32>, vector<4x256xf32>, vector<4x17xf32> -> vector<4x290xf32>
    %31 = vector.extract_strided_slice %15 {offsets = [12, 0], sizes = [4, 256], strides = [1, 1]} : vector<16x256xf32> to vector<4x256xf32>
    %32 = vector.broadcast %5 : vector<4x1xf32> to vector<4x256xf32>
    %33 = arith.addf %31, %32 : vector<4x256xf32>
    %cst_30 = arith.constant 0.000000e+00 : f32
    %34 = vector.broadcast %cst_30 : f32 to vector<4x17xf32>
    %35 = tpu.concatenate %34, %33, %34 in 1 : vector<4x17xf32>, vector<4x256xf32>, vector<4x17xf32> -> vector<4x290xf32>
    %36 = vector.extract_strided_slice %12 {offsets = [0, 0], sizes = [4, 256], strides = [1, 1]} : vector<16x256xf32> to vector<4x256xf32>
    %cst_31 = arith.constant 0.000000e+00 : f32
    %37 = vector.broadcast %cst_31 : f32 to vector<4x17xf32>
    %38 = tpu.concatenate %37, %36, %37 in 1 : vector<4x17xf32>, vector<4x256xf32>, vector<4x17xf32> -> vector<4x290xf32>
    %39 = vector.extract_strided_slice %12 {offsets = [4, 0], sizes = [4, 256], strides = [1, 1]} : vector<16x256xf32> to vector<4x256xf32>
    %cst_32 = arith.constant 0.000000e+00 : f32
    %40 = vector.broadcast %cst_32 : f32 to vector<4x17xf32>
    %41 = tpu.concatenate %40, %39, %40 in 1 : vector<4x17xf32>, vector<4x256xf32>, vector<4x17xf32> -> vector<4x290xf32>
    %42 = vector.extract_strided_slice %12 {offsets = [8, 0], sizes = [4, 256], strides = [1, 1]} : vector<16x256xf32> to vector<4x256xf32>
    %cst_33 = arith.constant 0.000000e+00 : f32
    %43 = vector.broadcast %cst_33 : f32 to vector<4x17xf32>
    %44 = tpu.concatenate %43, %42, %43 in 1 : vector<4x17xf32>, vector<4x256xf32>, vector<4x17xf32> -> vector<4x290xf32>
    %45 = vector.extract_strided_slice %12 {offsets = [12, 0], sizes = [4, 256], strides = [1, 1]} : vector<16x256xf32> to vector<4x256xf32>
    %cst_34 = arith.constant 0.000000e+00 : f32
    %46 = vector.broadcast %cst_34 : f32 to vector<4x17xf32>
    %47 = tpu.concatenate %46, %45, %46 in 1 : vector<4x17xf32>, vector<4x256xf32>, vector<4x17xf32> -> vector<4x290xf32>
    %cst_35 = arith.constant 0.000000e+00 : f32
    %48 = vector.broadcast %cst_35 : f32 to vector<4x256xf32>
    %49 = vector.extract_strided_slice %6 {offsets = [0, 0, 0], sizes = [1, 4, 4], strides = [1, 1, 1]} : vector<9x4x4xf32> to vector<1x4x4xf32>
    %50 = vector.shape_cast %49 : vector<1x4x4xf32> to vector<4x4xf32>
    %51 = vector.extract_strided_slice %47 {offsets = [0, 0], sizes = [4, 256], strides = [1, 1]} : vector<4x290xf32> to vector<4x256xf32>
    %52 = vector.broadcast %1 : vector<1x256xf32> to vector<4x256xf32>
    %53 = arith.mulf %51, %52 : vector<4x256xf32>
    %cst_36 = arith.constant dense<0.000000e+00> : vector<4x256xf32>
    %54 = tpu.matmul %50, %53, %cst_36 {dimension_numbers = #tpu.dot_dimension_numbers<[1], [0], [0], [1], [0, 0, 1, 1], [], []>} : vector<4x4xf32>, vector<4x256xf32>, vector<4x256xf32> -> vector<4x256xf32>
    %55 = arith.addf %48, %54 : vector<4x256xf32>
    %56 = vector.extract_strided_slice %7 {offsets = [0, 0, 0], sizes = [1, 4, 4], strides = [1, 1, 1]} : vector<9x4x4xf32> to vector<1x4x4xf32>
    %57 = vector.shape_cast %56 : vector<1x4x4xf32> to vector<4x4xf32>
    %58 = vector.extract_strided_slice %35 {offsets = [0, 0], sizes = [4, 256], strides = [1, 1]} : vector<4x290xf32> to vector<4x256xf32>
    %59 = vector.broadcast %1 : vector<1x256xf32> to vector<4x256xf32>
    %60 = arith.mulf %58, %59 : vector<4x256xf32>
    %cst_37 = arith.constant dense<0.000000e+00> : vector<4x256xf32>
    %61 = tpu.matmul %57, %60, %cst_37 {dimension_numbers = #tpu.dot_dimension_numbers<[1], [0], [0], [1], [0, 0, 1, 1], [], []>} : vector<4x4xf32>, vector<4x256xf32>, vector<4x256xf32> -> vector<4x256xf32>
    %62 = arith.addf %55, %61 : vector<4x256xf32>
    %63 = vector.extract_strided_slice %6 {offsets = [1, 0, 0], sizes = [1, 4, 4], strides = [1, 1, 1]} : vector<9x4x4xf32> to vector<1x4x4xf32>
    %64 = vector.shape_cast %63 : vector<1x4x4xf32> to vector<4x4xf32>
    %65 = vector.extract_strided_slice %44 {offsets = [0, 1], sizes = [4, 256], strides = [1, 1]} : vector<4x290xf32> to vector<4x256xf32>
    %cst_38 = arith.constant dense<0.000000e+00> : vector<4x256xf32>
    %66 = tpu.matmul %64, %65, %cst_38 {dimension_numbers = #tpu.dot_dimension_numbers<[1], [0], [0], [1], [0, 0, 1, 1], [], []>} : vector<4x4xf32>, vector<4x256xf32>, vector<4x256xf32> -> vector<4x256xf32>
    %67 = arith.addf %62, %66 : vector<4x256xf32>
    %68 = vector.extract_strided_slice %7 {offsets = [1, 0, 0], sizes = [1, 4, 4], strides = [1, 1, 1]} : vector<9x4x4xf32> to vector<1x4x4xf32>
    %69 = vector.shape_cast %68 : vector<1x4x4xf32> to vector<4x4xf32>
    %70 = vector.extract_strided_slice %30 {offsets = [0, 1], sizes = [4, 256], strides = [1, 1]} : vector<4x290xf32> to vector<4x256xf32>
    %cst_39 = arith.constant dense<0.000000e+00> : vector<4x256xf32>
    %71 = tpu.matmul %69, %70, %cst_39 {dimension_numbers = #tpu.dot_dimension_numbers<[1], [0], [0], [1], [0, 0, 1, 1], [], []>} : vector<4x4xf32>, vector<4x256xf32>, vector<4x256xf32> -> vector<4x256xf32>
    %72 = arith.addf %67, %71 : vector<4x256xf32>
    %73 = vector.extract_strided_slice %6 {offsets = [2, 0, 0], sizes = [1, 4, 4], strides = [1, 1, 1]} : vector<9x4x4xf32> to vector<1x4x4xf32>
    %74 = vector.shape_cast %73 : vector<1x4x4xf32> to vector<4x4xf32>
    %75 = vector.extract_strided_slice %47 {offsets = [0, 1], sizes = [4, 256], strides = [1, 1]} : vector<4x290xf32> to vector<4x256xf32>
    %cst_40 = arith.constant dense<0.000000e+00> : vector<4x256xf32>
    %76 = tpu.matmul %74, %75, %cst_40 {dimension_numbers = #tpu.dot_dimension_numbers<[1], [0], [0], [1], [0, 0, 1, 1], [], []>} : vector<4x4xf32>, vector<4x256xf32>, vector<4x256xf32> -> vector<4x256xf32>
    %77 = arith.addf %72, %76 : vector<4x256xf32>
    %78 = vector.extract_strided_slice %7 {offsets = [2, 0, 0], sizes = [1, 4, 4], strides = [1, 1, 1]} : vector<9x4x4xf32> to vector<1x4x4xf32>
    %79 = vector.shape_cast %78 : vector<1x4x4xf32> to vector<4x4xf32>
    %80 = vector.extract_strided_slice %35 {offsets = [0, 1], sizes = [4, 256], strides = [1, 1]} : vector<4x290xf32> to vector<4x256xf32>
    %cst_41 = arith.constant dense<0.000000e+00> : vector<4x256xf32>
    %81 = tpu.matmul %79, %80, %cst_41 {dimension_numbers = #tpu.dot_dimension_numbers<[1], [0], [0], [1], [0, 0, 1, 1], [], []>} : vector<4x4xf32>, vector<4x256xf32>, vector<4x256xf32> -> vector<4x256xf32>
    %82 = arith.addf %77, %81 : vector<4x256xf32>
    %83 = vector.extract_strided_slice %6 {offsets = [3, 0, 0], sizes = [1, 4, 4], strides = [1, 1, 1]} : vector<9x4x4xf32> to vector<1x4x4xf32>
    %84 = vector.shape_cast %83 : vector<1x4x4xf32> to vector<4x4xf32>
    %85 = vector.extract_strided_slice %41 {offsets = [0, 16], sizes = [4, 256], strides = [1, 1]} : vector<4x290xf32> to vector<4x256xf32>
    %86 = vector.broadcast %1 : vector<1x256xf32> to vector<4x256xf32>
    %87 = arith.mulf %85, %86 : vector<4x256xf32>
    %cst_42 = arith.constant dense<0.000000e+00> : vector<4x256xf32>
    %88 = tpu.matmul %84, %87, %cst_42 {dimension_numbers = #tpu.dot_dimension_numbers<[1], [0], [0], [1], [0, 0, 1, 1], [], []>} : vector<4x4xf32>, vector<4x256xf32>, vector<4x256xf32> -> vector<4x256xf32>
    %89 = arith.addf %82, %88 : vector<4x256xf32>
    %90 = vector.extract_strided_slice %7 {offsets = [3, 0, 0], sizes = [1, 4, 4], strides = [1, 1, 1]} : vector<9x4x4xf32> to vector<1x4x4xf32>
    %91 = vector.shape_cast %90 : vector<1x4x4xf32> to vector<4x4xf32>
    %92 = vector.extract_strided_slice %25 {offsets = [0, 16], sizes = [4, 256], strides = [1, 1]} : vector<4x290xf32> to vector<4x256xf32>
    %93 = vector.broadcast %1 : vector<1x256xf32> to vector<4x256xf32>
    %94 = arith.mulf %92, %93 : vector<4x256xf32>
    %cst_43 = arith.constant dense<0.000000e+00> : vector<4x256xf32>
    %95 = tpu.matmul %91, %94, %cst_43 {dimension_numbers = #tpu.dot_dimension_numbers<[1], [0], [0], [1], [0, 0, 1, 1], [], []>} : vector<4x4xf32>, vector<4x256xf32>, vector<4x256xf32> -> vector<4x256xf32>
    %96 = arith.addf %89, %95 : vector<4x256xf32>
    %97 = vector.extract_strided_slice %6 {offsets = [4, 0, 0], sizes = [1, 4, 4], strides = [1, 1, 1]} : vector<9x4x4xf32> to vector<1x4x4xf32>
    %98 = vector.shape_cast %97 : vector<1x4x4xf32> to vector<4x4xf32>
    %99 = vector.extract_strided_slice %38 {offsets = [0, 17], sizes = [4, 256], strides = [1, 1]} : vector<4x290xf32> to vector<4x256xf32>
    %cst_44 = arith.constant dense<0.000000e+00> : vector<4x256xf32>
    %100 = tpu.matmul %98, %99, %cst_44 {dimension_numbers = #tpu.dot_dimension_numbers<[1], [0], [0], [1], [0, 0, 1, 1], [], []>} : vector<4x4xf32>, vector<4x256xf32>, vector<4x256xf32> -> vector<4x256xf32>
    %101 = arith.addf %96, %100 : vector<4x256xf32>
    %102 = vector.extract_strided_slice %7 {offsets = [4, 0, 0], sizes = [1, 4, 4], strides = [1, 1, 1]} : vector<9x4x4xf32> to vector<1x4x4xf32>
    %103 = vector.shape_cast %102 : vector<1x4x4xf32> to vector<4x4xf32>
    %104 = vector.extract_strided_slice %20 {offsets = [0, 17], sizes = [4, 256], strides = [1, 1]} : vector<4x290xf32> to vector<4x256xf32>
    %cst_45 = arith.constant dense<0.000000e+00> : vector<4x256xf32>
    %105 = tpu.matmul %103, %104, %cst_45 {dimension_numbers = #tpu.dot_dimension_numbers<[1], [0], [0], [1], [0, 0, 1, 1], [], []>} : vector<4x4xf32>, vector<4x256xf32>, vector<4x256xf32> -> vector<4x256xf32>
    %106 = arith.addf %101, %105 : vector<4x256xf32>
    %107 = vector.extract_strided_slice %6 {offsets = [5, 0, 0], sizes = [1, 4, 4], strides = [1, 1, 1]} : vector<9x4x4xf32> to vector<1x4x4xf32>
    %108 = vector.shape_cast %107 : vector<1x4x4xf32> to vector<4x4xf32>
    %109 = vector.extract_strided_slice %41 {offsets = [0, 17], sizes = [4, 256], strides = [1, 1]} : vector<4x290xf32> to vector<4x256xf32>
    %cst_46 = arith.constant dense<0.000000e+00> : vector<4x256xf32>
    %110 = tpu.matmul %108, %109, %cst_46 {dimension_numbers = #tpu.dot_dimension_numbers<[1], [0], [0], [1], [0, 0, 1, 1], [], []>} : vector<4x4xf32>, vector<4x256xf32>, vector<4x256xf32> -> vector<4x256xf32>
    %111 = arith.addf %106, %110 : vector<4x256xf32>
    %112 = vector.extract_strided_slice %7 {offsets = [5, 0, 0], sizes = [1, 4, 4], strides = [1, 1, 1]} : vector<9x4x4xf32> to vector<1x4x4xf32>
    %113 = vector.shape_cast %112 : vector<1x4x4xf32> to vector<4x4xf32>
    %114 = vector.extract_strided_slice %25 {offsets = [0, 17], sizes = [4, 256], strides = [1, 1]} : vector<4x290xf32> to vector<4x256xf32>
    %cst_47 = arith.constant dense<0.000000e+00> : vector<4x256xf32>
    %115 = tpu.matmul %113, %114, %cst_47 {dimension_numbers = #tpu.dot_dimension_numbers<[1], [0], [0], [1], [0, 0, 1, 1], [], []>} : vector<4x4xf32>, vector<4x256xf32>, vector<4x256xf32> -> vector<4x256xf32>
    %116 = arith.addf %111, %115 : vector<4x256xf32>
    %117 = vector.extract_strided_slice %6 {offsets = [6, 0, 0], sizes = [1, 4, 4], strides = [1, 1, 1]} : vector<9x4x4xf32> to vector<1x4x4xf32>
    %118 = vector.shape_cast %117 : vector<1x4x4xf32> to vector<4x4xf32>
    %119 = vector.extract_strided_slice %47 {offsets = [0, 16], sizes = [4, 256], strides = [1, 1]} : vector<4x290xf32> to vector<4x256xf32>
    %120 = vector.broadcast %1 : vector<1x256xf32> to vector<4x256xf32>
    %121 = arith.mulf %119, %120 : vector<4x256xf32>
    %cst_48 = arith.constant dense<0.000000e+00> : vector<4x256xf32>
    %122 = tpu.matmul %118, %121, %cst_48 {dimension_numbers = #tpu.dot_dimension_numbers<[1], [0], [0], [1], [0, 0, 1, 1], [], []>} : vector<4x4xf32>, vector<4x256xf32>, vector<4x256xf32> -> vector<4x256xf32>
    %123 = arith.addf %116, %122 : vector<4x256xf32>
    %124 = vector.extract_strided_slice %7 {offsets = [6, 0, 0], sizes = [1, 4, 4], strides = [1, 1, 1]} : vector<9x4x4xf32> to vector<1x4x4xf32>
    %125 = vector.shape_cast %124 : vector<1x4x4xf32> to vector<4x4xf32>
    %126 = vector.extract_strided_slice %35 {offsets = [0, 16], sizes = [4, 256], strides = [1, 1]} : vector<4x290xf32> to vector<4x256xf32>
    %127 = vector.broadcast %1 : vector<1x256xf32> to vector<4x256xf32>
    %128 = arith.mulf %126, %127 : vector<4x256xf32>
    %cst_49 = arith.constant dense<0.000000e+00> : vector<4x256xf32>
    %129 = tpu.matmul %125, %128, %cst_49 {dimension_numbers = #tpu.dot_dimension_numbers<[1], [0], [0], [1], [0, 0, 1, 1], [], []>} : vector<4x4xf32>, vector<4x256xf32>, vector<4x256xf32> -> vector<4x256xf32>
    %130 = arith.addf %123, %129 : vector<4x256xf32>
    %131 = vector.extract_strided_slice %6 {offsets = [7, 0, 0], sizes = [1, 4, 4], strides = [1, 1, 1]} : vector<9x4x4xf32> to vector<1x4x4xf32>
    %132 = vector.shape_cast %131 : vector<1x4x4xf32> to vector<4x4xf32>
    %133 = vector.extract_strided_slice %44 {offsets = [0, 17], sizes = [4, 256], strides = [1, 1]} : vector<4x290xf32> to vector<4x256xf32>
    %cst_50 = arith.constant dense<0.000000e+00> : vector<4x256xf32>
    %134 = tpu.matmul %132, %133, %cst_50 {dimension_numbers = #tpu.dot_dimension_numbers<[1], [0], [0], [1], [0, 0, 1, 1], [], []>} : vector<4x4xf32>, vector<4x256xf32>, vector<4x256xf32> -> vector<4x256xf32>
    %135 = arith.addf %130, %134 : vector<4x256xf32>
    %136 = vector.extract_strided_slice %7 {offsets = [7, 0, 0], sizes = [1, 4, 4], strides = [1, 1, 1]} : vector<9x4x4xf32> to vector<1x4x4xf32>
    %137 = vector.shape_cast %136 : vector<1x4x4xf32> to vector<4x4xf32>
    %138 = vector.extract_strided_slice %30 {offsets = [0, 17], sizes = [4, 256], strides = [1, 1]} : vector<4x290xf32> to vector<4x256xf32>
    %cst_51 = arith.constant dense<0.000000e+00> : vector<4x256xf32>
    %139 = tpu.matmul %137, %138, %cst_51 {dimension_numbers = #tpu.dot_dimension_numbers<[1], [0], [0], [1], [0, 0, 1, 1], [], []>} : vector<4x4xf32>, vector<4x256xf32>, vector<4x256xf32> -> vector<4x256xf32>
    %140 = arith.addf %135, %139 : vector<4x256xf32>
    %141 = vector.extract_strided_slice %6 {offsets = [8, 0, 0], sizes = [1, 4, 4], strides = [1, 1, 1]} : vector<9x4x4xf32> to vector<1x4x4xf32>
    %142 = vector.shape_cast %141 : vector<1x4x4xf32> to vector<4x4xf32>
    %143 = vector.extract_strided_slice %47 {offsets = [0, 17], sizes = [4, 256], strides = [1, 1]} : vector<4x290xf32> to vector<4x256xf32>
    %cst_52 = arith.constant dense<0.000000e+00> : vector<4x256xf32>
    %144 = tpu.matmul %142, %143, %cst_52 {dimension_numbers = #tpu.dot_dimension_numbers<[1], [0], [0], [1], [0, 0, 1, 1], [], []>} : vector<4x4xf32>, vector<4x256xf32>, vector<4x256xf32> -> vector<4x256xf32>
    %145 = arith.addf %140, %144 : vector<4x256xf32>
    %146 = vector.extract_strided_slice %7 {offsets = [8, 0, 0], sizes = [1, 4, 4], strides = [1, 1, 1]} : vector<9x4x4xf32> to vector<1x4x4xf32>
    %147 = vector.shape_cast %146 : vector<1x4x4xf32> to vector<4x4xf32>
    %148 = vector.extract_strided_slice %35 {offsets = [0, 17], sizes = [4, 256], strides = [1, 1]} : vector<4x290xf32> to vector<4x256xf32>
    %cst_53 = arith.constant dense<0.000000e+00> : vector<4x256xf32>
    %149 = tpu.matmul %147, %148, %cst_53 {dimension_numbers = #tpu.dot_dimension_numbers<[1], [0], [0], [1], [0, 0, 1, 1], [], []>} : vector<4x4xf32>, vector<4x256xf32>, vector<4x256xf32> -> vector<4x256xf32>
    %150 = arith.addf %145, %149 : vector<4x256xf32>
    %151 = vector.broadcast %8 : vector<4x1xf32> to vector<4x256xf32>
    %152 = arith.addf %150, %151 : vector<4x256xf32>
    %cst_54 = arith.constant 0.000000e+00 : f32
    %153 = vector.broadcast %cst_54 : f32 to vector<4x256xf32>
    %154 = arith.maximumf %152, %153 : vector<4x256xf32>
    %cst_55 = arith.constant 0.000000e+00 : f32
    %155 = vector.broadcast %cst_55 : f32 to vector<4x256xf32>
    %156 = vector.extract_strided_slice %6 {offsets = [0, 0, 0], sizes = [1, 4, 4], strides = [1, 1, 1]} : vector<9x4x4xf32> to vector<1x4x4xf32>
    %157 = vector.shape_cast %156 : vector<1x4x4xf32> to vector<4x4xf32>
    %cst_56 = arith.constant dense<0.000000e+00> : vector<4x256xf32>
    %158 = tpu.matmul %157, %65, %cst_56 {dimension_numbers = #tpu.dot_dimension_numbers<[1], [0], [0], [1], [0, 0, 1, 1], [], []>} : vector<4x4xf32>, vector<4x256xf32>, vector<4x256xf32> -> vector<4x256xf32>
    %159 = arith.addf %155, %158 : vector<4x256xf32>
    %160 = vector.extract_strided_slice %7 {offsets = [0, 0, 0], sizes = [1, 4, 4], strides = [1, 1, 1]} : vector<9x4x4xf32> to vector<1x4x4xf32>
    %161 = vector.shape_cast %160 : vector<1x4x4xf32> to vector<4x4xf32>
    %cst_57 = arith.constant dense<0.000000e+00> : vector<4x256xf32>
    %162 = tpu.matmul %161, %70, %cst_57 {dimension_numbers = #tpu.dot_dimension_numbers<[1], [0], [0], [1], [0, 0, 1, 1], [], []>} : vector<4x4xf32>, vector<4x256xf32>, vector<4x256xf32> -> vector<4x256xf32>
    %163 = arith.addf %159, %162 : vector<4x256xf32>
    %164 = vector.extract_strided_slice %6 {offsets = [1, 0, 0], sizes = [1, 4, 4], strides = [1, 1, 1]} : vector<9x4x4xf32> to vector<1x4x4xf32>
    %165 = vector.shape_cast %164 : vector<1x4x4xf32> to vector<4x4xf32>
    %cst_58 = arith.constant dense<0.000000e+00> : vector<4x256xf32>
    %166 = tpu.matmul %165, %75, %cst_58 {dimension_numbers = #tpu.dot_dimension_numbers<[1], [0], [0], [1], [0, 0, 1, 1], [], []>} : vector<4x4xf32>, vector<4x256xf32>, vector<4x256xf32> -> vector<4x256xf32>
    %167 = arith.addf %163, %166 : vector<4x256xf32>
    %168 = vector.extract_strided_slice %7 {offsets = [1, 0, 0], sizes = [1, 4, 4], strides = [1, 1, 1]} : vector<9x4x4xf32> to vector<1x4x4xf32>
    %169 = vector.shape_cast %168 : vector<1x4x4xf32> to vector<4x4xf32>
    %cst_59 = arith.constant dense<0.000000e+00> : vector<4x256xf32>
    %170 = tpu.matmul %169, %80, %cst_59 {dimension_numbers = #tpu.dot_dimension_numbers<[1], [0], [0], [1], [0, 0, 1, 1], [], []>} : vector<4x4xf32>, vector<4x256xf32>, vector<4x256xf32> -> vector<4x256xf32>
    %171 = arith.addf %167, %170 : vector<4x256xf32>
    %172 = vector.extract_strided_slice %6 {offsets = [2, 0, 0], sizes = [1, 4, 4], strides = [1, 1, 1]} : vector<9x4x4xf32> to vector<1x4x4xf32>
    %173 = vector.shape_cast %172 : vector<1x4x4xf32> to vector<4x4xf32>
    %174 = vector.extract_strided_slice %44 {offsets = [0, 2], sizes = [4, 256], strides = [1, 1]} : vector<4x290xf32> to vector<4x256xf32>
    %175 = vector.broadcast %3 : vector<1x256xf32> to vector<4x256xf32>
    %176 = arith.mulf %174, %175 : vector<4x256xf32>
    %cst_60 = arith.constant dense<0.000000e+00> : vector<4x256xf32>
    %177 = tpu.matmul %173, %176, %cst_60 {dimension_numbers = #tpu.dot_dimension_numbers<[1], [0], [0], [1], [0, 0, 1, 1], [], []>} : vector<4x4xf32>, vector<4x256xf32>, vector<4x256xf32> -> vector<4x256xf32>
    %178 = arith.addf %171, %177 : vector<4x256xf32>
    %179 = vector.extract_strided_slice %7 {offsets = [2, 0, 0], sizes = [1, 4, 4], strides = [1, 1, 1]} : vector<9x4x4xf32> to vector<1x4x4xf32>
    %180 = vector.shape_cast %179 : vector<1x4x4xf32> to vector<4x4xf32>
    %181 = vector.extract_strided_slice %30 {offsets = [0, 2], sizes = [4, 256], strides = [1, 1]} : vector<4x290xf32> to vector<4x256xf32>
    %182 = vector.broadcast %3 : vector<1x256xf32> to vector<4x256xf32>
    %183 = arith.mulf %181, %182 : vector<4x256xf32>
    %cst_61 = arith.constant dense<0.000000e+00> : vector<4x256xf32>
    %184 = tpu.matmul %180, %183, %cst_61 {dimension_numbers = #tpu.dot_dimension_numbers<[1], [0], [0], [1], [0, 0, 1, 1], [], []>} : vector<4x4xf32>, vector<4x256xf32>, vector<4x256xf32> -> vector<4x256xf32>
    %185 = arith.addf %178, %184 : vector<4x256xf32>
    %186 = vector.extract_strided_slice %6 {offsets = [3, 0, 0], sizes = [1, 4, 4], strides = [1, 1, 1]} : vector<9x4x4xf32> to vector<1x4x4xf32>
    %187 = vector.shape_cast %186 : vector<1x4x4xf32> to vector<4x4xf32>
    %cst_62 = arith.constant dense<0.000000e+00> : vector<4x256xf32>
    %188 = tpu.matmul %187, %99, %cst_62 {dimension_numbers = #tpu.dot_dimension_numbers<[1], [0], [0], [1], [0, 0, 1, 1], [], []>} : vector<4x4xf32>, vector<4x256xf32>, vector<4x256xf32> -> vector<4x256xf32>
    %189 = arith.addf %185, %188 : vector<4x256xf32>
    %190 = vector.extract_strided_slice %7 {offsets = [3, 0, 0], sizes = [1, 4, 4], strides = [1, 1, 1]} : vector<9x4x4xf32> to vector<1x4x4xf32>
    %191 = vector.shape_cast %190 : vector<1x4x4xf32> to vector<4x4xf32>
    %cst_63 = arith.constant dense<0.000000e+00> : vector<4x256xf32>
    %192 = tpu.matmul %191, %104, %cst_63 {dimension_numbers = #tpu.dot_dimension_numbers<[1], [0], [0], [1], [0, 0, 1, 1], [], []>} : vector<4x4xf32>, vector<4x256xf32>, vector<4x256xf32> -> vector<4x256xf32>
    %193 = arith.addf %189, %192 : vector<4x256xf32>
    %194 = vector.extract_strided_slice %6 {offsets = [4, 0, 0], sizes = [1, 4, 4], strides = [1, 1, 1]} : vector<9x4x4xf32> to vector<1x4x4xf32>
    %195 = vector.shape_cast %194 : vector<1x4x4xf32> to vector<4x4xf32>
    %cst_64 = arith.constant dense<0.000000e+00> : vector<4x256xf32>
    %196 = tpu.matmul %195, %109, %cst_64 {dimension_numbers = #tpu.dot_dimension_numbers<[1], [0], [0], [1], [0, 0, 1, 1], [], []>} : vector<4x4xf32>, vector<4x256xf32>, vector<4x256xf32> -> vector<4x256xf32>
    %197 = arith.addf %193, %196 : vector<4x256xf32>
    %198 = vector.extract_strided_slice %7 {offsets = [4, 0, 0], sizes = [1, 4, 4], strides = [1, 1, 1]} : vector<9x4x4xf32> to vector<1x4x4xf32>
    %199 = vector.shape_cast %198 : vector<1x4x4xf32> to vector<4x4xf32>
    %cst_65 = arith.constant dense<0.000000e+00> : vector<4x256xf32>
    %200 = tpu.matmul %199, %114, %cst_65 {dimension_numbers = #tpu.dot_dimension_numbers<[1], [0], [0], [1], [0, 0, 1, 1], [], []>} : vector<4x4xf32>, vector<4x256xf32>, vector<4x256xf32> -> vector<4x256xf32>
    %201 = arith.addf %197, %200 : vector<4x256xf32>
    %202 = vector.extract_strided_slice %6 {offsets = [5, 0, 0], sizes = [1, 4, 4], strides = [1, 1, 1]} : vector<9x4x4xf32> to vector<1x4x4xf32>
    %203 = vector.shape_cast %202 : vector<1x4x4xf32> to vector<4x4xf32>
    %204 = vector.extract_strided_slice %38 {offsets = [0, 18], sizes = [4, 256], strides = [1, 1]} : vector<4x290xf32> to vector<4x256xf32>
    %205 = vector.broadcast %3 : vector<1x256xf32> to vector<4x256xf32>
    %206 = arith.mulf %204, %205 : vector<4x256xf32>
    %cst_66 = arith.constant dense<0.000000e+00> : vector<4x256xf32>
    %207 = tpu.matmul %203, %206, %cst_66 {dimension_numbers = #tpu.dot_dimension_numbers<[1], [0], [0], [1], [0, 0, 1, 1], [], []>} : vector<4x4xf32>, vector<4x256xf32>, vector<4x256xf32> -> vector<4x256xf32>
    %208 = arith.addf %201, %207 : vector<4x256xf32>
    %209 = vector.extract_strided_slice %7 {offsets = [5, 0, 0], sizes = [1, 4, 4], strides = [1, 1, 1]} : vector<9x4x4xf32> to vector<1x4x4xf32>
    %210 = vector.shape_cast %209 : vector<1x4x4xf32> to vector<4x4xf32>
    %211 = vector.extract_strided_slice %20 {offsets = [0, 18], sizes = [4, 256], strides = [1, 1]} : vector<4x290xf32> to vector<4x256xf32>
    %212 = vector.broadcast %3 : vector<1x256xf32> to vector<4x256xf32>
    %213 = arith.mulf %211, %212 : vector<4x256xf32>
    %cst_67 = arith.constant dense<0.000000e+00> : vector<4x256xf32>
    %214 = tpu.matmul %210, %213, %cst_67 {dimension_numbers = #tpu.dot_dimension_numbers<[1], [0], [0], [1], [0, 0, 1, 1], [], []>} : vector<4x4xf32>, vector<4x256xf32>, vector<4x256xf32> -> vector<4x256xf32>
    %215 = arith.addf %208, %214 : vector<4x256xf32>
    %216 = vector.extract_strided_slice %6 {offsets = [6, 0, 0], sizes = [1, 4, 4], strides = [1, 1, 1]} : vector<9x4x4xf32> to vector<1x4x4xf32>
    %217 = vector.shape_cast %216 : vector<1x4x4xf32> to vector<4x4xf32>
    %cst_68 = arith.constant dense<0.000000e+00> : vector<4x256xf32>
    %218 = tpu.matmul %217, %133, %cst_68 {dimension_numbers = #tpu.dot_dimension_numbers<[1], [0], [0], [1], [0, 0, 1, 1], [], []>} : vector<4x4xf32>, vector<4x256xf32>, vector<4x256xf32> -> vector<4x256xf32>
    %219 = arith.addf %215, %218 : vector<4x256xf32>
    %220 = vector.extract_strided_slice %7 {offsets = [6, 0, 0], sizes = [1, 4, 4], strides = [1, 1, 1]} : vector<9x4x4xf32> to vector<1x4x4xf32>
    %221 = vector.shape_cast %220 : vector<1x4x4xf32> to vector<4x4xf32>
    %cst_69 = arith.constant dense<0.000000e+00> : vector<4x256xf32>
    %222 = tpu.matmul %221, %138, %cst_69 {dimension_numbers = #tpu.dot_dimension_numbers<[1], [0], [0], [1], [0, 0, 1, 1], [], []>} : vector<4x4xf32>, vector<4x256xf32>, vector<4x256xf32> -> vector<4x256xf32>
    %223 = arith.addf %219, %222 : vector<4x256xf32>
    %224 = vector.extract_strided_slice %6 {offsets = [7, 0, 0], sizes = [1, 4, 4], strides = [1, 1, 1]} : vector<9x4x4xf32> to vector<1x4x4xf32>
    %225 = vector.shape_cast %224 : vector<1x4x4xf32> to vector<4x4xf32>
    %cst_70 = arith.constant dense<0.000000e+00> : vector<4x256xf32>
    %226 = tpu.matmul %225, %143, %cst_70 {dimension_numbers = #tpu.dot_dimension_numbers<[1], [0], [0], [1], [0, 0, 1, 1], [], []>} : vector<4x4xf32>, vector<4x256xf32>, vector<4x256xf32> -> vector<4x256xf32>
    %227 = arith.addf %223, %226 : vector<4x256xf32>
    %228 = vector.extract_strided_slice %7 {offsets = [7, 0, 0], sizes = [1, 4, 4], strides = [1, 1, 1]} : vector<9x4x4xf32> to vector<1x4x4xf32>
    %229 = vector.shape_cast %228 : vector<1x4x4xf32> to vector<4x4xf32>
    %cst_71 = arith.constant dense<0.000000e+00> : vector<4x256xf32>
    %230 = tpu.matmul %229, %148, %cst_71 {dimension_numbers = #tpu.dot_dimension_numbers<[1], [0], [0], [1], [0, 0, 1, 1], [], []>} : vector<4x4xf32>, vector<4x256xf32>, vector<4x256xf32> -> vector<4x256xf32>
    %231 = arith.addf %227, %230 : vector<4x256xf32>
    %232 = vector.extract_strided_slice %6 {offsets = [8, 0, 0], sizes = [1, 4, 4], strides = [1, 1, 1]} : vector<9x4x4xf32> to vector<1x4x4xf32>
    %233 = vector.shape_cast %232 : vector<1x4x4xf32> to vector<4x4xf32>
    %234 = vector.extract_strided_slice %44 {offsets = [0, 18], sizes = [4, 256], strides = [1, 1]} : vector<4x290xf32> to vector<4x256xf32>
    %235 = vector.broadcast %3 : vector<1x256xf32> to vector<4x256xf32>
    %236 = arith.mulf %234, %235 : vector<4x256xf32>
    %cst_72 = arith.constant dense<0.000000e+00> : vector<4x256xf32>
    %237 = tpu.matmul %233, %236, %cst_72 {dimension_numbers = #tpu.dot_dimension_numbers<[1], [0], [0], [1], [0, 0, 1, 1], [], []>} : vector<4x4xf32>, vector<4x256xf32>, vector<4x256xf32> -> vector<4x256xf32>
    %238 = arith.addf %231, %237 : vector<4x256xf32>
    %239 = vector.extract_strided_slice %7 {offsets = [8, 0, 0], sizes = [1, 4, 4], strides = [1, 1, 1]} : vector<9x4x4xf32> to vector<1x4x4xf32>
    %240 = vector.shape_cast %239 : vector<1x4x4xf32> to vector<4x4xf32>
    %241 = vector.extract_strided_slice %30 {offsets = [0, 18], sizes = [4, 256], strides = [1, 1]} : vector<4x290xf32> to vector<4x256xf32>
    %242 = vector.broadcast %3 : vector<1x256xf32> to vector<4x256xf32>
    %243 = arith.mulf %241, %242 : vector<4x256xf32>
    %cst_73 = arith.constant dense<0.000000e+00> : vector<4x256xf32>
    %244 = tpu.matmul %240, %243, %cst_73 {dimension_numbers = #tpu.dot_dimension_numbers<[1], [0], [0], [1], [0, 0, 1, 1], [], []>} : vector<4x4xf32>, vector<4x256xf32>, vector<4x256xf32> -> vector<4x256xf32>
    %245 = arith.addf %238, %244 : vector<4x256xf32>
    %246 = vector.broadcast %8 : vector<4x1xf32> to vector<4x256xf32>
    %247 = arith.addf %245, %246 : vector<4x256xf32>
    %cst_74 = arith.constant 0.000000e+00 : f32
    %248 = vector.broadcast %cst_74 : f32 to vector<4x256xf32>
    %249 = arith.maximumf %247, %248 : vector<4x256xf32>
    %cst_75 = arith.constant 0.000000e+00 : f32
    %250 = vector.broadcast %cst_75 : f32 to vector<4x256xf32>
    %251 = vector.extract_strided_slice %6 {offsets = [0, 0, 0], sizes = [1, 4, 4], strides = [1, 1, 1]} : vector<9x4x4xf32> to vector<1x4x4xf32>
    %252 = vector.shape_cast %251 : vector<1x4x4xf32> to vector<4x4xf32>
    %cst_76 = arith.constant dense<0.000000e+00> : vector<4x256xf32>
    %253 = tpu.matmul %252, %87, %cst_76 {dimension_numbers = #tpu.dot_dimension_numbers<[1], [0], [0], [1], [0, 0, 1, 1], [], []>} : vector<4x4xf32>, vector<4x256xf32>, vector<4x256xf32> -> vector<4x256xf32>
    %254 = arith.addf %250, %253 : vector<4x256xf32>
    %255 = vector.extract_strided_slice %7 {offsets = [0, 0, 0], sizes = [1, 4, 4], strides = [1, 1, 1]} : vector<9x4x4xf32> to vector<1x4x4xf32>
    %256 = vector.shape_cast %255 : vector<1x4x4xf32> to vector<4x4xf32>
    %cst_77 = arith.constant dense<0.000000e+00> : vector<4x256xf32>
    %257 = tpu.matmul %256, %94, %cst_77 {dimension_numbers = #tpu.dot_dimension_numbers<[1], [0], [0], [1], [0, 0, 1, 1], [], []>} : vector<4x4xf32>, vector<4x256xf32>, vector<4x256xf32> -> vector<4x256xf32>
    %258 = arith.addf %254, %257 : vector<4x256xf32>
    %259 = vector.extract_strided_slice %6 {offsets = [1, 0, 0], sizes = [1, 4, 4], strides = [1, 1, 1]} : vector<9x4x4xf32> to vector<1x4x4xf32>
    %260 = vector.shape_cast %259 : vector<1x4x4xf32> to vector<4x4xf32>
    %cst_78 = arith.constant dense<0.000000e+00> : vector<4x256xf32>
    %261 = tpu.matmul %260, %99, %cst_78 {dimension_numbers = #tpu.dot_dimension_numbers<[1], [0], [0], [1], [0, 0, 1, 1], [], []>} : vector<4x4xf32>, vector<4x256xf32>, vector<4x256xf32> -> vector<4x256xf32>
    %262 = arith.addf %258, %261 : vector<4x256xf32>
    %263 = vector.extract_strided_slice %7 {offsets = [1, 0, 0], sizes = [1, 4, 4], strides = [1, 1, 1]} : vector<9x4x4xf32> to vector<1x4x4xf32>
    %264 = vector.shape_cast %263 : vector<1x4x4xf32> to vector<4x4xf32>
    %cst_79 = arith.constant dense<0.000000e+00> : vector<4x256xf32>
    %265 = tpu.matmul %264, %104, %cst_79 {dimension_numbers = #tpu.dot_dimension_numbers<[1], [0], [0], [1], [0, 0, 1, 1], [], []>} : vector<4x4xf32>, vector<4x256xf32>, vector<4x256xf32> -> vector<4x256xf32>
    %266 = arith.addf %262, %265 : vector<4x256xf32>
    %267 = vector.extract_strided_slice %6 {offsets = [2, 0, 0], sizes = [1, 4, 4], strides = [1, 1, 1]} : vector<9x4x4xf32> to vector<1x4x4xf32>
    %268 = vector.shape_cast %267 : vector<1x4x4xf32> to vector<4x4xf32>
    %cst_80 = arith.constant dense<0.000000e+00> : vector<4x256xf32>
    %269 = tpu.matmul %268, %109, %cst_80 {dimension_numbers = #tpu.dot_dimension_numbers<[1], [0], [0], [1], [0, 0, 1, 1], [], []>} : vector<4x4xf32>, vector<4x256xf32>, vector<4x256xf32> -> vector<4x256xf32>
    %270 = arith.addf %266, %269 : vector<4x256xf32>
    %271 = vector.extract_strided_slice %7 {offsets = [2, 0, 0], sizes = [1, 4, 4], strides = [1, 1, 1]} : vector<9x4x4xf32> to vector<1x4x4xf32>
    %272 = vector.shape_cast %271 : vector<1x4x4xf32> to vector<4x4xf32>
    %cst_81 = arith.constant dense<0.000000e+00> : vector<4x256xf32>
    %273 = tpu.matmul %272, %114, %cst_81 {dimension_numbers = #tpu.dot_dimension_numbers<[1], [0], [0], [1], [0, 0, 1, 1], [], []>} : vector<4x4xf32>, vector<4x256xf32>, vector<4x256xf32> -> vector<4x256xf32>
    %274 = arith.addf %270, %273 : vector<4x256xf32>
    %275 = vector.extract_strided_slice %6 {offsets = [3, 0, 0], sizes = [1, 4, 4], strides = [1, 1, 1]} : vector<9x4x4xf32> to vector<1x4x4xf32>
    %276 = vector.shape_cast %275 : vector<1x4x4xf32> to vector<4x4xf32>
    %cst_82 = arith.constant dense<0.000000e+00> : vector<4x256xf32>
    %277 = tpu.matmul %276, %121, %cst_82 {dimension_numbers = #tpu.dot_dimension_numbers<[1], [0], [0], [1], [0, 0, 1, 1], [], []>} : vector<4x4xf32>, vector<4x256xf32>, vector<4x256xf32> -> vector<4x256xf32>
    %278 = arith.addf %274, %277 : vector<4x256xf32>
    %279 = vector.extract_strided_slice %7 {offsets = [3, 0, 0], sizes = [1, 4, 4], strides = [1, 1, 1]} : vector<9x4x4xf32> to vector<1x4x4xf32>
    %280 = vector.shape_cast %279 : vector<1x4x4xf32> to vector<4x4xf32>
    %cst_83 = arith.constant dense<0.000000e+00> : vector<4x256xf32>
    %281 = tpu.matmul %280, %128, %cst_83 {dimension_numbers = #tpu.dot_dimension_numbers<[1], [0], [0], [1], [0, 0, 1, 1], [], []>} : vector<4x4xf32>, vector<4x256xf32>, vector<4x256xf32> -> vector<4x256xf32>
    %282 = arith.addf %278, %281 : vector<4x256xf32>
    %283 = vector.extract_strided_slice %6 {offsets = [4, 0, 0], sizes = [1, 4, 4], strides = [1, 1, 1]} : vector<9x4x4xf32> to vector<1x4x4xf32>
    %284 = vector.shape_cast %283 : vector<1x4x4xf32> to vector<4x4xf32>
    %cst_84 = arith.constant dense<0.000000e+00> : vector<4x256xf32>
    %285 = tpu.matmul %284, %133, %cst_84 {dimension_numbers = #tpu.dot_dimension_numbers<[1], [0], [0], [1], [0, 0, 1, 1], [], []>} : vector<4x4xf32>, vector<4x256xf32>, vector<4x256xf32> -> vector<4x256xf32>
    %286 = arith.addf %282, %285 : vector<4x256xf32>
    %287 = vector.extract_strided_slice %7 {offsets = [4, 0, 0], sizes = [1, 4, 4], strides = [1, 1, 1]} : vector<9x4x4xf32> to vector<1x4x4xf32>
    %288 = vector.shape_cast %287 : vector<1x4x4xf32> to vector<4x4xf32>
    %cst_85 = arith.constant dense<0.000000e+00> : vector<4x256xf32>
    %289 = tpu.matmul %288, %138, %cst_85 {dimension_numbers = #tpu.dot_dimension_numbers<[1], [0], [0], [1], [0, 0, 1, 1], [], []>} : vector<4x4xf32>, vector<4x256xf32>, vector<4x256xf32> -> vector<4x256xf32>
    %290 = arith.addf %286, %289 : vector<4x256xf32>
    %291 = vector.extract_strided_slice %6 {offsets = [5, 0, 0], sizes = [1, 4, 4], strides = [1, 1, 1]} : vector<9x4x4xf32> to vector<1x4x4xf32>
    %292 = vector.shape_cast %291 : vector<1x4x4xf32> to vector<4x4xf32>
    %cst_86 = arith.constant dense<0.000000e+00> : vector<4x256xf32>
    %293 = tpu.matmul %292, %143, %cst_86 {dimension_numbers = #tpu.dot_dimension_numbers<[1], [0], [0], [1], [0, 0, 1, 1], [], []>} : vector<4x4xf32>, vector<4x256xf32>, vector<4x256xf32> -> vector<4x256xf32>
    %294 = arith.addf %290, %293 : vector<4x256xf32>
    %295 = vector.extract_strided_slice %7 {offsets = [5, 0, 0], sizes = [1, 4, 4], strides = [1, 1, 1]} : vector<9x4x4xf32> to vector<1x4x4xf32>
    %296 = vector.shape_cast %295 : vector<1x4x4xf32> to vector<4x4xf32>
    %cst_87 = arith.constant dense<0.000000e+00> : vector<4x256xf32>
    %297 = tpu.matmul %296, %148, %cst_87 {dimension_numbers = #tpu.dot_dimension_numbers<[1], [0], [0], [1], [0, 0, 1, 1], [], []>} : vector<4x4xf32>, vector<4x256xf32>, vector<4x256xf32> -> vector<4x256xf32>
    %298 = arith.addf %294, %297 : vector<4x256xf32>
    %299 = vector.extract_strided_slice %6 {offsets = [6, 0, 0], sizes = [1, 4, 4], strides = [1, 1, 1]} : vector<9x4x4xf32> to vector<1x4x4xf32>
    %300 = vector.shape_cast %299 : vector<1x4x4xf32> to vector<4x4xf32>
    %301 = vector.extract_strided_slice %41 {offsets = [0, 32], sizes = [4, 256], strides = [1, 1]} : vector<4x290xf32> to vector<4x256xf32>
    %302 = vector.broadcast %1 : vector<1x256xf32> to vector<4x256xf32>
    %303 = arith.mulf %301, %302 : vector<4x256xf32>
    %cst_88 = arith.constant dense<0.000000e+00> : vector<4x256xf32>
    %304 = tpu.matmul %300, %303, %cst_88 {dimension_numbers = #tpu.dot_dimension_numbers<[1], [0], [0], [1], [0, 0, 1, 1], [], []>} : vector<4x4xf32>, vector<4x256xf32>, vector<4x256xf32> -> vector<4x256xf32>
    %305 = arith.addf %298, %304 : vector<4x256xf32>
    %306 = vector.extract_strided_slice %7 {offsets = [6, 0, 0], sizes = [1, 4, 4], strides = [1, 1, 1]} : vector<9x4x4xf32> to vector<1x4x4xf32>
    %307 = vector.shape_cast %306 : vector<1x4x4xf32> to vector<4x4xf32>
    %308 = vector.extract_strided_slice %25 {offsets = [0, 32], sizes = [4, 256], strides = [1, 1]} : vector<4x290xf32> to vector<4x256xf32>
    %309 = vector.broadcast %1 : vector<1x256xf32> to vector<4x256xf32>
    %310 = arith.mulf %308, %309 : vector<4x256xf32>
    %cst_89 = arith.constant dense<0.000000e+00> : vector<4x256xf32>
    %311 = tpu.matmul %307, %310, %cst_89 {dimension_numbers = #tpu.dot_dimension_numbers<[1], [0], [0], [1], [0, 0, 1, 1], [], []>} : vector<4x4xf32>, vector<4x256xf32>, vector<4x256xf32> -> vector<4x256xf32>
    %312 = arith.addf %305, %311 : vector<4x256xf32>
    %313 = vector.extract_strided_slice %6 {offsets = [7, 0, 0], sizes = [1, 4, 4], strides = [1, 1, 1]} : vector<9x4x4xf32> to vector<1x4x4xf32>
    %314 = vector.shape_cast %313 : vector<1x4x4xf32> to vector<4x4xf32>
    %315 = vector.extract_strided_slice %38 {offsets = [0, 33], sizes = [4, 256], strides = [1, 1]} : vector<4x290xf32> to vector<4x256xf32>
    %cst_90 = arith.constant dense<0.000000e+00> : vector<4x256xf32>
    %316 = tpu.matmul %314, %315, %cst_90 {dimension_numbers = #tpu.dot_dimension_numbers<[1], [0], [0], [1], [0, 0, 1, 1], [], []>} : vector<4x4xf32>, vector<4x256xf32>, vector<4x256xf32> -> vector<4x256xf32>
    %317 = arith.addf %312, %316 : vector<4x256xf32>
    %318 = vector.extract_strided_slice %7 {offsets = [7, 0, 0], sizes = [1, 4, 4], strides = [1, 1, 1]} : vector<9x4x4xf32> to vector<1x4x4xf32>
    %319 = vector.shape_cast %318 : vector<1x4x4xf32> to vector<4x4xf32>
    %320 = vector.extract_strided_slice %20 {offsets = [0, 33], sizes = [4, 256], strides = [1, 1]} : vector<4x290xf32> to vector<4x256xf32>
    %cst_91 = arith.constant dense<0.000000e+00> : vector<4x256xf32>
    %321 = tpu.matmul %319, %320, %cst_91 {dimension_numbers = #tpu.dot_dimension_numbers<[1], [0], [0], [1], [0, 0, 1, 1], [], []>} : vector<4x4xf32>, vector<4x256xf32>, vector<4x256xf32> -> vector<4x256xf32>
    %322 = arith.addf %317, %321 : vector<4x256xf32>
    %323 = vector.extract_strided_slice %6 {offsets = [8, 0, 0], sizes = [1, 4, 4], strides = [1, 1, 1]} : vector<9x4x4xf32> to vector<1x4x4xf32>
    %324 = vector.shape_cast %323 : vector<1x4x4xf32> to vector<4x4xf32>
    %325 = vector.extract_strided_slice %41 {offsets = [0, 33], sizes = [4, 256], strides = [1, 1]} : vector<4x290xf32> to vector<4x256xf32>
    %cst_92 = arith.constant dense<0.000000e+00> : vector<4x256xf32>
    %326 = tpu.matmul %324, %325, %cst_92 {dimension_numbers = #tpu.dot_dimension_numbers<[1], [0], [0], [1], [0, 0, 1, 1], [], []>} : vector<4x4xf32>, vector<4x256xf32>, vector<4x256xf32> -> vector<4x256xf32>
    %327 = arith.addf %322, %326 : vector<4x256xf32>
    %328 = vector.extract_strided_slice %7 {offsets = [8, 0, 0], sizes = [1, 4, 4], strides = [1, 1, 1]} : vector<9x4x4xf32> to vector<1x4x4xf32>
    %329 = vector.shape_cast %328 : vector<1x4x4xf32> to vector<4x4xf32>
    %330 = vector.extract_strided_slice %25 {offsets = [0, 33], sizes = [4, 256], strides = [1, 1]} : vector<4x290xf32> to vector<4x256xf32>
    %cst_93 = arith.constant dense<0.000000e+00> : vector<4x256xf32>
    %331 = tpu.matmul %329, %330, %cst_93 {dimension_numbers = #tpu.dot_dimension_numbers<[1], [0], [0], [1], [0, 0, 1, 1], [], []>} : vector<4x4xf32>, vector<4x256xf32>, vector<4x256xf32> -> vector<4x256xf32>
    %332 = arith.addf %327, %331 : vector<4x256xf32>
    %333 = vector.broadcast %8 : vector<4x1xf32> to vector<4x256xf32>
    %334 = arith.addf %332, %333 : vector<4x256xf32>
    %cst_94 = arith.constant 0.000000e+00 : f32
    %335 = vector.broadcast %cst_94 : f32 to vector<4x256xf32>
    %336 = arith.maximumf %334, %335 : vector<4x256xf32>
    %cst_95 = arith.constant 0.000000e+00 : f32
    %337 = vector.broadcast %cst_95 : f32 to vector<4x256xf32>
    %338 = vector.extract_strided_slice %6 {offsets = [0, 0, 0], sizes = [1, 4, 4], strides = [1, 1, 1]} : vector<9x4x4xf32> to vector<1x4x4xf32>
    %339 = vector.shape_cast %338 : vector<1x4x4xf32> to vector<4x4xf32>
    %cst_96 = arith.constant dense<0.000000e+00> : vector<4x256xf32>
    %340 = tpu.matmul %339, %99, %cst_96 {dimension_numbers = #tpu.dot_dimension_numbers<[1], [0], [0], [1], [0, 0, 1, 1], [], []>} : vector<4x4xf32>, vector<4x256xf32>, vector<4x256xf32> -> vector<4x256xf32>
    %341 = arith.addf %337, %340 : vector<4x256xf32>
    %342 = vector.extract_strided_slice %7 {offsets = [0, 0, 0], sizes = [1, 4, 4], strides = [1, 1, 1]} : vector<9x4x4xf32> to vector<1x4x4xf32>
    %343 = vector.shape_cast %342 : vector<1x4x4xf32> to vector<4x4xf32>
    %cst_97 = arith.constant dense<0.000000e+00> : vector<4x256xf32>
    %344 = tpu.matmul %343, %104, %cst_97 {dimension_numbers = #tpu.dot_dimension_numbers<[1], [0], [0], [1], [0, 0, 1, 1], [], []>} : vector<4x4xf32>, vector<4x256xf32>, vector<4x256xf32> -> vector<4x256xf32>
    %345 = arith.addf %341, %344 : vector<4x256xf32>
    %346 = vector.extract_strided_slice %6 {offsets = [1, 0, 0], sizes = [1, 4, 4], strides = [1, 1, 1]} : vector<9x4x4xf32> to vector<1x4x4xf32>
    %347 = vector.shape_cast %346 : vector<1x4x4xf32> to vector<4x4xf32>
    %cst_98 = arith.constant dense<0.000000e+00> : vector<4x256xf32>
    %348 = tpu.matmul %347, %109, %cst_98 {dimension_numbers = #tpu.dot_dimension_numbers<[1], [0], [0], [1], [0, 0, 1, 1], [], []>} : vector<4x4xf32>, vector<4x256xf32>, vector<4x256xf32> -> vector<4x256xf32>
    %349 = arith.addf %345, %348 : vector<4x256xf32>
    %350 = vector.extract_strided_slice %7 {offsets = [1, 0, 0], sizes = [1, 4, 4], strides = [1, 1, 1]} : vector<9x4x4xf32> to vector<1x4x4xf32>
    %351 = vector.shape_cast %350 : vector<1x4x4xf32> to vector<4x4xf32>
    %cst_99 = arith.constant dense<0.000000e+00> : vector<4x256xf32>
    %352 = tpu.matmul %351, %114, %cst_99 {dimension_numbers = #tpu.dot_dimension_numbers<[1], [0], [0], [1], [0, 0, 1, 1], [], []>} : vector<4x4xf32>, vector<4x256xf32>, vector<4x256xf32> -> vector<4x256xf32>
    %353 = arith.addf %349, %352 : vector<4x256xf32>
    %354 = vector.extract_strided_slice %6 {offsets = [2, 0, 0], sizes = [1, 4, 4], strides = [1, 1, 1]} : vector<9x4x4xf32> to vector<1x4x4xf32>
    %355 = vector.shape_cast %354 : vector<1x4x4xf32> to vector<4x4xf32>
    %cst_100 = arith.constant dense<0.000000e+00> : vector<4x256xf32>
    %356 = tpu.matmul %355, %206, %cst_100 {dimension_numbers = #tpu.dot_dimension_numbers<[1], [0], [0], [1], [0, 0, 1, 1], [], []>} : vector<4x4xf32>, vector<4x256xf32>, vector<4x256xf32> -> vector<4x256xf32>
    %357 = arith.addf %353, %356 : vector<4x256xf32>
    %358 = vector.extract_strided_slice %7 {offsets = [2, 0, 0], sizes = [1, 4, 4], strides = [1, 1, 1]} : vector<9x4x4xf32> to vector<1x4x4xf32>
    %359 = vector.shape_cast %358 : vector<1x4x4xf32> to vector<4x4xf32>
    %cst_101 = arith.constant dense<0.000000e+00> : vector<4x256xf32>
    %360 = tpu.matmul %359, %213, %cst_101 {dimension_numbers = #tpu.dot_dimension_numbers<[1], [0], [0], [1], [0, 0, 1, 1], [], []>} : vector<4x4xf32>, vector<4x256xf32>, vector<4x256xf32> -> vector<4x256xf32>
    %361 = arith.addf %357, %360 : vector<4x256xf32>
    %362 = vector.extract_strided_slice %6 {offsets = [3, 0, 0], sizes = [1, 4, 4], strides = [1, 1, 1]} : vector<9x4x4xf32> to vector<1x4x4xf32>
    %363 = vector.shape_cast %362 : vector<1x4x4xf32> to vector<4x4xf32>
    %cst_102 = arith.constant dense<0.000000e+00> : vector<4x256xf32>
    %364 = tpu.matmul %363, %133, %cst_102 {dimension_numbers = #tpu.dot_dimension_numbers<[1], [0], [0], [1], [0, 0, 1, 1], [], []>} : vector<4x4xf32>, vector<4x256xf32>, vector<4x256xf32> -> vector<4x256xf32>
    %365 = arith.addf %361, %364 : vector<4x256xf32>
    %366 = vector.extract_strided_slice %7 {offsets = [3, 0, 0], sizes = [1, 4, 4], strides = [1, 1, 1]} : vector<9x4x4xf32> to vector<1x4x4xf32>
    %367 = vector.shape_cast %366 : vector<1x4x4xf32> to vector<4x4xf32>
    %cst_103 = arith.constant dense<0.000000e+00> : vector<4x256xf32>
    %368 = tpu.matmul %367, %138, %cst_103 {dimension_numbers = #tpu.dot_dimension_numbers<[1], [0], [0], [1], [0, 0, 1, 1], [], []>} : vector<4x4xf32>, vector<4x256xf32>, vector<4x256xf32> -> vector<4x256xf32>
    %369 = arith.addf %365, %368 : vector<4x256xf32>
    %370 = vector.extract_strided_slice %6 {offsets = [4, 0, 0], sizes = [1, 4, 4], strides = [1, 1, 1]} : vector<9x4x4xf32> to vector<1x4x4xf32>
    %371 = vector.shape_cast %370 : vector<1x4x4xf32> to vector<4x4xf32>
    %cst_104 = arith.constant dense<0.000000e+00> : vector<4x256xf32>
    %372 = tpu.matmul %371, %143, %cst_104 {dimension_numbers = #tpu.dot_dimension_numbers<[1], [0], [0], [1], [0, 0, 1, 1], [], []>} : vector<4x4xf32>, vector<4x256xf32>, vector<4x256xf32> -> vector<4x256xf32>
    %373 = arith.addf %369, %372 : vector<4x256xf32>
    %374 = vector.extract_strided_slice %7 {offsets = [4, 0, 0], sizes = [1, 4, 4], strides = [1, 1, 1]} : vector<9x4x4xf32> to vector<1x4x4xf32>
    %375 = vector.shape_cast %374 : vector<1x4x4xf32> to vector<4x4xf32>
    %cst_105 = arith.constant dense<0.000000e+00> : vector<4x256xf32>
    %376 = tpu.matmul %375, %148, %cst_105 {dimension_numbers = #tpu.dot_dimension_numbers<[1], [0], [0], [1], [0, 0, 1, 1], [], []>} : vector<4x4xf32>, vector<4x256xf32>, vector<4x256xf32> -> vector<4x256xf32>
    %377 = arith.addf %373, %376 : vector<4x256xf32>
    %378 = vector.extract_strided_slice %6 {offsets = [5, 0, 0], sizes = [1, 4, 4], strides = [1, 1, 1]} : vector<9x4x4xf32> to vector<1x4x4xf32>
    %379 = vector.shape_cast %378 : vector<1x4x4xf32> to vector<4x4xf32>
    %cst_106 = arith.constant dense<0.000000e+00> : vector<4x256xf32>
    %380 = tpu.matmul %379, %236, %cst_106 {dimension_numbers = #tpu.dot_dimension_numbers<[1], [0], [0], [1], [0, 0, 1, 1], [], []>} : vector<4x4xf32>, vector<4x256xf32>, vector<4x256xf32> -> vector<4x256xf32>
    %381 = arith.addf %377, %380 : vector<4x256xf32>
    %382 = vector.extract_strided_slice %7 {offsets = [5, 0, 0], sizes = [1, 4, 4], strides = [1, 1, 1]} : vector<9x4x4xf32> to vector<1x4x4xf32>
    %383 = vector.shape_cast %382 : vector<1x4x4xf32> to vector<4x4xf32>
    %cst_107 = arith.constant dense<0.000000e+00> : vector<4x256xf32>
    %384 = tpu.matmul %383, %243, %cst_107 {dimension_numbers = #tpu.dot_dimension_numbers<[1], [0], [0], [1], [0, 0, 1, 1], [], []>} : vector<4x4xf32>, vector<4x256xf32>, vector<4x256xf32> -> vector<4x256xf32>
    %385 = arith.addf %381, %384 : vector<4x256xf32>
    %386 = vector.extract_strided_slice %6 {offsets = [6, 0, 0], sizes = [1, 4, 4], strides = [1, 1, 1]} : vector<9x4x4xf32> to vector<1x4x4xf32>
    %387 = vector.shape_cast %386 : vector<1x4x4xf32> to vector<4x4xf32>
    %cst_108 = arith.constant dense<0.000000e+00> : vector<4x256xf32>
    %388 = tpu.matmul %387, %315, %cst_108 {dimension_numbers = #tpu.dot_dimension_numbers<[1], [0], [0], [1], [0, 0, 1, 1], [], []>} : vector<4x4xf32>, vector<4x256xf32>, vector<4x256xf32> -> vector<4x256xf32>
    %389 = arith.addf %385, %388 : vector<4x256xf32>
    %390 = vector.extract_strided_slice %7 {offsets = [6, 0, 0], sizes = [1, 4, 4], strides = [1, 1, 1]} : vector<9x4x4xf32> to vector<1x4x4xf32>
    %391 = vector.shape_cast %390 : vector<1x4x4xf32> to vector<4x4xf32>
    %cst_109 = arith.constant dense<0.000000e+00> : vector<4x256xf32>
    %392 = tpu.matmul %391, %320, %cst_109 {dimension_numbers = #tpu.dot_dimension_numbers<[1], [0], [0], [1], [0, 0, 1, 1], [], []>} : vector<4x4xf32>, vector<4x256xf32>, vector<4x256xf32> -> vector<4x256xf32>
    %393 = arith.addf %389, %392 : vector<4x256xf32>
    %394 = vector.extract_strided_slice %6 {offsets = [7, 0, 0], sizes = [1, 4, 4], strides = [1, 1, 1]} : vector<9x4x4xf32> to vector<1x4x4xf32>
    %395 = vector.shape_cast %394 : vector<1x4x4xf32> to vector<4x4xf32>
    %cst_110 = arith.constant dense<0.000000e+00> : vector<4x256xf32>
    %396 = tpu.matmul %395, %325, %cst_110 {dimension_numbers = #tpu.dot_dimension_numbers<[1], [0], [0], [1], [0, 0, 1, 1], [], []>} : vector<4x4xf32>, vector<4x256xf32>, vector<4x256xf32> -> vector<4x256xf32>
    %397 = arith.addf %393, %396 : vector<4x256xf32>
    %398 = vector.extract_strided_slice %7 {offsets = [7, 0, 0], sizes = [1, 4, 4], strides = [1, 1, 1]} : vector<9x4x4xf32> to vector<1x4x4xf32>
    %399 = vector.shape_cast %398 : vector<1x4x4xf32> to vector<4x4xf32>
    %cst_111 = arith.constant dense<0.000000e+00> : vector<4x256xf32>
    %400 = tpu.matmul %399, %330, %cst_111 {dimension_numbers = #tpu.dot_dimension_numbers<[1], [0], [0], [1], [0, 0, 1, 1], [], []>} : vector<4x4xf32>, vector<4x256xf32>, vector<4x256xf32> -> vector<4x256xf32>
    %401 = arith.addf %397, %400 : vector<4x256xf32>
    %402 = vector.extract_strided_slice %6 {offsets = [8, 0, 0], sizes = [1, 4, 4], strides = [1, 1, 1]} : vector<9x4x4xf32> to vector<1x4x4xf32>
    %403 = vector.shape_cast %402 : vector<1x4x4xf32> to vector<4x4xf32>
    %404 = vector.extract_strided_slice %38 {offsets = [0, 34], sizes = [4, 256], strides = [1, 1]} : vector<4x290xf32> to vector<4x256xf32>
    %405 = vector.broadcast %3 : vector<1x256xf32> to vector<4x256xf32>
    %406 = arith.mulf %404, %405 : vector<4x256xf32>
    %cst_112 = arith.constant dense<0.000000e+00> : vector<4x256xf32>
    %407 = tpu.matmul %403, %406, %cst_112 {dimension_numbers = #tpu.dot_dimension_numbers<[1], [0], [0], [1], [0, 0, 1, 1], [], []>} : vector<4x4xf32>, vector<4x256xf32>, vector<4x256xf32> -> vector<4x256xf32>
    %408 = arith.addf %401, %407 : vector<4x256xf32>
    %409 = vector.extract_strided_slice %7 {offsets = [8, 0, 0], sizes = [1, 4, 4], strides = [1, 1, 1]} : vector<9x4x4xf32> to vector<1x4x4xf32>
    %410 = vector.shape_cast %409 : vector<1x4x4xf32> to vector<4x4xf32>
    %411 = vector.extract_strided_slice %20 {offsets = [0, 34], sizes = [4, 256], strides = [1, 1]} : vector<4x290xf32> to vector<4x256xf32>
    %412 = vector.broadcast %3 : vector<1x256xf32> to vector<4x256xf32>
    %413 = arith.mulf %411, %412 : vector<4x256xf32>
    %cst_113 = arith.constant dense<0.000000e+00> : vector<4x256xf32>
    %414 = tpu.matmul %410, %413, %cst_113 {dimension_numbers = #tpu.dot_dimension_numbers<[1], [0], [0], [1], [0, 0, 1, 1], [], []>} : vector<4x4xf32>, vector<4x256xf32>, vector<4x256xf32> -> vector<4x256xf32>
    %415 = arith.addf %408, %414 : vector<4x256xf32>
    %416 = vector.broadcast %8 : vector<4x1xf32> to vector<4x256xf32>
    %417 = arith.addf %415, %416 : vector<4x256xf32>
    %cst_114 = arith.constant 0.000000e+00 : f32
    %418 = vector.broadcast %cst_114 : f32 to vector<4x256xf32>
    %419 = arith.maximumf %417, %418 : vector<4x256xf32>
    %cst_115 = arith.constant 0.000000e+00 : f32
    %420 = vector.broadcast %cst_115 : f32 to vector<4x17xf32>
    %421 = tpu.concatenate %420, %154, %420 in 1 : vector<4x17xf32>, vector<4x256xf32>, vector<4x17xf32> -> vector<4x290xf32>
    %cst_116 = arith.constant 0.000000e+00 : f32
    %422 = vector.broadcast %cst_116 : f32 to vector<4x17xf32>
    %423 = tpu.concatenate %422, %249, %422 in 1 : vector<4x17xf32>, vector<4x256xf32>, vector<4x17xf32> -> vector<4x290xf32>
    %cst_117 = arith.constant 0.000000e+00 : f32
    %424 = vector.broadcast %cst_117 : f32 to vector<4x17xf32>
    %425 = tpu.concatenate %424, %336, %424 in 1 : vector<4x17xf32>, vector<4x256xf32>, vector<4x17xf32> -> vector<4x290xf32>
    %cst_118 = arith.constant 0.000000e+00 : f32
    %426 = vector.broadcast %cst_118 : f32 to vector<4x17xf32>
    %427 = tpu.concatenate %426, %419, %426 in 1 : vector<4x17xf32>, vector<4x256xf32>, vector<4x17xf32> -> vector<4x290xf32>
    %cst_119 = arith.constant 0.000000e+00 : f32
    %428 = vector.broadcast %cst_119 : f32 to vector<4x256xf32>
    %429 = vector.extract_strided_slice %9 {offsets = [0, 0, 0], sizes = [1, 4, 4], strides = [1, 1, 1]} : vector<9x4x4xf32> to vector<1x4x4xf32>
    %430 = vector.shape_cast %429 : vector<1x4x4xf32> to vector<4x4xf32>
    %431 = vector.extract_strided_slice %427 {offsets = [0, 0], sizes = [4, 256], strides = [1, 1]} : vector<4x290xf32> to vector<4x256xf32>
    %432 = vector.broadcast %1 : vector<1x256xf32> to vector<4x256xf32>
    %433 = arith.mulf %431, %432 : vector<4x256xf32>
    %cst_120 = arith.constant dense<0.000000e+00> : vector<4x256xf32>
    %434 = tpu.matmul %430, %433, %cst_120 {dimension_numbers = #tpu.dot_dimension_numbers<[1], [0], [0], [1], [0, 0, 1, 1], [], []>} : vector<4x4xf32>, vector<4x256xf32>, vector<4x256xf32> -> vector<4x256xf32>
    %435 = arith.addf %428, %434 : vector<4x256xf32>
    %436 = vector.extract_strided_slice %9 {offsets = [1, 0, 0], sizes = [1, 4, 4], strides = [1, 1, 1]} : vector<9x4x4xf32> to vector<1x4x4xf32>
    %437 = vector.shape_cast %436 : vector<1x4x4xf32> to vector<4x4xf32>
    %438 = vector.extract_strided_slice %425 {offsets = [0, 1], sizes = [4, 256], strides = [1, 1]} : vector<4x290xf32> to vector<4x256xf32>
    %cst_121 = arith.constant dense<0.000000e+00> : vector<4x256xf32>
    %439 = tpu.matmul %437, %438, %cst_121 {dimension_numbers = #tpu.dot_dimension_numbers<[1], [0], [0], [1], [0, 0, 1, 1], [], []>} : vector<4x4xf32>, vector<4x256xf32>, vector<4x256xf32> -> vector<4x256xf32>
    %440 = arith.addf %435, %439 : vector<4x256xf32>
    %441 = vector.extract_strided_slice %9 {offsets = [2, 0, 0], sizes = [1, 4, 4], strides = [1, 1, 1]} : vector<9x4x4xf32> to vector<1x4x4xf32>
    %442 = vector.shape_cast %441 : vector<1x4x4xf32> to vector<4x4xf32>
    %443 = vector.extract_strided_slice %427 {offsets = [0, 1], sizes = [4, 256], strides = [1, 1]} : vector<4x290xf32> to vector<4x256xf32>
    %cst_122 = arith.constant dense<0.000000e+00> : vector<4x256xf32>
    %444 = tpu.matmul %442, %443, %cst_122 {dimension_numbers = #tpu.dot_dimension_numbers<[1], [0], [0], [1], [0, 0, 1, 1], [], []>} : vector<4x4xf32>, vector<4x256xf32>, vector<4x256xf32> -> vector<4x256xf32>
    %445 = arith.addf %440, %444 : vector<4x256xf32>
    %446 = vector.extract_strided_slice %9 {offsets = [3, 0, 0], sizes = [1, 4, 4], strides = [1, 1, 1]} : vector<9x4x4xf32> to vector<1x4x4xf32>
    %447 = vector.shape_cast %446 : vector<1x4x4xf32> to vector<4x4xf32>
    %448 = vector.extract_strided_slice %423 {offsets = [0, 16], sizes = [4, 256], strides = [1, 1]} : vector<4x290xf32> to vector<4x256xf32>
    %449 = vector.broadcast %1 : vector<1x256xf32> to vector<4x256xf32>
    %450 = arith.mulf %448, %449 : vector<4x256xf32>
    %cst_123 = arith.constant dense<0.000000e+00> : vector<4x256xf32>
    %451 = tpu.matmul %447, %450, %cst_123 {dimension_numbers = #tpu.dot_dimension_numbers<[1], [0], [0], [1], [0, 0, 1, 1], [], []>} : vector<4x4xf32>, vector<4x256xf32>, vector<4x256xf32> -> vector<4x256xf32>
    %452 = arith.addf %445, %451 : vector<4x256xf32>
    %453 = vector.extract_strided_slice %9 {offsets = [4, 0, 0], sizes = [1, 4, 4], strides = [1, 1, 1]} : vector<9x4x4xf32> to vector<1x4x4xf32>
    %454 = vector.shape_cast %453 : vector<1x4x4xf32> to vector<4x4xf32>
    %455 = vector.extract_strided_slice %421 {offsets = [0, 17], sizes = [4, 256], strides = [1, 1]} : vector<4x290xf32> to vector<4x256xf32>
    %cst_124 = arith.constant dense<0.000000e+00> : vector<4x256xf32>
    %456 = tpu.matmul %454, %455, %cst_124 {dimension_numbers = #tpu.dot_dimension_numbers<[1], [0], [0], [1], [0, 0, 1, 1], [], []>} : vector<4x4xf32>, vector<4x256xf32>, vector<4x256xf32> -> vector<4x256xf32>
    %457 = arith.addf %452, %456 : vector<4x256xf32>
    %458 = vector.extract_strided_slice %9 {offsets = [5, 0, 0], sizes = [1, 4, 4], strides = [1, 1, 1]} : vector<9x4x4xf32> to vector<1x4x4xf32>
    %459 = vector.shape_cast %458 : vector<1x4x4xf32> to vector<4x4xf32>
    %460 = vector.extract_strided_slice %423 {offsets = [0, 17], sizes = [4, 256], strides = [1, 1]} : vector<4x290xf32> to vector<4x256xf32>
    %cst_125 = arith.constant dense<0.000000e+00> : vector<4x256xf32>
    %461 = tpu.matmul %459, %460, %cst_125 {dimension_numbers = #tpu.dot_dimension_numbers<[1], [0], [0], [1], [0, 0, 1, 1], [], []>} : vector<4x4xf32>, vector<4x256xf32>, vector<4x256xf32> -> vector<4x256xf32>
    %462 = arith.addf %457, %461 : vector<4x256xf32>
    %463 = vector.extract_strided_slice %9 {offsets = [6, 0, 0], sizes = [1, 4, 4], strides = [1, 1, 1]} : vector<9x4x4xf32> to vector<1x4x4xf32>
    %464 = vector.shape_cast %463 : vector<1x4x4xf32> to vector<4x4xf32>
    %465 = vector.extract_strided_slice %427 {offsets = [0, 16], sizes = [4, 256], strides = [1, 1]} : vector<4x290xf32> to vector<4x256xf32>
    %466 = vector.broadcast %1 : vector<1x256xf32> to vector<4x256xf32>
    %467 = arith.mulf %465, %466 : vector<4x256xf32>
    %cst_126 = arith.constant dense<0.000000e+00> : vector<4x256xf32>
    %468 = tpu.matmul %464, %467, %cst_126 {dimension_numbers = #tpu.dot_dimension_numbers<[1], [0], [0], [1], [0, 0, 1, 1], [], []>} : vector<4x4xf32>, vector<4x256xf32>, vector<4x256xf32> -> vector<4x256xf32>
    %469 = arith.addf %462, %468 : vector<4x256xf32>
    %470 = vector.extract_strided_slice %9 {offsets = [7, 0, 0], sizes = [1, 4, 4], strides = [1, 1, 1]} : vector<9x4x4xf32> to vector<1x4x4xf32>
    %471 = vector.shape_cast %470 : vector<1x4x4xf32> to vector<4x4xf32>
    %472 = vector.extract_strided_slice %425 {offsets = [0, 17], sizes = [4, 256], strides = [1, 1]} : vector<4x290xf32> to vector<4x256xf32>
    %cst_127 = arith.constant dense<0.000000e+00> : vector<4x256xf32>
    %473 = tpu.matmul %471, %472, %cst_127 {dimension_numbers = #tpu.dot_dimension_numbers<[1], [0], [0], [1], [0, 0, 1, 1], [], []>} : vector<4x4xf32>, vector<4x256xf32>, vector<4x256xf32> -> vector<4x256xf32>
    %474 = arith.addf %469, %473 : vector<4x256xf32>
    %475 = vector.extract_strided_slice %9 {offsets = [8, 0, 0], sizes = [1, 4, 4], strides = [1, 1, 1]} : vector<9x4x4xf32> to vector<1x4x4xf32>
    %476 = vector.shape_cast %475 : vector<1x4x4xf32> to vector<4x4xf32>
    %477 = vector.extract_strided_slice %427 {offsets = [0, 17], sizes = [4, 256], strides = [1, 1]} : vector<4x290xf32> to vector<4x256xf32>
    %cst_128 = arith.constant dense<0.000000e+00> : vector<4x256xf32>
    %478 = tpu.matmul %476, %477, %cst_128 {dimension_numbers = #tpu.dot_dimension_numbers<[1], [0], [0], [1], [0, 0, 1, 1], [], []>} : vector<4x4xf32>, vector<4x256xf32>, vector<4x256xf32> -> vector<4x256xf32>
    %479 = arith.addf %474, %478 : vector<4x256xf32>
    %480 = vector.broadcast %10 : vector<4x1xf32> to vector<4x256xf32>
    %481 = arith.addf %479, %480 : vector<4x256xf32>
    %cst_129 = arith.constant 0.000000e+00 : f32
    %482 = vector.broadcast %cst_129 : f32 to vector<4x256xf32>
    %483 = arith.maximumf %481, %482 : vector<4x256xf32>
    %cst_130 = arith.constant 0.000000e+00 : f32
    %484 = vector.broadcast %cst_130 : f32 to vector<4x256xf32>
    %485 = vector.extract_strided_slice %9 {offsets = [0, 0, 0], sizes = [1, 4, 4], strides = [1, 1, 1]} : vector<9x4x4xf32> to vector<1x4x4xf32>
    %486 = vector.shape_cast %485 : vector<1x4x4xf32> to vector<4x4xf32>
    %cst_131 = arith.constant dense<0.000000e+00> : vector<4x256xf32>
    %487 = tpu.matmul %486, %438, %cst_131 {dimension_numbers = #tpu.dot_dimension_numbers<[1], [0], [0], [1], [0, 0, 1, 1], [], []>} : vector<4x4xf32>, vector<4x256xf32>, vector<4x256xf32> -> vector<4x256xf32>
    %488 = arith.addf %484, %487 : vector<4x256xf32>
    %489 = vector.extract_strided_slice %9 {offsets = [1, 0, 0], sizes = [1, 4, 4], strides = [1, 1, 1]} : vector<9x4x4xf32> to vector<1x4x4xf32>
    %490 = vector.shape_cast %489 : vector<1x4x4xf32> to vector<4x4xf32>
    %cst_132 = arith.constant dense<0.000000e+00> : vector<4x256xf32>
    %491 = tpu.matmul %490, %443, %cst_132 {dimension_numbers = #tpu.dot_dimension_numbers<[1], [0], [0], [1], [0, 0, 1, 1], [], []>} : vector<4x4xf32>, vector<4x256xf32>, vector<4x256xf32> -> vector<4x256xf32>
    %492 = arith.addf %488, %491 : vector<4x256xf32>
    %493 = vector.extract_strided_slice %9 {offsets = [2, 0, 0], sizes = [1, 4, 4], strides = [1, 1, 1]} : vector<9x4x4xf32> to vector<1x4x4xf32>
    %494 = vector.shape_cast %493 : vector<1x4x4xf32> to vector<4x4xf32>
    %495 = vector.extract_strided_slice %425 {offsets = [0, 2], sizes = [4, 256], strides = [1, 1]} : vector<4x290xf32> to vector<4x256xf32>
    %496 = vector.broadcast %3 : vector<1x256xf32> to vector<4x256xf32>
    %497 = arith.mulf %495, %496 : vector<4x256xf32>
    %cst_133 = arith.constant dense<0.000000e+00> : vector<4x256xf32>
    %498 = tpu.matmul %494, %497, %cst_133 {dimension_numbers = #tpu.dot_dimension_numbers<[1], [0], [0], [1], [0, 0, 1, 1], [], []>} : vector<4x4xf32>, vector<4x256xf32>, vector<4x256xf32> -> vector<4x256xf32>
    %499 = arith.addf %492, %498 : vector<4x256xf32>
    %500 = vector.extract_strided_slice %9 {offsets = [3, 0, 0], sizes = [1, 4, 4], strides = [1, 1, 1]} : vector<9x4x4xf32> to vector<1x4x4xf32>
    %501 = vector.shape_cast %500 : vector<1x4x4xf32> to vector<4x4xf32>
    %cst_134 = arith.constant dense<0.000000e+00> : vector<4x256xf32>
    %502 = tpu.matmul %501, %455, %cst_134 {dimension_numbers = #tpu.dot_dimension_numbers<[1], [0], [0], [1], [0, 0, 1, 1], [], []>} : vector<4x4xf32>, vector<4x256xf32>, vector<4x256xf32> -> vector<4x256xf32>
    %503 = arith.addf %499, %502 : vector<4x256xf32>
    %504 = vector.extract_strided_slice %9 {offsets = [4, 0, 0], sizes = [1, 4, 4], strides = [1, 1, 1]} : vector<9x4x4xf32> to vector<1x4x4xf32>
    %505 = vector.shape_cast %504 : vector<1x4x4xf32> to vector<4x4xf32>
    %cst_135 = arith.constant dense<0.000000e+00> : vector<4x256xf32>
    %506 = tpu.matmul %505, %460, %cst_135 {dimension_numbers = #tpu.dot_dimension_numbers<[1], [0], [0], [1], [0, 0, 1, 1], [], []>} : vector<4x4xf32>, vector<4x256xf32>, vector<4x256xf32> -> vector<4x256xf32>
    %507 = arith.addf %503, %506 : vector<4x256xf32>
    %508 = vector.extract_strided_slice %9 {offsets = [5, 0, 0], sizes = [1, 4, 4], strides = [1, 1, 1]} : vector<9x4x4xf32> to vector<1x4x4xf32>
    %509 = vector.shape_cast %508 : vector<1x4x4xf32> to vector<4x4xf32>
    %510 = vector.extract_strided_slice %421 {offsets = [0, 18], sizes = [4, 256], strides = [1, 1]} : vector<4x290xf32> to vector<4x256xf32>
    %511 = vector.broadcast %3 : vector<1x256xf32> to vector<4x256xf32>
    %512 = arith.mulf %510, %511 : vector<4x256xf32>
    %cst_136 = arith.constant dense<0.000000e+00> : vector<4x256xf32>
    %513 = tpu.matmul %509, %512, %cst_136 {dimension_numbers = #tpu.dot_dimension_numbers<[1], [0], [0], [1], [0, 0, 1, 1], [], []>} : vector<4x4xf32>, vector<4x256xf32>, vector<4x256xf32> -> vector<4x256xf32>
    %514 = arith.addf %507, %513 : vector<4x256xf32>
    %515 = vector.extract_strided_slice %9 {offsets = [6, 0, 0], sizes = [1, 4, 4], strides = [1, 1, 1]} : vector<9x4x4xf32> to vector<1x4x4xf32>
    %516 = vector.shape_cast %515 : vector<1x4x4xf32> to vector<4x4xf32>
    %cst_137 = arith.constant dense<0.000000e+00> : vector<4x256xf32>
    %517 = tpu.matmul %516, %472, %cst_137 {dimension_numbers = #tpu.dot_dimension_numbers<[1], [0], [0], [1], [0, 0, 1, 1], [], []>} : vector<4x4xf32>, vector<4x256xf32>, vector<4x256xf32> -> vector<4x256xf32>
    %518 = arith.addf %514, %517 : vector<4x256xf32>
    %519 = vector.extract_strided_slice %9 {offsets = [7, 0, 0], sizes = [1, 4, 4], strides = [1, 1, 1]} : vector<9x4x4xf32> to vector<1x4x4xf32>
    %520 = vector.shape_cast %519 : vector<1x4x4xf32> to vector<4x4xf32>
    %cst_138 = arith.constant dense<0.000000e+00> : vector<4x256xf32>
    %521 = tpu.matmul %520, %477, %cst_138 {dimension_numbers = #tpu.dot_dimension_numbers<[1], [0], [0], [1], [0, 0, 1, 1], [], []>} : vector<4x4xf32>, vector<4x256xf32>, vector<4x256xf32> -> vector<4x256xf32>
    %522 = arith.addf %518, %521 : vector<4x256xf32>
    %523 = vector.extract_strided_slice %9 {offsets = [8, 0, 0], sizes = [1, 4, 4], strides = [1, 1, 1]} : vector<9x4x4xf32> to vector<1x4x4xf32>
    %524 = vector.shape_cast %523 : vector<1x4x4xf32> to vector<4x4xf32>
    %525 = vector.extract_strided_slice %425 {offsets = [0, 18], sizes = [4, 256], strides = [1, 1]} : vector<4x290xf32> to vector<4x256xf32>
    %526 = vector.broadcast %3 : vector<1x256xf32> to vector<4x256xf32>
    %527 = arith.mulf %525, %526 : vector<4x256xf32>
    %cst_139 = arith.constant dense<0.000000e+00> : vector<4x256xf32>
    %528 = tpu.matmul %524, %527, %cst_139 {dimension_numbers = #tpu.dot_dimension_numbers<[1], [0], [0], [1], [0, 0, 1, 1], [], []>} : vector<4x4xf32>, vector<4x256xf32>, vector<4x256xf32> -> vector<4x256xf32>
    %529 = arith.addf %522, %528 : vector<4x256xf32>
    %530 = vector.broadcast %10 : vector<4x1xf32> to vector<4x256xf32>
    %531 = arith.addf %529, %530 : vector<4x256xf32>
    %cst_140 = arith.constant 0.000000e+00 : f32
    %532 = vector.broadcast %cst_140 : f32 to vector<4x256xf32>
    %533 = arith.maximumf %531, %532 : vector<4x256xf32>
    %cst_141 = arith.constant 0.000000e+00 : f32
    %534 = vector.broadcast %cst_141 : f32 to vector<4x256xf32>
    %535 = vector.extract_strided_slice %9 {offsets = [0, 0, 0], sizes = [1, 4, 4], strides = [1, 1, 1]} : vector<9x4x4xf32> to vector<1x4x4xf32>
    %536 = vector.shape_cast %535 : vector<1x4x4xf32> to vector<4x4xf32>
    %cst_142 = arith.constant dense<0.000000e+00> : vector<4x256xf32>
    %537 = tpu.matmul %536, %450, %cst_142 {dimension_numbers = #tpu.dot_dimension_numbers<[1], [0], [0], [1], [0, 0, 1, 1], [], []>} : vector<4x4xf32>, vector<4x256xf32>, vector<4x256xf32> -> vector<4x256xf32>
    %538 = arith.addf %534, %537 : vector<4x256xf32>
    %539 = vector.extract_strided_slice %9 {offsets = [1, 0, 0], sizes = [1, 4, 4], strides = [1, 1, 1]} : vector<9x4x4xf32> to vector<1x4x4xf32>
    %540 = vector.shape_cast %539 : vector<1x4x4xf32> to vector<4x4xf32>
    %cst_143 = arith.constant dense<0.000000e+00> : vector<4x256xf32>
    %541 = tpu.matmul %540, %455, %cst_143 {dimension_numbers = #tpu.dot_dimension_numbers<[1], [0], [0], [1], [0, 0, 1, 1], [], []>} : vector<4x4xf32>, vector<4x256xf32>, vector<4x256xf32> -> vector<4x256xf32>
    %542 = arith.addf %538, %541 : vector<4x256xf32>
    %543 = vector.extract_strided_slice %9 {offsets = [2, 0, 0], sizes = [1, 4, 4], strides = [1, 1, 1]} : vector<9x4x4xf32> to vector<1x4x4xf32>
    %544 = vector.shape_cast %543 : vector<1x4x4xf32> to vector<4x4xf32>
    %cst_144 = arith.constant dense<0.000000e+00> : vector<4x256xf32>
    %545 = tpu.matmul %544, %460, %cst_144 {dimension_numbers = #tpu.dot_dimension_numbers<[1], [0], [0], [1], [0, 0, 1, 1], [], []>} : vector<4x4xf32>, vector<4x256xf32>, vector<4x256xf32> -> vector<4x256xf32>
    %546 = arith.addf %542, %545 : vector<4x256xf32>
    %547 = vector.extract_strided_slice %9 {offsets = [3, 0, 0], sizes = [1, 4, 4], strides = [1, 1, 1]} : vector<9x4x4xf32> to vector<1x4x4xf32>
    %548 = vector.shape_cast %547 : vector<1x4x4xf32> to vector<4x4xf32>
    %cst_145 = arith.constant dense<0.000000e+00> : vector<4x256xf32>
    %549 = tpu.matmul %548, %467, %cst_145 {dimension_numbers = #tpu.dot_dimension_numbers<[1], [0], [0], [1], [0, 0, 1, 1], [], []>} : vector<4x4xf32>, vector<4x256xf32>, vector<4x256xf32> -> vector<4x256xf32>
    %550 = arith.addf %546, %549 : vector<4x256xf32>
    %551 = vector.extract_strided_slice %9 {offsets = [4, 0, 0], sizes = [1, 4, 4], strides = [1, 1, 1]} : vector<9x4x4xf32> to vector<1x4x4xf32>
    %552 = vector.shape_cast %551 : vector<1x4x4xf32> to vector<4x4xf32>
    %cst_146 = arith.constant dense<0.000000e+00> : vector<4x256xf32>
    %553 = tpu.matmul %552, %472, %cst_146 {dimension_numbers = #tpu.dot_dimension_numbers<[1], [0], [0], [1], [0, 0, 1, 1], [], []>} : vector<4x4xf32>, vector<4x256xf32>, vector<4x256xf32> -> vector<4x256xf32>
    %554 = arith.addf %550, %553 : vector<4x256xf32>
    %555 = vector.extract_strided_slice %9 {offsets = [5, 0, 0], sizes = [1, 4, 4], strides = [1, 1, 1]} : vector<9x4x4xf32> to vector<1x4x4xf32>
    %556 = vector.shape_cast %555 : vector<1x4x4xf32> to vector<4x4xf32>
    %cst_147 = arith.constant dense<0.000000e+00> : vector<4x256xf32>
    %557 = tpu.matmul %556, %477, %cst_147 {dimension_numbers = #tpu.dot_dimension_numbers<[1], [0], [0], [1], [0, 0, 1, 1], [], []>} : vector<4x4xf32>, vector<4x256xf32>, vector<4x256xf32> -> vector<4x256xf32>
    %558 = arith.addf %554, %557 : vector<4x256xf32>
    %559 = vector.extract_strided_slice %9 {offsets = [6, 0, 0], sizes = [1, 4, 4], strides = [1, 1, 1]} : vector<9x4x4xf32> to vector<1x4x4xf32>
    %560 = vector.shape_cast %559 : vector<1x4x4xf32> to vector<4x4xf32>
    %561 = vector.extract_strided_slice %423 {offsets = [0, 32], sizes = [4, 256], strides = [1, 1]} : vector<4x290xf32> to vector<4x256xf32>
    %562 = vector.broadcast %1 : vector<1x256xf32> to vector<4x256xf32>
    %563 = arith.mulf %561, %562 : vector<4x256xf32>
    %cst_148 = arith.constant dense<0.000000e+00> : vector<4x256xf32>
    %564 = tpu.matmul %560, %563, %cst_148 {dimension_numbers = #tpu.dot_dimension_numbers<[1], [0], [0], [1], [0, 0, 1, 1], [], []>} : vector<4x4xf32>, vector<4x256xf32>, vector<4x256xf32> -> vector<4x256xf32>
    %565 = arith.addf %558, %564 : vector<4x256xf32>
    %566 = vector.extract_strided_slice %9 {offsets = [7, 0, 0], sizes = [1, 4, 4], strides = [1, 1, 1]} : vector<9x4x4xf32> to vector<1x4x4xf32>
    %567 = vector.shape_cast %566 : vector<1x4x4xf32> to vector<4x4xf32>
    %568 = vector.extract_strided_slice %421 {offsets = [0, 33], sizes = [4, 256], strides = [1, 1]} : vector<4x290xf32> to vector<4x256xf32>
    %cst_149 = arith.constant dense<0.000000e+00> : vector<4x256xf32>
    %569 = tpu.matmul %567, %568, %cst_149 {dimension_numbers = #tpu.dot_dimension_numbers<[1], [0], [0], [1], [0, 0, 1, 1], [], []>} : vector<4x4xf32>, vector<4x256xf32>, vector<4x256xf32> -> vector<4x256xf32>
    %570 = arith.addf %565, %569 : vector<4x256xf32>
    %571 = vector.extract_strided_slice %9 {offsets = [8, 0, 0], sizes = [1, 4, 4], strides = [1, 1, 1]} : vector<9x4x4xf32> to vector<1x4x4xf32>
    %572 = vector.shape_cast %571 : vector<1x4x4xf32> to vector<4x4xf32>
    %573 = vector.extract_strided_slice %423 {offsets = [0, 33], sizes = [4, 256], strides = [1, 1]} : vector<4x290xf32> to vector<4x256xf32>
    %cst_150 = arith.constant dense<0.000000e+00> : vector<4x256xf32>
    %574 = tpu.matmul %572, %573, %cst_150 {dimension_numbers = #tpu.dot_dimension_numbers<[1], [0], [0], [1], [0, 0, 1, 1], [], []>} : vector<4x4xf32>, vector<4x256xf32>, vector<4x256xf32> -> vector<4x256xf32>
    %575 = arith.addf %570, %574 : vector<4x256xf32>
    %576 = vector.broadcast %10 : vector<4x1xf32> to vector<4x256xf32>
    %577 = arith.addf %575, %576 : vector<4x256xf32>
    %cst_151 = arith.constant 0.000000e+00 : f32
    %578 = vector.broadcast %cst_151 : f32 to vector<4x256xf32>
    %579 = arith.maximumf %577, %578 : vector<4x256xf32>
    %cst_152 = arith.constant 0.000000e+00 : f32
    %580 = vector.broadcast %cst_152 : f32 to vector<4x256xf32>
    %581 = vector.extract_strided_slice %9 {offsets = [0, 0, 0], sizes = [1, 4, 4], strides = [1, 1, 1]} : vector<9x4x4xf32> to vector<1x4x4xf32>
    %582 = vector.shape_cast %581 : vector<1x4x4xf32> to vector<4x4xf32>
    %cst_153 = arith.constant dense<0.000000e+00> : vector<4x256xf32>
    %583 = tpu.matmul %582, %455, %cst_153 {dimension_numbers = #tpu.dot_dimension_numbers<[1], [0], [0], [1], [0, 0, 1, 1], [], []>} : vector<4x4xf32>, vector<4x256xf32>, vector<4x256xf32> -> vector<4x256xf32>
    %584 = arith.addf %580, %583 : vector<4x256xf32>
    %585 = vector.extract_strided_slice %9 {offsets = [1, 0, 0], sizes = [1, 4, 4], strides = [1, 1, 1]} : vector<9x4x4xf32> to vector<1x4x4xf32>
    %586 = vector.shape_cast %585 : vector<1x4x4xf32> to vector<4x4xf32>
    %cst_154 = arith.constant dense<0.000000e+00> : vector<4x256xf32>
    %587 = tpu.matmul %586, %460, %cst_154 {dimension_numbers = #tpu.dot_dimension_numbers<[1], [0], [0], [1], [0, 0, 1, 1], [], []>} : vector<4x4xf32>, vector<4x256xf32>, vector<4x256xf32> -> vector<4x256xf32>
    %588 = arith.addf %584, %587 : vector<4x256xf32>
    %589 = vector.extract_strided_slice %9 {offsets = [2, 0, 0], sizes = [1, 4, 4], strides = [1, 1, 1]} : vector<9x4x4xf32> to vector<1x4x4xf32>
    %590 = vector.shape_cast %589 : vector<1x4x4xf32> to vector<4x4xf32>
    %cst_155 = arith.constant dense<0.000000e+00> : vector<4x256xf32>
    %591 = tpu.matmul %590, %512, %cst_155 {dimension_numbers = #tpu.dot_dimension_numbers<[1], [0], [0], [1], [0, 0, 1, 1], [], []>} : vector<4x4xf32>, vector<4x256xf32>, vector<4x256xf32> -> vector<4x256xf32>
    %592 = arith.addf %588, %591 : vector<4x256xf32>
    %593 = vector.extract_strided_slice %9 {offsets = [3, 0, 0], sizes = [1, 4, 4], strides = [1, 1, 1]} : vector<9x4x4xf32> to vector<1x4x4xf32>
    %594 = vector.shape_cast %593 : vector<1x4x4xf32> to vector<4x4xf32>
    %cst_156 = arith.constant dense<0.000000e+00> : vector<4x256xf32>
    %595 = tpu.matmul %594, %472, %cst_156 {dimension_numbers = #tpu.dot_dimension_numbers<[1], [0], [0], [1], [0, 0, 1, 1], [], []>} : vector<4x4xf32>, vector<4x256xf32>, vector<4x256xf32> -> vector<4x256xf32>
    %596 = arith.addf %592, %595 : vector<4x256xf32>
    %597 = vector.extract_strided_slice %9 {offsets = [4, 0, 0], sizes = [1, 4, 4], strides = [1, 1, 1]} : vector<9x4x4xf32> to vector<1x4x4xf32>
    %598 = vector.shape_cast %597 : vector<1x4x4xf32> to vector<4x4xf32>
    %cst_157 = arith.constant dense<0.000000e+00> : vector<4x256xf32>
    %599 = tpu.matmul %598, %477, %cst_157 {dimension_numbers = #tpu.dot_dimension_numbers<[1], [0], [0], [1], [0, 0, 1, 1], [], []>} : vector<4x4xf32>, vector<4x256xf32>, vector<4x256xf32> -> vector<4x256xf32>
    %600 = arith.addf %596, %599 : vector<4x256xf32>
    %601 = vector.extract_strided_slice %9 {offsets = [5, 0, 0], sizes = [1, 4, 4], strides = [1, 1, 1]} : vector<9x4x4xf32> to vector<1x4x4xf32>
    %602 = vector.shape_cast %601 : vector<1x4x4xf32> to vector<4x4xf32>
    %cst_158 = arith.constant dense<0.000000e+00> : vector<4x256xf32>
    %603 = tpu.matmul %602, %527, %cst_158 {dimension_numbers = #tpu.dot_dimension_numbers<[1], [0], [0], [1], [0, 0, 1, 1], [], []>} : vector<4x4xf32>, vector<4x256xf32>, vector<4x256xf32> -> vector<4x256xf32>
    %604 = arith.addf %600, %603 : vector<4x256xf32>
    %605 = vector.extract_strided_slice %9 {offsets = [6, 0, 0], sizes = [1, 4, 4], strides = [1, 1, 1]} : vector<9x4x4xf32> to vector<1x4x4xf32>
    %606 = vector.shape_cast %605 : vector<1x4x4xf32> to vector<4x4xf32>
    %cst_159 = arith.constant dense<0.000000e+00> : vector<4x256xf32>
    %607 = tpu.matmul %606, %568, %cst_159 {dimension_numbers = #tpu.dot_dimension_numbers<[1], [0], [0], [1], [0, 0, 1, 1], [], []>} : vector<4x4xf32>, vector<4x256xf32>, vector<4x256xf32> -> vector<4x256xf32>
    %608 = arith.addf %604, %607 : vector<4x256xf32>
    %609 = vector.extract_strided_slice %9 {offsets = [7, 0, 0], sizes = [1, 4, 4], strides = [1, 1, 1]} : vector<9x4x4xf32> to vector<1x4x4xf32>
    %610 = vector.shape_cast %609 : vector<1x4x4xf32> to vector<4x4xf32>
    %cst_160 = arith.constant dense<0.000000e+00> : vector<4x256xf32>
    %611 = tpu.matmul %610, %573, %cst_160 {dimension_numbers = #tpu.dot_dimension_numbers<[1], [0], [0], [1], [0, 0, 1, 1], [], []>} : vector<4x4xf32>, vector<4x256xf32>, vector<4x256xf32> -> vector<4x256xf32>
    %612 = arith.addf %608, %611 : vector<4x256xf32>
    %613 = vector.extract_strided_slice %9 {offsets = [8, 0, 0], sizes = [1, 4, 4], strides = [1, 1, 1]} : vector<9x4x4xf32> to vector<1x4x4xf32>
    %614 = vector.shape_cast %613 : vector<1x4x4xf32> to vector<4x4xf32>
    %615 = vector.extract_strided_slice %421 {offsets = [0, 34], sizes = [4, 256], strides = [1, 1]} : vector<4x290xf32> to vector<4x256xf32>
    %616 = vector.broadcast %3 : vector<1x256xf32> to vector<4x256xf32>
    %617 = arith.mulf %615, %616 : vector<4x256xf32>
    %cst_161 = arith.constant dense<0.000000e+00> : vector<4x256xf32>
    %618 = tpu.matmul %614, %617, %cst_161 {dimension_numbers = #tpu.dot_dimension_numbers<[1], [0], [0], [1], [0, 0, 1, 1], [], []>} : vector<4x4xf32>, vector<4x256xf32>, vector<4x256xf32> -> vector<4x256xf32>
    %619 = arith.addf %612, %618 : vector<4x256xf32>
    %620 = vector.broadcast %10 : vector<4x1xf32> to vector<4x256xf32>
    %621 = arith.addf %619, %620 : vector<4x256xf32>
    %cst_162 = arith.constant 0.000000e+00 : f32
    %622 = vector.broadcast %cst_162 : f32 to vector<4x256xf32>
    %623 = arith.maximumf %621, %622 : vector<4x256xf32>
    %624 = tpu.concatenate %483, %533, %579, %623 in 0 : vector<4x256xf32>, vector<4x256xf32>, vector<4x256xf32>, vector<4x256xf32> -> vector<16x256xf32>
    %c0_163 = arith.constant 0 : index
    %c0_164 = arith.constant 0 : index
    %c0_165 = arith.constant 0 : index
    %625 = vector.load %arg11[%c0_163, %c0_164, %c0_165] : memref<1x16x256xf32, #tpu.memory_space<vmem>>, vector<1x16x256xf32>
    %626 = vector.shape_cast %625 : vector<1x16x256xf32> to vector<16x256xf32>
    %627 = vector.shape_cast %624 : vector<16x256xf32> to vector<1x16x256xf32>
    tpu.vector_store %arg11[%c0_163, %c0_164, %c0_165], %627 {strides = array<i32>} : memref<1x16x256xf32, #tpu.memory_space<vmem>>, vector<1x16x256xf32>,
    return
  }
  func.func @transform_0(%arg0: i32) -> (i32, i32, i32) {
    %c0_i32 = arith.constant 0 : i32
    %c0_i32_0 = arith.constant 0 : i32
    %c0_i32_1 = arith.constant 0 : i32
    return %arg0, %c0_i32, %c0_i32_0 : i32, i32, i32
  }
  func.func @transform_1(%arg0: i32) -> (i32, i32, i32) {
    %c0_i32 = arith.constant 0 : i32
    %c0_i32_0 = arith.constant 0 : i32
    %c0_i32_1 = arith.constant 0 : i32
    return %arg0, %c0_i32, %c0_i32_0 : i32, i32, i32
  }
  func.func @transform_2(%arg0: i32) -> (i32, i32) {
    %c0_i32 = arith.constant 0 : i32
    %c0_i32_0 = arith.constant 0 : i32
    %c0_i32_1 = arith.constant 0 : i32
    return %c0_i32, %c0_i32_0 : i32, i32
  }
  func.func @transform_3(%arg0: i32) -> (i32, i32) {
    %c0_i32 = arith.constant 0 : i32
    %c0_i32_0 = arith.constant 0 : i32
    %c0_i32_1 = arith.constant 0 : i32
    return %c0_i32, %c0_i32_0 : i32, i32
  }
  func.func @transform_4(%arg0: i32) -> (i32, i32, i32) {
    %c0_i32 = arith.constant 0 : i32
    %c0_i32_0 = arith.constant 0 : i32
    %c0_i32_1 = arith.constant 0 : i32
    %c0_i32_2 = arith.constant 0 : i32
    return %c0_i32, %c0_i32_0, %c0_i32_1 : i32, i32, i32
  }
  func.func @transform_5(%arg0: i32) -> (i32, i32, i32) {
    %c0_i32 = arith.constant 0 : i32
    %c0_i32_0 = arith.constant 0 : i32
    %c0_i32_1 = arith.constant 0 : i32
    %c0_i32_2 = arith.constant 0 : i32
    return %c0_i32, %c0_i32_0, %c0_i32_1 : i32, i32, i32
  }
  func.func @transform_6(%arg0: i32) -> (i32, i32, i32) {
    %c0_i32 = arith.constant 0 : i32
    %c0_i32_0 = arith.constant 0 : i32
    %c0_i32_1 = arith.constant 0 : i32
    %c0_i32_2 = arith.constant 0 : i32
    return %c0_i32, %c0_i32_0, %c0_i32_1 : i32, i32, i32
  }
  func.func @transform_7(%arg0: i32) -> (i32, i32) {
    %c0_i32 = arith.constant 0 : i32
    %c0_i32_0 = arith.constant 0 : i32
    %c0_i32_1 = arith.constant 0 : i32
    return %c0_i32, %c0_i32_0 : i32, i32
  }
  func.func @transform_8(%arg0: i32) -> (i32, i32, i32) {
    %c0_i32 = arith.constant 0 : i32
    %c0_i32_0 = arith.constant 0 : i32
    %c0_i32_1 = arith.constant 0 : i32
    %c0_i32_2 = arith.constant 0 : i32
    return %c0_i32, %c0_i32_0, %c0_i32_1 : i32, i32, i32
  }
  func.func @transform_9(%arg0: i32) -> (i32, i32) {
    %c0_i32 = arith.constant 0 : i32
    %c0_i32_0 = arith.constant 0 : i32
    %c0_i32_1 = arith.constant 0 : i32
    return %c0_i32, %c0_i32_0 : i32, i32
  }
  func.func @transform_10(%arg0: i32) -> (i32, i32, i32) {
    %c0_i32 = arith.constant 0 : i32
    %c0_i32_0 = arith.constant 0 : i32
    %c0_i32_1 = arith.constant 0 : i32
    return %arg0, %c0_i32, %c0_i32_0 : i32, i32, i32
  }
}

</mosaic_0001>

<bundles_post_ra>
// kernel: unet_up_forward.1
= control target key start
LH: loop header
LB: loop body
LE: loop exit
PB: predicated region body
PF: predicated region fallthrough
CT: control target
= control target key end

     0   :  { %s10170_s13 = smov 0   ;;  %s11700_s0 = inlined_call_operand.vmem [shape: f32[2,16,256], index: 0, kind: input, shape index: {}]   ;;  %s11701_s1 = inlined_call_operand.vmem [shape: f32[2,8,256], index: 1, kind: input, shape index: {}]   ;;  %s11702_s2 = inlined_call_operand.vmem [shape: f32[16,8], index: 2, kind: input, shape index: {}]   ;;  %s11703_s3 = inlined_call_operand.vmem [shape: f32[4,1], index: 3, kind: input, shape index: {}]   ;;  %s11704_s4 = inlined_call_operand.vmem [shape: f32[2,1,256], index: 4, kind: input, shape index: {}]   ;;  %s11705_s5 = inlined_call_operand.vmem [shape: f32[9,4,4], index: 5, kind: input, shape index: {}]   ;;  %s11706_s6 = inlined_call_operand.vmem [shape: f32[9,4,4], index: 6, kind: input, shape index: {}]   ;;  %s11707_s7 = inlined_call_operand.vmem [shape: f32[4,1], index: 7, kind: input, shape index: {}]   ;;  %s11708_s8 = inlined_call_operand.vmem [shape: f32[9,4,4], index: 8, kind: input, shape index: {}]   ;;  %s11709_s9 = inlined_call_operand.vmem [shape: f32[4,1], index: 9, kind: input, shape index: {}]   ;;  %s11710_s10 = inlined_call_operand.vmem [shape: f32[2,16,256], index: 10, kind: output, shape index: {}]  }
   0x1 LB: > { %s9520_s14 = sadd.s32 4294967295, %s10097_s13   ;;  %p9524_p0 = scmp.ge.s32.totalorder %s10097_s13, 1  ;;  %s10097_s13 = sphi %s10170_s13, %s20_s13  }
   0x2   : > { %p322_p1 = scmp.lt.s32.totalorder %s10097_s13, 3 }
   0x4   : > { %p323_p2 = pnand %p9524_p0, %p322_p1 }
   0x6   : > { %326 = sbr.rel (%p323_p2) target bundleno = 1647 (0x66f), region = 60 }
   0xd   : > { %p365_p3 = scmp.lt.s32.totalorder %s9520_s14, 1  ;;  %v11711_v0 = vmov 0.0   ;;  %v385_v1 = vld [vmem:[%s11703_s3] sm:$0xf]  ;;  %v10100_v2 = vmov 0   ;;  %vm421_vm0 = vcmask 64512   ;;  %v622_v14 = vlaneseq }
   0xe   : > { %492 = vmatprep.mubr.f32.mxu0 %v11711_v0  ;;  %498 = vmatprep.mubr.f32.mxu1 %v11711_v0  ;;  %v383_v3 = vld [vmem:[%s11702_s2] sm:$0xff]  ;;  %v384_v6 = vld [vmem:[%s11702_s2 + $0x8] sm:$0xff]  ;;  %s10101_s29 = smov 17   ;;  %s10102_s12 = smov 2   ;;  %vm518_vm1 = vcmask 138240   ;;  %vm640_vm2 = vcmask 1043456  }
   0xf   : > { %s11770_s14 = smov (!%p365_p3, %s9520_s14), 1  ;;  %10089 = vset.pattern.permute.xlu0 %v10100_v2  ;;  %10090 = vset.pattern.permute.xlu1 %v10100_v2  ;;  %v623_v19 = vshrl.u32 %v622_v14, 7  ;;  %v9531_v24 = vld [vmem:[%s11704_s4 + $0x2] sm:$0x3]  ;;  %v380_v33 = vld [vmem:[%s11704_s4] sm:$0x3] }
  0x10   : > { %507 = vperm.xlu0 %10089, %v385_v1   ;;  %s9861_s17 = sshll.u32 %s11770_s14, 4  ;;  %s9860_s25 = sshll.u32 %s11770_s14, 5  ;;  %v10302_v2 = vld [vmem:[%s11706_s6] sm:$0xf]  ;;  %vm636_vm3 = vcmask 31744   ;;  %vm2568_vm4 = vcmask 15360  }
  0x11   : > { %s374_s20 = scalar_lea.vmem %s11701_s1, %s9861_s17  ;;  %s10203_s28 = scalar_lea.vmem %s11700_s0, %s9860_s25  ;;  %v628_v23 = vsub.s32 1, %v623_v19  ;;  %v624_v25 = vsub.s32 0, %v623_v19  ;;  %vm1163_vm5 = vcmask 130048   ;;  %vm806_vm6 = vcmask 1039360  }
  0x12   : > { %v420_v4 = vld [vmem:[%s374_s20 + $0x8] sm:$0xff]  ;;  %v419_v5 = vld [vmem:[%s374_s20] sm:$0xff]  ;;  %v418_v15 = vld [vmem:[%s10203_s28 + $0x18] sm:$0xff]  ;;  %s10103_s17 = smov 16   ;;  %s10104_s18 = smov 127   ;;  %vm3052_vm7 = vcmask 146432  }
  0x13   : > { %428 = vmatprep.subr.mxu0 %v420_v4  ;;  %9863 = vmatprep.subr.mxu1 %v420_v4  ;;  %v417_v17 = vld [vmem:[%s10203_s28 + $0x10] sm:$0xff]  ;;  %v610_v18 = vrot.slane %v418_v15, 4  ;;  %v10217_v28 = vrot.slane %v9531_v24, %v628_v23  ;;  %v10220_v29 = vrot.slane %v9531_v24, %v624_v25  ;;  %v416_v30 = vld [vmem:[%s10203_s28 + $0x8] sm:$0xff]  ;;  %v415_v31 = vld [vmem:[%s10203_s28] sm:$0xff]  ;;  %v10231_v35 = vrot.slane %v380_v33, %v628_v23  ;;  %s10105_s21 = smov 18   ;;  %s10106_s24 = smov 126  }
  0x14   : > { %429 = vmatpush1.msra.mxu0 %v419_v5  ;;  %9864 = vmatpush1.msra.mxu1 %v419_v5  ;;  %v609_v20 = vrot.slane %v417_v17, 4  ;;  %v586_v32 = vrot.slane %v416_v30, 4  ;;  %v585_v34 = vrot.slane %v415_v31, 4  ;;  %v10234_v36 = vrot.slane %v380_v33, %v624_v25  ;;  %s10107_s26 = smov 111   ;;  %s10108_s27 = smov 112  }
  0x15   : > { %9532 = vmatmul.mubr.msk.f32.vlgmr.msra.gmra.mrb[0].mxu0 %vm421_vm0, %v383_v3  ;;  %9533 = vmatmul.mubr.msk.f32.vlgmr.msra.gmra.mrb[0].mxu1 %vm421_vm0, %v384_v6  ;;  %11738 = vst [vmem:[#allocation2_spill] sm:$0xff] %v10231_v35  ;;  %v10325_v6 = vld [vmem:[%s11705_s5] sm:$0xf]  ;;  %s10109_s15 = smov 110   ;;  %vm2585_vm8 = vcmask 1031168   ;;  %vm1365_vm9 = vcmask 908288  }
  0x16   : > { %711 = vmatprep.mubr.f32.mxu1 %v11711_v0  ;;  %2331 = vmatprep.mubr.f32.mxu0 %v11711_v0  ;;  %11739 = vst [vmem:[#allocation3_spill] sm:$0xff] %v10234_v36  ;;  %vm1180_vm10 = vcmask 916480   ;;  %s10112_s22 = smov 95   ;;  %vm3069_vm11 = vcmask 900096   ;;  %vm4594_vm12 = vcmask 261120   ;;  %s10113_s30 = smov 96  }
  0x17   : > { %vm6295_vm13 = vcmask 277504   ;;  %s10114_s16 = smov 94   ;;  %vm4788_vm14 = vcmask 777216   ;;  %vm4611_vm15 = vcmask 785408   ;;  %vm6312_vm0 = vcmask 769024  }
  0x8f   : > { %v508_v7 = vpop.permute.xlu0 %507 }
  0x90   : > { %v525_v16 = vrot.slane %v508_v7, 4 }
  0xe8   : > { %v494_v8 = vpop.f32.mrb[0].mxu0  ;;  %v500_v9 = vpop.f32.mrb[0].mxu1 }
  0xe9   : > { %v543_v10 = vadd.f32 %v508_v7, %v500_v9  ;;  %v496_v11 = vpop.f32.mrb[1].mxu0  ;;  %v502_v12 = vpop.f32.mrb[1].mxu1  ;;  %v557_v22 = vadd.f32 %v525_v16, %v500_v9  ;;  %v510_v39 = vadd.f32 %v508_v7, %v494_v8  ;;  %v527_v40 = vadd.f32 %v525_v16, %v494_v8 }
  0xea   : > { %v544_v13 = vadd.f32 %v508_v7, %v502_v12  ;;  %v558_v21 = vadd.f32 %v525_v16, %v502_v12  ;;  %v511_v37 = vadd.f32 %v508_v7, %v496_v11  ;;  %v528_v38 = vadd.f32 %v525_v16, %v496_v11 }
  0xeb   : > { %547 = vrot.lane.b32.xlu0 %v543_v10, %s10101_s29  ;;  %v561_v27 = vrot.slane %v557_v22, 4  ;;  %v531_v42 = vrot.slane %v527_v40, 4 }
  0xec   : > { %549 = vrot.lane.b32.xlu1 %v544_v13, %s10101_s29  ;;  %v562_v26 = vrot.slane %v558_v21, 4  ;;  %v532_v41 = vrot.slane %v528_v38, 4 }
  0xef   : > { %601 = vrot.lane.b32.xlu0 %v418_v15, %s10101_s29 }
  0xf0   : > { %599 = vrot.lane.b32.xlu1 %v417_v17, %s10101_s29 }
  0xf3   : > { %613 = vrot.lane.b32.xlu0 %v610_v18, %s10101_s29 }
  0xf4   : > { %611 = vrot.lane.b32.xlu1 %v609_v20, %s10101_s29 }
  0xf7   : > { %565 = vrot.lane.b32.xlu0 %v562_v26, %s10101_s29 }
  0xf8   : > { %563 = vrot.lane.b32.xlu1 %v561_v27, %s10101_s29 }
  0xfb   : > { %2566 = vrot.lane.b32.xlu0 %v10217_v28, %s10102_s12 }
  0xfc   : > { %2564 = vrot.lane.b32.xlu1 %v10220_v29, %s10102_s12 }
  0xff   : > { %577 = vrot.lane.b32.xlu0 %v416_v30, %s10101_s29 }
 0x100   : > { %575 = vrot.lane.b32.xlu1 %v415_v31, %s10101_s29 }
 0x103   : > { %589 = vrot.lane.b32.xlu0 %v586_v32, %s10101_s29 }
 0x104   : > { %587 = vrot.lane.b32.xlu1 %v585_v34, %s10101_s29 }
 0x107   : > { %1161 = vrot.lane.b32.xlu0 %v10231_v35, %s10103_s17 }
 0x108   : > { %1159 = vrot.lane.b32.xlu1 %v10234_v36, %s10103_s17  ;;  %s10110_s17 = smov 32  }
 0x10b   : > { %516 = vrot.lane.b32.xlu0 %v511_v37, %s10101_s29 }
 0x10c   : > { %514 = vrot.lane.b32.xlu1 %v510_v39, %s10101_s29 }
 0x10f   : > { %535 = vrot.lane.b32.xlu0 %v532_v41, %s10101_s29 }
 0x110   : > { %533 = vrot.lane.b32.xlu1 %v531_v42, %s10101_s29 }
 0x15d   : > { %v548_v43 = vpop.permute.xlu0 %547 }
 0x15e   : > { %v550_v44 = vpop.permute.xlu1 %549  ;;  %v10257_v50 = vsel %vm518_vm1, 0.0, %v548_v43 }
 0x15f   : > { %v10244_v45 = vsel %vm518_vm1, %v550_v44, 0.0  ;;  %v10247_v46 = vsel %vm518_vm1, %v548_v43, %v550_v44 }
 0x160   : > { %895 = vrot.lane.b32.xlu0 %v10244_v45, %s10104_s18  ;;  %893 = vrot.lane.b32.xlu1 %v10247_v46, %s10104_s18 }
 0x161   : > { %v602_v47 = vpop.permute.xlu0 %601 }
 0x162   : > { %v600_v48 = vpop.permute.xlu1 %599  ;;  %v10267_v53 = vsel %vm518_vm1, %v602_v47, 0.0 }
 0x163   : > { %v10254_v49 = vsel %vm518_vm1, %v600_v48, %v602_v47  ;;  %v10264_v52 = vsel %vm518_vm1, 0.0, %v600_v48 }
 0x164   : > { %802 = vrot.lane.b32.xlu0 %v10254_v49, %s10104_s18  ;;  %891 = vrot.lane.b32.xlu1 %v10257_v50, %s10104_s18 }
 0x165   : > { %v614_v51 = vpop.permute.xlu0 %613 }
 0x166   : > { %v612_v54 = vpop.permute.xlu1 %611  ;;  %v10274_v56 = vsel %vm518_vm1, %v614_v51, 0.0 }
 0x167   : > { %v10277_v57 = vsel %vm518_vm1, %v612_v54, %v614_v51  ;;  %v10294_v63 = vsel %vm518_vm1, 0.0, %v612_v54 }
 0x168   : > { %800 = vrot.lane.b32.xlu0 %v10264_v52, %s10104_s18  ;;  %804 = vrot.lane.b32.xlu1 %v10267_v53, %s10104_s18  ;;  %v633_v1 = vmul.f32 %v10231_v35, %v10277_v57  ;;  %v632_v3 = vmul.f32 %v10234_v36, %v10294_v63 }
 0x169   : > { %v566_v55 = vpop.permute.xlu0 %565 }
 0x16a   : > { %v564_v58 = vpop.permute.xlu1 %563  ;;  %v10330_v9 = vsel %vm518_vm1, %v566_v55, 0.0 }
 0x16b   : > { %v10280_v59 = vsel %vm518_vm1, %v564_v58, %v566_v55  ;;  %v10283_v60 = vsel %vm518_vm1, 0.0, %v564_v58 }
 0x16c   : > { %v634_v61 = vmul.f32 %v10234_v36, %v10283_v60  ;;  %985 = vrot.lane.b32.xlu0 %v10274_v56, %s10104_s18  ;;  %983 = vrot.lane.b32.xlu1 %v10277_v57, %s10104_s18  ;;  %v635_v62 = vmul.f32 %v10231_v35, %v10280_v59 }
 0x16d   : > { %v10313_v4 = vpop.permute.xlu0 %2566 }
 0x16e   : > { %9534 = vmatprep.subr.msk.mxu1 %vm640_vm2, %v635_v62  ;;  %11740 = vst [vmem:[#allocation4_spill] sm:$0xff] %v10313_v4  ;;  %v10315_v5 = vpop.permute.xlu1 %2564  ;;  %v2575_v11 = vmul.f32 %v10313_v4, %v10267_v53  ;;  %v2667_v23 = vmul.f32 %v10313_v4, %v10244_v45 }
 0x16f   : > { %9535 = vmatpush1.msk.msra.mxu1 %vm640_vm2, %v634_v61  ;;  %11741 = vst [vmem:[#allocation5_spill] sm:$0xff] %v10315_v5  ;;  %v10334_v10 = vsel %vm2568_vm4, %v10315_v5, %v10313_v4  ;;  %v2665_v15 = vmul.f32 %v10315_v5, %v10257_v50  ;;  %v2573_v16 = vmul.f32 %v10315_v5, %v10264_v52 }
 0x170   : > { %9537 = vmatprep.subr.msk.mxu1 %vm640_vm2, %v633_v1  ;;  %3048 = vrot.lane.b32.xlu0 %v10220_v29, %s10105_s21  ;;  %11742 = vst [vmem:[#allocation6_spill] sm:$0xff] %v10334_v10  ;;  %v2574_v12 = vmul.f32 %v10334_v10, %v10254_v49  ;;  %v2666_v22 = vmul.f32 %v10334_v10, %v10247_v46 }
 0x171   : > { %981 = vrot.lane.b32.xlu1 %v10294_v63, %s10104_s18  ;;  %9536 = vmatmul.mubr.msk.f32.vlgmr.msra.gmra.mrb[2].mxu1 %vm636_vm3, %v10302_v2  ;;  %v578_v7 = vpop.permute.xlu0 %577 }
 0x172   : > { %9538 = vmatpush1.msk.msra.mxu1 %vm640_vm2, %v632_v3  ;;  %791 = vmatprep.mubr.f32.mxu1 %v11711_v0  ;;  %v576_v8 = vpop.permute.xlu1 %575  ;;  %v10354_v17 = vsel %vm518_vm1, %v578_v7, 0.0 }
 0x173   : > { %v10357_v18 = vsel %vm518_vm1, %v576_v8, %v578_v7  ;;  %v10389_v32 = vsel %vm518_vm1, 0.0, %v576_v8 }
 0x174   : > { %1071 = vrot.lane.b32.xlu0 %v10283_v60, %s10104_s18 }
 0x175   : > { %3050 = vrot.lane.b32.xlu1 %v10217_v28, %s10105_s21  ;;  %v590_v13 = vpop.permute.xlu0 %589  ;;  %s10111_s21 = smov 34  }
 0x176   : > { %v588_v14 = vpop.permute.xlu1 %587  ;;  %v10386_v27 = vsel %vm518_vm1, %v590_v13, 0.0 }
 0x177   : > { %v10366_v21 = vsel %vm518_vm1, %v588_v14, %v590_v13  ;;  %v10382_v26 = vsel %vm518_vm1, 0.0, %v588_v14 }
 0x178   : > { %1073 = vrot.lane.b32.xlu0 %v10280_v59, %s10104_s18 }
 0x179   : > { %1075 = vrot.lane.b32.xlu1 %v10330_v9, %s10104_s18  ;;  %9539 = vmatmul.mubr.msk.f32.vlgmr.msra.gmra.mrb[2].mxu1 %vm636_vm3, %v10325_v6  ;;  %v10359_v19 = vpop.permute.xlu0 %1161 }
 0x17a   : > { %880 = vmatprep.mubr.f32.mxu1 %v11711_v0  ;;  %11743 = vst [vmem:[#allocation7_spill] sm:$0xff] %v10359_v19  ;;  %v10361_v20 = vpop.permute.xlu1 %1159  ;;  %v1170_v34 = vmul.f32 %v10359_v19, %v10386_v27 }
 0x17b   : > { %11744 = vst [vmem:[#allocation8_spill] sm:$0xff] %v10361_v20  ;;  %v10376_v24 = vsel %vm1163_vm5, %v10361_v20, %v10359_v19  ;;  %v1168_v33 = vmul.f32 %v10361_v20, %v10382_v26 }
 0x17c   : > { %2583 = vrot.lane.b32.xlu0 %v2575_v11, %s10106_s24  ;;  %11745 = vst [vmem:[#allocation9_spill] sm:$0xff] %v10376_v24  ;;  %v1169_v25 = vmul.f32 %v10376_v24, %v10366_v21 }
 0x17d   : > { %2581 = vrot.lane.b32.xlu1 %v2574_v12, %s10106_s24  ;;  %v517_v30 = vpop.permute.xlu0 %516  ;;  %v10457_v12 = vld [vmem:[%s11705_s5 + $0x4] sm:$0xf] }
 0x17e   : > { %v515_v31 = vpop.permute.xlu1 %514  ;;  %v10404_v40 = vsel %vm518_vm1, %v517_v30, 0.0 }
 0x17f   : > { %v10409_v41 = vsel %vm518_vm1, %v515_v31, %v517_v30  ;;  %v10422_v47 = vsel %vm518_vm1, 0.0, %v515_v31 }
 0x180   : > { %2671 = vrot.lane.b32.xlu0 %v2665_v15, %s10106_s24 }
 0x181   : > { %2579 = vrot.lane.b32.xlu1 %v2573_v16, %s10106_s24  ;;  %v536_v37 = vpop.permute.xlu0 %535 }
 0x182   : > { %v534_v38 = vpop.permute.xlu1 %533  ;;  %v10419_v44 = vsel %vm518_vm1, %v536_v37, 0.0 }
 0x183   : > { %v10401_v39 = vsel %vm518_vm1, %v534_v38, %v536_v37  ;;  %v10416_v43 = vsel %vm518_vm1, 0.0, %v534_v38  ;;  %v1265_v51 = vmul.f32 %v10359_v19, %v10419_v44 }
 0x184   : > { %1363 = vrot.lane.b32.xlu0 %v10354_v17, %s10107_s26  ;;  %v1264_v42 = vmul.f32 %v10376_v24, %v10401_v39  ;;  %v1263_v48 = vmul.f32 %v10361_v20, %v10416_v43 }
 0x185   : > { %1361 = vrot.lane.b32.xlu1 %v10357_v18, %s10107_s26 }
 0x188   : > { %2673 = vrot.lane.b32.xlu0 %v2666_v22, %s10106_s24 }
 0x189   : > { %2675 = vrot.lane.b32.xlu1 %v2667_v23, %s10106_s24  ;;  %v10479_v23 = vld [vmem:[%s11706_s6 + $0x4] sm:$0xf] }
 0x18c   : > { %1176 = vrot.lane.b32.xlu0 %v1169_v25, %s10108_s27 }
 0x18d   : > { %1359 = vrot.lane.b32.xlu1 %v10389_v32, %s10107_s26 }
 0x190   : > { %1174 = vrot.lane.b32.xlu0 %v1168_v33, %s10108_s27 }
 0x191   : > { %1178 = vrot.lane.b32.xlu1 %v1170_v34, %s10108_s27 }
 0x194   : > { %1454 = vrot.lane.b32.xlu0 %v10404_v40, %s10107_s26 }
 0x195   : > { %1452 = vrot.lane.b32.xlu1 %v10409_v41, %s10107_s26 }
 0x198   : > { %1271 = vrot.lane.b32.xlu0 %v1264_v42, %s10108_s27 }
 0x199   : > { %1450 = vrot.lane.b32.xlu1 %v10422_v47, %s10107_s26 }
 0x19c   : > { %1269 = vrot.lane.b32.xlu0 %v1263_v48, %s10108_s27 }
 0x19d   : > { %1273 = vrot.lane.b32.xlu1 %v1265_v51, %s10108_s27 }
 0x1a0   : > { %1544 = vrot.lane.b32.xlu0 %v10386_v27, %s10107_s26 }
 0x1a1   : > { %1542 = vrot.lane.b32.xlu1 %v10366_v21, %s10107_s26 }
 0x1a4   : > { %1632 = vrot.lane.b32.xlu0 %v10401_v39, %s10107_s26 }
 0x1a5   : > { %1540 = vrot.lane.b32.xlu1 %v10382_v26, %s10107_s26 }
 0x1a8   : > { %1630 = vrot.lane.b32.xlu0 %v10416_v43, %s10107_s26 }
 0x1a9   : > { %1634 = vrot.lane.b32.xlu1 %v10419_v44, %s10107_s26 }
 0x1d2   : > { %v896_v54 = vpop.permute.xlu0 %895  ;;  %v894_v55 = vpop.permute.xlu1 %893 }
 0x1d3   : > { %v898_v58 = vsel %vm806_vm6, %v894_v55, %v896_v54 }
 0x1d4   : > { %9588 = vmatprep.subr.msk.mxu0 %vm640_vm2, %v898_v58 }
 0x1d6   : > { %v803_v61 = vpop.permute.xlu0 %802  ;;  %v892_v62 = vpop.permute.xlu1 %891 }
 0x1d7   : > { %v897_v1 = vsel %vm806_vm6, %v892_v62, %v894_v55  ;;  %v10509_v55 = vld [vmem:[%s11705_s5 + $0x8] sm:$0xf] }
 0x1d8   : > { %9589 = vmatpush1.msk.msra.mxu0 %vm640_vm2, %v897_v1 }
 0x1d9   : > { %9590 = vmatmul.mubr.msk.f32.vlgmr.msra.gmra.mrb[2].mxu0 %vm636_vm3, %v10302_v2 }
 0x1da   : > { %v801_v3 = vpop.permute.xlu0 %800  ;;  %v805_v7 = vpop.permute.xlu1 %804  ;;  %2402 = vmatprep.mubr.f32.mxu0 %v11711_v0 }
 0x1db   : > { %v807_v8 = vsel %vm806_vm6, %v801_v3, %v803_v61  ;;  %v808_v11 = vsel %vm806_vm6, %v803_v61, %v805_v7 }
 0x1dc   : > { %9540 = vmatprep.subr.msk.mxu1 %vm640_vm2, %v808_v11  ;;  %9591 = vmatprep.subr.msk.mxu0 %vm640_vm2, %v808_v11 }
 0x1dd   : > { %9541 = vmatpush1.msk.msra.mxu1 %vm640_vm2, %v807_v8  ;;  %9592 = vmatpush1.msk.msra.mxu0 %vm640_vm2, %v807_v8 }
 0x1de   : > { %v986_v13 = vpop.permute.xlu0 %985  ;;  %9542 = vmatmul.mubr.msk.f32.vlgmr.msra.gmra.mrb[2].mxu1 %vm636_vm3, %v10457_v12  ;;  %9543 = vmatprep.subr.msk.mxu1 %vm640_vm2, %v898_v58  ;;  %v984_v14 = vpop.permute.xlu1 %983 }
 0x1df   : > { %9544 = vmatpush1.msk.msra.mxu1 %vm640_vm2, %v897_v1  ;;  %v988_v15 = vsel %vm806_vm6, %v984_v14, %v986_v13  ;;  %970 = vmatprep.mubr.f32.mxu1 %v11711_v0 }
 0x1e0   : > { %9546 = vmatprep.subr.msk.mxu1 %vm640_vm2, %v988_v15  ;;  %9594 = vmatprep.subr.msk.mxu0 %vm640_vm2, %v988_v15 }
 0x1e1   : > { %9593 = vmatmul.mubr.msk.f32.vlgmr.msra.gmra.mrb[2].mxu0 %vm636_vm3, %v10325_v6 }
 0x1e2   : > { %v10473_v16 = vpop.permute.xlu0 %3048  ;;  %2473 = vmatprep.mubr.f32.mxu0 %v11711_v0 }
 0x1e3   : > { %11746 = vst [vmem:[#allocation10_spill] sm:$0xff] %v10473_v16  ;;  %v982_v22 = vpop.permute.xlu1 %981  ;;  %v3057_v58 = vmul.f32 %v10473_v16, %v10389_v32  ;;  %v3149_v3 = vmul.f32 %v10473_v16, %v10422_v47 }
 0x1e4   : > { %v987_v25 = vsel %vm806_vm6, %v982_v22, %v984_v14  ;;  %v10537_v14 = vld [vmem:[%s11706_s6 + $0x8] sm:$0xf] }
 0x1e5   : > { %9595 = vmatpush1.msk.msra.mxu0 %vm640_vm2, %v987_v25 }
 0x1e6   : > { %v1072_v30 = vpop.permute.xlu0 %1071  ;;  %9545 = vmatmul.mubr.msk.f32.vlgmr.msra.gmra.mrb[2].mxu1 %vm636_vm3, %v10479_v23 }
 0x1e7   : > { %9547 = vmatpush1.msk.msra.mxu1 %vm640_vm2, %v987_v25  ;;  %v10486_v31 = vpop.permute.xlu1 %3050  ;;  %1060 = vmatprep.mubr.f32.mxu1 %v11711_v0  ;;  %v1719_v25 = vmul.f32 %v10376_v24, %v10277_v57 }
 0x1e8   : > { %11747 = vst [vmem:[#allocation11_spill] sm:$0xff] %v10486_v31  ;;  %v3059_v33 = vmul.f32 %v10486_v31, %v10354_v17  ;;  %v10493_v34 = vsel %vm3052_vm7, %v10473_v16, %v10486_v31  ;;  %v3151_v7 = vmul.f32 %v10486_v31, %v10404_v40 }
 0x1e9   : > { %11748 = vst [vmem:[#allocation12_spill] sm:$0xff] %v10493_v34  ;;  %v3058_v37 = vmul.f32 %v10493_v34, %v10357_v18  ;;  %9596 = vmatmul.mubr.msk.f32.vlgmr.msra.gmra.mrb[2].mxu0 %vm636_vm3, %v10457_v12  ;;  %v3150_v54 = vmul.f32 %v10493_v34, %v10409_v41 }
 0x1ea   : > { %3067 = vrot.lane.b32.xlu0 %v3059_v33, %s10109_s15  ;;  %v1074_v38 = vpop.permute.xlu0 %1073  ;;  %2546 = vmatprep.mubr.f32.mxu0 %v11711_v0 }
 0x1eb   : > { %v1077_v42 = vsel %vm806_vm6, %v1072_v30, %v1074_v38  ;;  %3065 = vrot.lane.b32.xlu1 %v3058_v37, %s10109_s15  ;;  %v1076_v48 = vpop.permute.xlu1 %1075 }
 0x1ec   : > { %v1078_v51 = vsel %vm806_vm6, %v1074_v38, %v1076_v48 }
 0x1ed   : > { %9549 = vmatprep.subr.msk.mxu1 %vm640_vm2, %v1078_v51  ;;  %9597 = vmatprep.subr.msk.mxu0 %vm640_vm2, %v1078_v51  ;;  %v1720_v51 = vmul.f32 %v10359_v19, %v10274_v56 }
 0x1ee   : > { %3157 = vrot.lane.b32.xlu0 %v3150_v54, %s10109_s15  ;;  %9598 = vmatpush1.msk.msra.mxu0 %vm640_vm2, %v1077_v42  ;;  %v2584_v61 = vpop.permute.xlu0 %2583 }
 0x1ef   : > { %9548 = vmatmul.mubr.msk.f32.vlgmr.msra.gmra.mrb[2].mxu1 %vm636_vm3, %v10509_v55  ;;  %3063 = vrot.lane.b32.xlu1 %v3057_v58, %s10109_s15  ;;  %v2582_v62 = vpop.permute.xlu1 %2581 }
 0x1f0   : > { %9550 = vmatpush1.msk.msra.mxu1 %vm640_vm2, %v1077_v42  ;;  %v2587_v1 = vsel %vm2585_vm8, %v2582_v62, %v2584_v61  ;;  %1150 = vmatprep.mubr.f32.mxu1 %v11711_v0  ;;  %v1718_v42 = vmul.f32 %v10361_v20, %v10294_v63 }
 0x1f1   : > { %9600 = vmatprep.subr.msk.mxu0 %vm640_vm2, %v2587_v1  ;;  %9599 = vmatmul.mubr.msk.f32.vlgmr.msra.gmra.mrb[2].mxu0 %vm636_vm3, %v10479_v23 }
 0x1f2   : > { %3155 = vrot.lane.b32.xlu0 %v3149_v3, %s10109_s15  ;;  %v2672_v8 = vpop.permute.xlu0 %2671  ;;  %2656 = vmatprep.mubr.f32.mxu0 %v11711_v0 }
 0x1f3   : > { %3159 = vrot.lane.b32.xlu1 %v3151_v7, %s10109_s15  ;;  %v2580_v11 = vpop.permute.xlu1 %2579 }
 0x1f4   : > { %v2586_v13 = vsel %vm2585_vm8, %v2580_v11, %v2582_v62  ;;  %v10593_v11 = vld [vmem:[%s11705_s5 + $0xc] sm:$0xf] }
 0x1f5   : > { %9601 = vmatpush1.msk.msra.mxu0 %vm640_vm2, %v2586_v13 }
 0x1f6   : > { %1910 = vrot.lane.b32.xlu0 %v10267_v53, %s10107_s26  ;;  %v1364_v15 = vpop.permute.xlu0 %1363 }
 0x1f7   : > { %1908 = vrot.lane.b32.xlu1 %v10254_v49, %s10107_s26  ;;  %v1362_v22 = vpop.permute.xlu1 %1361  ;;  %9551 = vmatmul.mubr.msk.f32.vlgmr.msra.gmra.mrb[2].mxu1 %vm636_vm3, %v10537_v14 }
 0x1f8   : > { %1254 = vmatprep.mubr.f32.mxu1 %v11711_v0  ;;  %v10560_v48 = vsel %vm1365_vm9, %v1362_v22, %v1364_v15 }
 0x1f9   : > { %9602 = vmatmul.mubr.msk.f32.vlgmr.msra.gmra.mrb[2].mxu0 %vm636_vm3, %v10509_v55 }
 0x1fa   : > { %1726 = vrot.lane.b32.xlu0 %v1719_v25, %s10108_s27  ;;  %v2674_v30 = vpop.permute.xlu0 %2673  ;;  %2747 = vmatprep.mubr.f32.mxu0 %v11711_v0  ;;  %v1812_v25 = vmul.f32 %v10361_v20, %v10283_v60 }
 0x1fb   : > { %v2677_v33 = vsel %vm2585_vm8, %v2672_v8, %v2674_v30  ;;  %1906 = vrot.lane.b32.xlu1 %v10264_v52, %s10107_s26  ;;  %v2676_v37 = vpop.permute.xlu1 %2675  ;;  %v1813_v8 = vmul.f32 %v10376_v24, %v10280_v59 }
 0x1fc   : > { %v2678_v38 = vsel %vm2585_vm8, %v2674_v30, %v2676_v37  ;;  %v1814_v30 = vmul.f32 %v10359_v19, %v10330_v9 }
 0x1fd   : > { %9603 = vmatprep.subr.msk.mxu0 %vm640_vm2, %v2678_v38 }
 0x1fe   : > { %1724 = vrot.lane.b32.xlu0 %v1718_v42, %s10108_s27  ;;  %9604 = vmatpush1.msk.msra.mxu0 %vm640_vm2, %v2677_v33  ;;  %v1177_v54 = vpop.permute.xlu0 %1176 }
 0x1ff   : > { %1728 = vrot.lane.b32.xlu1 %v1720_v51, %s10108_s27  ;;  %v1360_v58 = vpop.permute.xlu1 %1359  ;;  %9606 = vmatprep.subr.msk.mxu0 %vm640_vm2, %v10560_v48 }
 0x200   : > { %v10571_v61 = vsel %vm1365_vm9, %v1360_v58, %v1362_v22 }
 0x201   : > { %9605 = vmatmul.mubr.msk.f32.vlgmr.msra.gmra.mrb[2].mxu0 %vm636_vm3, %v10537_v14 }
 0x202   : > { %1998 = vrot.lane.b32.xlu0 %v10244_v45, %s10107_s26  ;;  %v1175_v62 = vpop.permute.xlu0 %1174  ;;  %9607 = vmatpush1.msk.msra.mxu0 %vm640_vm2, %v10571_v61 }
 0x203   : > { %v10580_v1 = vsel %vm1180_vm10, %v1175_v62, %v1177_v54  ;;  %1996 = vrot.lane.b32.xlu1 %v10247_v46, %s10107_s26  ;;  %v1179_v3 = vpop.permute.xlu1 %1178  ;;  %2820 = vmatprep.mubr.f32.mxu0 %v11711_v0  ;;  %v10637_v62 = vld [vmem:[%s11706_s6 + $0xc] sm:$0xf] }
 0x204   : > { %v10586_v7 = vsel %vm1180_vm10, %v1177_v54, %v1179_v3 }
 0x205   : > { %9552 = vmatprep.subr.msk.mxu1 %vm640_vm2, %v10586_v7 }
 0x206   : > { %1820 = vrot.lane.b32.xlu0 %v1813_v8, %s10108_s27  ;;  %v1455_v13 = vpop.permute.xlu0 %1454  ;;  %9553 = vmatpush1.msk.msra.mxu1 %vm640_vm2, %v10580_v1 }
 0x207   : > { %1994 = vrot.lane.b32.xlu1 %v10257_v50, %s10107_s26  ;;  %v1453_v15 = vpop.permute.xlu1 %1452  ;;  %9554 = vmatmul.mubr.msk.f32.vlgmr.msra.gmra.mrb[2].mxu1 %vm636_vm3, %v10593_v11 }
 0x208   : > { %v10605_v22 = vsel %vm1365_vm9, %v1453_v15, %v1455_v13  ;;  %1348 = vmatprep.mubr.f32.mxu1 %v11711_v0  ;;  %v3534_v13 = vmul.f32 %v10486_v31, %v10267_v53 }
 0x209   : > { %9609 = vmatprep.subr.msk.mxu0 %vm640_vm2, %v10605_v22  ;;  %9608 = vmatmul.mubr.msk.f32.vlgmr.msra.gmra.mrb[2].mxu0 %vm636_vm3, %v10593_v11 }
 0x20a   : > { %1818 = vrot.lane.b32.xlu0 %v1812_v25, %s10108_s27  ;;  %v1272_v33 = vpop.permute.xlu0 %1271  ;;  %2893 = vmatprep.mubr.f32.mxu0 %v11711_v0 }
 0x20b   : > { %1822 = vrot.lane.b32.xlu1 %v1814_v30, %s10108_s27  ;;  %v1451_v37 = vpop.permute.xlu1 %1450  ;;  %v3624_v30 = vmul.f32 %v10493_v34, %v10247_v46  ;;  %v3623_v46 = vmul.f32 %v10473_v16, %v10257_v50 }
 0x20c   : > { %v10620_v38 = vsel %vm1365_vm9, %v1451_v37, %v1453_v15  ;;  %v10676_v15 = vld [vmem:[%s11705_s5 + $0x10] sm:$0xf] }
 0x20d   : > { %9610 = vmatpush1.msk.msra.mxu0 %vm640_vm2, %v10620_v38  ;;  %v10715_v37 = vld [vmem:[%s11706_s6 + $0x10] sm:$0xf] }
 0x20e   : > { %2086 = vrot.lane.b32.xlu0 %v10274_v56, %s10107_s26  ;;  %v1270_v42 = vpop.permute.xlu0 %1269 }
 0x20f   : > { %v10627_v51 = vsel %vm1180_vm10, %v1270_v42, %v1272_v33  ;;  %2084 = vrot.lane.b32.xlu1 %v10277_v57, %s10107_s26  ;;  %v1274_v54 = vpop.permute.xlu1 %1273 }
 0x210   : > { %v10632_v58 = vsel %vm1180_vm10, %v1272_v33, %v1274_v54  ;;  %v3532_v33 = vmul.f32 %v10473_v16, %v10264_v52  ;;  %v3625_v52 = vmul.f32 %v10486_v31, %v10244_v45  ;;  %v10736_v45 = vld [vmem:[%s11705_s5 + $0x14] sm:$0xf]  ;;  %v10861_v16 = vld [vmem:[%s11705_s5 + $0x1c] sm:$0xf] }
 0x211   : > { %9555 = vmatprep.subr.msk.mxu1 %vm640_vm2, %v10632_v58  ;;  %9611 = vmatmul.mubr.msk.f32.vlgmr.msra.gmra.mrb[2].mxu0 %vm636_vm3, %v10637_v62  ;;  %11751 = vst [vmem:[#allocation14_spill] sm:$0xff] %v10861_v16 }
 0x212   : > { %2172 = vrot.lane.b32.xlu0 %v10280_v59, %s10107_s26  ;;  %9556 = vmatpush1.msk.msra.mxu1 %vm640_vm2, %v10627_v51  ;;  %v1545_v56 = vpop.permute.xlu0 %1544 }
 0x213   : > { %2082 = vrot.lane.b32.xlu1 %v10294_v63, %s10107_s26  ;;  %9557 = vmatmul.mubr.msk.f32.vlgmr.msra.gmra.mrb[2].mxu1 %vm636_vm3, %v10637_v62  ;;  %v1543_v57 = vpop.permute.xlu1 %1542 }
 0x214   : > { %9558 = vmatprep.subr.msk.mxu1 %vm640_vm2, %v10560_v48  ;;  %1439 = vmatprep.mubr.f32.mxu1 %v11711_v0  ;;  %v10655_v3 = vsel %vm1365_vm9, %v1543_v57, %v1545_v56 }
 0x215   : > { %9559 = vmatpush1.msk.msra.mxu1 %vm640_vm2, %v10571_v61  ;;  %9612 = vmatprep.subr.msk.mxu0 %vm640_vm2, %v10655_v3 }
 0x216   : > { %9561 = vmatprep.subr.msk.mxu1 %vm640_vm2, %v10605_v22  ;;  %2170 = vrot.lane.b32.xlu0 %v10283_v60, %s10107_s26  ;;  %v1633_v59 = vpop.permute.xlu0 %1632  ;;  %v3533_v60 = vmul.f32 %v10493_v34, %v10254_v49 }
 0x217   : > { %2174 = vrot.lane.b32.xlu1 %v10330_v9, %s10107_s26  ;;  %v1541_v63 = vpop.permute.xlu1 %1540  ;;  %2966 = vmatprep.mubr.f32.mxu0 %v11711_v0 }
 0x218   : > { %v10669_v8 = vsel %vm1365_vm9, %v1541_v63, %v1543_v57 }
 0x219   : > { %9613 = vmatpush1.msk.msra.mxu0 %vm640_vm2, %v10669_v8 }
 0x21a   : > { %3542 = vrot.lane.b32.xlu0 %v3534_v13, %s10109_s15  ;;  %v1631_v9 = vpop.permute.xlu0 %1630  ;;  %9614 = vmatmul.mubr.msk.f32.vlgmr.msra.gmra.mrb[2].mxu0 %vm636_vm3, %v10676_v15 }
 0x21b   : > { %v10686_v25 = vsel %vm1365_vm9, %v1631_v9, %v1633_v59  ;;  %3540 = vrot.lane.b32.xlu1 %v3533_v60, %s10109_s15  ;;  %9560 = vmatmul.mubr.msk.f32.vlgmr.msra.gmra.mrb[2].mxu1 %vm636_vm3, %v10676_v15  ;;  %v1635_v53 = vpop.permute.xlu1 %1634 }
 0x21c   : > { %9562 = vmatpush1.msk.msra.mxu1 %vm640_vm2, %v10620_v38  ;;  %v10694_v49 = vsel %vm1365_vm9, %v1633_v59, %v1635_v53  ;;  %1529 = vmatprep.mubr.f32.mxu1 %v11711_v0 }
 0x21d   : > { %9615 = vmatprep.subr.msk.mxu0 %vm640_vm2, %v10694_v49  ;;  %9564 = vmatprep.subr.msk.mxu1 %vm640_vm2, %v10655_v3 }
 0x21e   : > { %3631 = vrot.lane.b32.xlu0 %v3624_v30, %s10109_s15  ;;  %9616 = vmatpush1.msk.msra.mxu0 %vm640_vm2, %v10686_v25 }
 0x21f   : > { %3538 = vrot.lane.b32.xlu1 %v3532_v33, %s10109_s15  ;;  %3039 = vmatprep.mubr.f32.mxu0 %v11711_v0 }
 0x222   : > { %3629 = vrot.lane.b32.xlu0 %v3623_v46, %s10109_s15  ;;  %9617 = vmatmul.mubr.msk.f32.vlgmr.msra.gmra.mrb[2].mxu0 %vm636_vm3, %v10715_v37 }
 0x223   : > { %3633 = vrot.lane.b32.xlu1 %v3625_v52, %s10109_s15  ;;  %9563 = vmatmul.mubr.msk.f32.vlgmr.msra.gmra.mrb[2].mxu1 %vm636_vm3, %v10715_v37 }
 0x224   : > { %9565 = vmatpush1.msk.msra.mxu1 %vm640_vm2, %v10669_v8  ;;  %1619 = vmatprep.mubr.f32.mxu1 %v11711_v0 }
 0x225   : > { %9567 = vmatprep.subr.msk.mxu1 %vm640_vm2, %v10694_v49  ;;  %3140 = vmatprep.mubr.f32.mxu0 %v11711_v0 }
 0x226   : > { %4592 = vrot.lane.b32.xlu0 %v10231_v35, %s10110_s17 }
 0x227   : > { %4590 = vrot.lane.b32.xlu1 %v10234_v36, %s10110_s17  ;;  %v11750_v36 = vmov 0.0  }
 0x22a   : > { %6293 = vrot.lane.b32.xlu0 %v10217_v28, %s10111_s21  ;;  %v10752_v28 = vld [vmem:[%s11706_s6 + $0x14] sm:$0xf] }
 0x22b   : > { %6291 = vrot.lane.b32.xlu1 %v10220_v29, %s10111_s21  ;;  %9566 = vmatmul.mubr.msk.f32.vlgmr.msra.gmra.mrb[2].mxu1 %vm636_vm3, %v10736_v45 }
 0x22c   : > { %9568 = vmatpush1.msk.msra.mxu1 %vm640_vm2, %v10686_v25  ;;  %1709 = vmatprep.mubr.f32.mxu1 %v11711_v0 }
 0x22e   : > { %4786 = vrot.lane.b32.xlu0 %v10354_v17, %s10112_s22 }
 0x22f   : > { %4784 = vrot.lane.b32.xlu1 %v10357_v18, %s10112_s22 }
 0x233   : > { %4782 = vrot.lane.b32.xlu1 %v10389_v32, %s10112_s22  ;;  %9569 = vmatmul.mubr.msk.f32.vlgmr.msra.gmra.mrb[2].mxu1 %vm636_vm3, %v10752_v28 }
 0x234   : > { %1803 = vmatprep.mubr.f32.mxu1 %v11711_v0 }
 0x25c   : > { %v3068_v29 = vpop.permute.xlu0 %3067 }
 0x25d   : > { %v3066_v50 = vpop.permute.xlu1 %3065 }
 0x25e   : > { %v10760_v42 = vsel %vm3069_vm11, %v3066_v50, %v3068_v29 }
 0x25f   : > { %9618 = vmatprep.subr.msk.mxu0 %vm640_vm2, %v10760_v42 }
 0x260   : > { %v3158_v54 = vpop.permute.xlu0 %3157 }
 0x261   : > { %v3064_v56 = vpop.permute.xlu1 %3063 }
 0x262   : > { %v10765_v57 = vsel %vm3069_vm11, %v3064_v56, %v3066_v50 }
 0x263   : > { %9619 = vmatpush1.msk.msra.mxu0 %vm640_vm2, %v10765_v57 }
 0x264   : > { %v3156_v59 = vpop.permute.xlu0 %3155  ;;  %9620 = vmatmul.mubr.msk.f32.vlgmr.msra.gmra.mrb[2].mxu0 %vm636_vm3, %v10736_v45 }
 0x265   : > { %v3160_v63 = vpop.permute.xlu1 %3159  ;;  %3231 = vmatprep.mubr.f32.mxu0 %v11711_v0  ;;  %v10776_v60 = vsel %vm3069_vm11, %v3156_v59, %v3158_v54 }
 0x266   : > { %v10773_v13 = vsel %vm3069_vm11, %v3158_v54, %v3160_v63  ;;  %v10798_v54 = vld [vmem:[%s11705_s5 + $0x18] sm:$0xf] }
 0x267   : > { %9621 = vmatprep.subr.msk.mxu0 %vm640_vm2, %v10773_v13 }
 0x268   : > { %v1911_v9 = vpop.permute.xlu0 %1910  ;;  %9622 = vmatpush1.msk.msra.mxu0 %vm640_vm2, %v10776_v60 }
 0x269   : > { %v1909_v53 = vpop.permute.xlu1 %1908 }
 0x26a   : > { %v10783_v30 = vsel %vm1365_vm9, %v1909_v53, %v1911_v9 }
 0x26b   : > { %9624 = vmatprep.subr.msk.mxu0 %vm640_vm2, %v10783_v30 }
 0x26c   : > { %v1727_v33 = vpop.permute.xlu0 %1726  ;;  %9623 = vmatmul.mubr.msk.f32.vlgmr.msra.gmra.mrb[2].mxu0 %vm636_vm3, %v10752_v28 }
 0x26d   : > { %v1907_v46 = vpop.permute.xlu1 %1906  ;;  %3304 = vmatprep.mubr.f32.mxu0 %v11711_v0 }
 0x26e   : > { %v10791_v52 = vsel %vm1365_vm9, %v1907_v46, %v1909_v53 }
 0x26f   : > { %9625 = vmatpush1.msk.msra.mxu0 %vm640_vm2, %v10791_v52 }
 0x270   : > { %v1725_v29 = vpop.permute.xlu0 %1724 }
 0x271   : > { %v1729_v50 = vpop.permute.xlu1 %1728  ;;  %v10804_v59 = vsel %vm1180_vm10, %v1725_v29, %v1727_v33  ;;  %v10824_v29 = vld [vmem:[%s11706_s6 + $0x18] sm:$0xf] }
 0x272   : > { %v10801_v56 = vsel %vm1180_vm10, %v1727_v33, %v1729_v50  ;;  %11749 = vst [vmem:[#allocation13_spill] sm:$0xff] %v10824_v29 }
 0x273   : > { %9570 = vmatprep.subr.msk.mxu1 %vm640_vm2, %v10801_v56 }
 0x274   : > { %v1999_v63 = vpop.permute.xlu0 %1998  ;;  %9571 = vmatpush1.msk.msra.mxu1 %vm640_vm2, %v10804_v59  ;;  %9626 = vmatmul.mubr.msk.f32.vlgmr.msra.gmra.mrb[2].mxu0 %vm636_vm3, %v10798_v54 }
 0x275   : > { %v1997_v9 = vpop.permute.xlu1 %1996  ;;  %9572 = vmatmul.mubr.msk.f32.vlgmr.msra.gmra.mrb[2].mxu1 %vm636_vm3, %v10798_v54  ;;  %3377 = vmatprep.mubr.f32.mxu0 %v11711_v0 }
 0x276   : > { %v10816_v53 = vsel %vm1365_vm9, %v1997_v9, %v1999_v63  ;;  %1897 = vmatprep.mubr.f32.mxu1 %v11711_v0 }
 0x277   : > { %9627 = vmatprep.subr.msk.mxu0 %vm640_vm2, %v10816_v53 }
 0x278   : > { %v1821_v33 = vpop.permute.xlu0 %1820 }
 0x279   : > { %v1995_v46 = vpop.permute.xlu1 %1994 }
 0x27a   : > { %v10827_v50 = vsel %vm1365_vm9, %v1995_v46, %v1997_v9 }
 0x27b   : > { %9628 = vmatpush1.msk.msra.mxu0 %vm640_vm2, %v10827_v50 }
 0x27c   : > { %v1819_v63 = vpop.permute.xlu0 %1818  ;;  %9629 = vmatmul.mubr.msk.f32.vlgmr.msra.gmra.mrb[2].mxu0 %vm636_vm3, %v10824_v29 }
 0x27d   : > { %v1823_v0 = vpop.permute.xlu1 %1822  ;;  %3450 = vmatprep.mubr.f32.mxu0 %v11750_v36  ;;  %v10838_v31 = vsel %vm1180_vm10, %v1819_v63, %v1821_v33 }
 0x27e   : > { %v10835_v35 = vsel %vm1180_vm10, %v1821_v33, %v1823_v0 }
 0x27f   : > { %9573 = vmatprep.subr.msk.mxu1 %vm640_vm2, %v10835_v35 }
 0x280   : > { %v2087_v9 = vpop.permute.xlu0 %2086  ;;  %9574 = vmatpush1.msk.msra.mxu1 %vm640_vm2, %v10838_v31 }
 0x281   : > { %9575 = vmatmul.mubr.msk.f32.vlgmr.msra.gmra.mrb[2].mxu1 %vm636_vm3, %v10824_v29  ;;  %9576 = vmatprep.subr.msk.mxu1 %vm640_vm2, %v10783_v30  ;;  %v2085_v46 = vpop.permute.xlu1 %2084 }
 0x282   : > { %v10849_v0 = vsel %vm1365_vm9, %v2085_v46, %v2087_v9  ;;  %9577 = vmatpush1.msk.msra.mxu1 %vm640_vm2, %v10791_v52  ;;  %1985 = vmatprep.mubr.f32.mxu1 %v11750_v36 }
 0x283   : > { %9579 = vmatprep.subr.msk.mxu1 %vm640_vm2, %v10816_v53  ;;  %9630 = vmatprep.subr.msk.mxu0 %vm640_vm2, %v10849_v0 }
 0x284   : > { %v2173_v33 = vpop.permute.xlu0 %2172 }
 0x285   : > { %v2083_v63 = vpop.permute.xlu1 %2082 }
 0x286   : > { %v10864_v9 = vsel %vm1365_vm9, %v2083_v63, %v2085_v46 }
 0x287   : > { %9631 = vmatpush1.msk.msra.mxu0 %vm640_vm2, %v10864_v9 }
 0x288   : > { %v2171_v34 = vpop.permute.xlu0 %2170  ;;  %9632 = vmatmul.mubr.msk.f32.vlgmr.msra.gmra.mrb[2].mxu0 %vm636_vm3, %v10861_v16 }
 0x289   : > { %9578 = vmatmul.mubr.msk.f32.vlgmr.msra.gmra.mrb[2].mxu1 %vm636_vm3, %v10861_v16  ;;  %v2175_v19 = vpop.permute.xlu1 %2174  ;;  %3523 = vmatprep.mubr.f32.mxu0 %v11750_v36  ;;  %v10880_v46 = vsel %vm1365_vm9, %v2171_v34, %v2173_v33 }
 0x28a   : > { %9580 = vmatpush1.msk.msra.mxu1 %vm640_vm2, %v10827_v50  ;;  %v10876_v20 = vsel %vm1365_vm9, %v2173_v33, %v2175_v19  ;;  %2073 = vmatprep.mubr.f32.mxu1 %v11750_v36  ;;  %v10891_v19 = vld [vmem:[%s11706_s6 + $0x1c] sm:$0xf] }
 0x28b   : > { %9582 = vmatprep.subr.msk.mxu1 %vm640_vm2, %v10849_v0  ;;  %9633 = vmatprep.subr.msk.mxu0 %vm640_vm2, %v10876_v20  ;;  %11752 = vst [vmem:[#allocation15_spill] sm:$0xff] %v10891_v19 }
 0x28c   : > { %v3543_v63 = vpop.permute.xlu0 %3542  ;;  %9634 = vmatpush1.msk.msra.mxu0 %vm640_vm2, %v10880_v46 }
 0x28d   : > { %v3541_v24 = vpop.permute.xlu1 %3540 }
 0x28e   : > { %v10894_v4 = vsel %vm3069_vm11, %v3541_v24, %v3543_v63 }
 0x28f   : > { %9636 = vmatprep.subr.msk.mxu0 %vm640_vm2, %v10894_v4 }
 0x290   : > { %v3632_v34 = vpop.permute.xlu0 %3631  ;;  %9635 = vmatmul.mubr.msk.f32.vlgmr.msra.gmra.mrb[2].mxu0 %vm636_vm3, %v10891_v19 }
 0x291   : > { %9581 = vmatmul.mubr.msk.f32.vlgmr.msra.gmra.mrb[2].mxu1 %vm636_vm3, %v10891_v19  ;;  %v3539_v33 = vpop.permute.xlu1 %3538  ;;  %3614 = vmatprep.mubr.f32.mxu0 %v11750_v36  ;;  %v10916_v19 = vld [vmem:[%s11705_s5 + $0x20] sm:$0xf] }
 0x292   : > { %9583 = vmatpush1.msk.msra.mxu1 %vm640_vm2, %v10864_v9  ;;  %v10906_v5 = vsel %vm3069_vm11, %v3539_v33, %v3541_v24  ;;  %2161 = vmatprep.mubr.f32.mxu1 %v11750_v36  ;;  %11753 = vst [vmem:[#allocation16_spill] sm:$0xff] %v10916_v19 }
 0x293   : > { %9585 = vmatprep.subr.msk.mxu1 %vm640_vm2, %v10876_v20  ;;  %9637 = vmatpush1.msk.msra.mxu0 %vm640_vm2, %v10906_v5 }
 0x294   : > { %v3630_v63 = vpop.permute.xlu0 %3629 }
 0x295   : > { %v3634_v10 = vpop.permute.xlu1 %3633  ;;  %v10924_v24 = vsel %vm3069_vm11, %v3630_v63, %v3632_v34 }
 0x296   : > { %v10919_v16 = vsel %vm3069_vm11, %v3632_v34, %v3634_v10 }
 0x297   : > { %9639 = vmatprep.subr.msk.mxu0 %vm640_vm2, %v10919_v16 }
 0x298   : > { %v10926_v33 = vpop.permute.xlu0 %4592  ;;  %9638 = vmatmul.mubr.msk.f32.vlgmr.msra.gmra.mrb[2].mxu0 %vm636_vm3, %v10916_v19 }
 0x299   : > { %9640 = vmatpush1.msk.msra.mxu0 %vm640_vm2, %v10924_v24  ;;  %9584 = vmatmul.mubr.msk.f32.vlgmr.msra.gmra.mrb[2].mxu1 %vm636_vm3, %v10916_v19  ;;  %v10934_v10 = vpop.permute.xlu1 %4590  ;;  %v4601_v29 = vmul.f32 %v10926_v33, %v10386_v27  ;;  %v10957_v19 = vld [vmem:[%s11706_s6 + $0x20] sm:$0xf] }
 0x29a   : > { %9586 = vmatpush1.msk.msra.mxu1 %vm640_vm2, %v10880_v46  ;;  %9696 = vmatprep.subr.msk.mxu0 %vm640_vm2, %v10605_v22  ;;  %v10944_v34 = vsel %vm4594_vm12, %v10934_v10, %v10926_v33 }
 0x29b   : > { %9642 = vmatprep.subr.msk.mxu1 %vm640_vm2, %v10632_v58  ;;  %4609 = vrot.lane.b32.xlu1 %v4601_v29, %s10113_s30  ;;  %v4600_v63 = vmul.f32 %v10944_v34, %v10366_v21  ;;  %v4599_v58 = vmul.f32 %v10934_v10, %v10382_v26 }
 0x29c   : > { %3705 = vmatprep.mubr.f32.mxu0 %v11750_v36  ;;  %2249 = vmatprep.mubr.f32.mxu1 %v11750_v36 }
 0x29d   : > { %4607 = vrot.lane.b32.xlu0 %v4600_v63, %s10113_s30 }
 0x29f   : > { %4870 = vrot.lane.b32.xlu1 %v10409_v41, %s10112_s22 }
 0x2a0   : > { %9641 = vmatmul.mubr.msk.f32.vlgmr.msra.gmra.mrb[2].mxu0 %vm636_vm3, %v10957_v19 }
 0x2a1   : > { %9697 = vmatpush1.msk.msra.mxu0 %vm640_vm2, %v10620_v38  ;;  %9587 = vmatmul.mubr.msk.f32.vlgmr.msra.gmra.mrb[2].mxu1 %vm636_vm3, %v10957_v19 }
 0x2a2   : > { %9643 = vmatpush1.msk.msra.mxu1 %vm640_vm2, %v10627_v51  ;;  %9699 = vmatprep.subr.msk.mxu0 %vm640_vm2, %v10560_v48  ;;  %v4693_v51 = vmul.f32 %v10926_v33, %v10419_v44 }
 0x2a3   : > { %4605 = vrot.lane.b32.xlu0 %v4599_v58, %s10113_s30  ;;  %9645 = vmatprep.subr.msk.mxu1 %vm640_vm2, %v10586_v7 }
 0x2a4   : > { %4868 = vrot.lane.b32.xlu1 %v10422_v47, %s10112_s22  ;;  %5191 = vmatprep.mubr.f32.mxu0 %v11750_v36 }
 0x2a5   : > { %3782 = vmatprep.mubr.f32.mxu1 %v11750_v36  ;;  %9698 = vmatmul.mubr.msk.f32.vlgmr.msra.gmra.mrb[4].mxu0 %vm636_vm3, %v10302_v2 }
 0x2a6   : > { %9700 = vmatpush1.msk.msra.mxu0 %vm640_vm2, %v10571_v61  ;;  %9644 = vmatmul.mubr.msk.f32.vlgmr.msra.gmra.mrb[4].mxu1 %vm636_vm3, %v10302_v2  ;;  %v4692_v2 = vmul.f32 %v10944_v34, %v10401_v39 }
 0x2a7   : > { %9646 = vmatpush1.msk.msra.mxu1 %vm640_vm2, %v10580_v1  ;;  %9702 = vmatprep.subr.msk.mxu0 %vm640_vm2, %v10655_v3  ;;  %v11021_v1 = vpop.permute.xlu1 %6291 }
 0x2a8   : > { %4872 = vrot.lane.b32.xlu0 %v10404_v40, %s10112_s22  ;;  %9648 = vmatprep.subr.msk.mxu1 %vm640_vm2, %v10560_v48  ;;  %v4691_v48 = vmul.f32 %v10934_v10, %v10416_v43 }
 0x2a9   : > { %4701 = vrot.lane.b32.xlu1 %v4693_v51, %s10113_s30  ;;  %5262 = vmatprep.mubr.f32.mxu0 %v11750_v36 }
 0x2aa   : > { %3853 = vmatprep.mubr.f32.mxu1 %v11750_v36 }
 0x2ac   : > { %4699 = vrot.lane.b32.xlu0 %v4692_v2, %s10113_s30 }
 0x2ad   : > { %4955 = vrot.lane.b32.xlu1 %v10366_v21, %s10112_s22  ;;  %9701 = vmatmul.mubr.msk.f32.vlgmr.msra.gmra.mrb[4].mxu0 %vm636_vm3, %v10325_v6  ;;  %v11019_v21 = vpop.permute.xlu0 %6293 }
 0x2ae   : > { %9703 = vmatpush1.msk.msra.mxu0 %vm640_vm2, %v10669_v8  ;;  %9647 = vmatmul.mubr.msk.f32.vlgmr.msra.gmra.mrb[4].mxu1 %vm636_vm3, %v10325_v6  ;;  %v11029_v6 = vsel %vm6295_vm13, %v11021_v1, %v11019_v21 }
 0x2af   : > { %9649 = vmatpush1.msk.msra.mxu1 %vm640_vm2, %v10571_v61  ;;  %9705 = vmatprep.subr.msk.mxu0 %vm640_vm2, %v10694_v49 }
 0x2b0   : > { %4697 = vrot.lane.b32.xlu0 %v4691_v48, %s10113_s30  ;;  %9651 = vmatprep.subr.msk.mxu1 %vm640_vm2, %v10605_v22  ;;  %v11754_v22 = vld [vmem:[#allocation13_spill] sm:$0xff] }
 0x2b1   : > { %4953 = vrot.lane.b32.xlu1 %v10382_v26, %s10112_s22  ;;  %5333 = vmatprep.mubr.f32.mxu0 %v11750_v36  ;;  %v6301_v26 = vmul.f32 %v11029_v6, %v10357_v18  ;;  %v6302_v18 = vmul.f32 %v11019_v21, %v10354_v17  ;;  %v6393_v17 = vmul.f32 %v11029_v6, %v10409_v41 }
 0x2b2   : > { %3924 = vmatprep.mubr.f32.mxu1 %v11750_v36 }
 0x2b4   : > { %4957 = vrot.lane.b32.xlu0 %v10386_v27, %s10112_s22  ;;  %v6300_v27 = vmul.f32 %v11021_v1, %v10389_v32  ;;  %v6394_v32 = vmul.f32 %v11019_v21, %v10404_v40  ;;  %v6392_v40 = vmul.f32 %v11021_v1, %v10422_v47 }
 0x2b5   : > { %5042 = vrot.lane.b32.xlu1 %v10419_v44, %s10112_s22  ;;  %9704 = vmatmul.mubr.msk.f32.vlgmr.msra.gmra.mrb[4].mxu0 %vm636_vm3, %v10457_v12 }
 0x2b6   : > { %9706 = vmatpush1.msk.msra.mxu0 %vm640_vm2, %v10686_v25  ;;  %9650 = vmatmul.mubr.msk.f32.vlgmr.msra.gmra.mrb[4].mxu1 %vm636_vm3, %v10457_v12 }
 0x2b7   : > { %9652 = vmatpush1.msk.msra.mxu1 %vm640_vm2, %v10620_v38  ;;  %9708 = vmatprep.subr.msk.mxu0 %vm640_vm2, %v10760_v42  ;;  %v11755_v42 = vld [vmem:[#allocation14_spill] sm:$0xff] }
 0x2b8   : > { %5040 = vrot.lane.b32.xlu0 %v10401_v39, %s10112_s22  ;;  %9654 = vmatprep.subr.msk.mxu1 %vm640_vm2, %v10655_v3  ;;  %v404_v39 = vld [vmem:[%s11707_s7] sm:$0xf] }
 0x2b9   : > { %6308 = vrot.lane.b32.xlu1 %v6301_v26, %s10114_s16  ;;  %5406 = vmatprep.mubr.f32.mxu0 %v11750_v36 }
 0x2ba   : > { %3997 = vmatprep.mubr.f32.mxu1 %v11750_v36 }
 0x2bc   : > { %5038 = vrot.lane.b32.xlu0 %v10416_v43, %s10112_s22 }
 0x2bd   : > { %6306 = vrot.lane.b32.xlu1 %v6300_v27, %s10114_s16  ;;  %9707 = vmatmul.mubr.msk.f32.vlgmr.msra.gmra.mrb[4].mxu0 %vm636_vm3, %v10479_v23 }
 0x2be   : > { %9709 = vmatpush1.msk.msra.mxu0 %vm640_vm2, %v10765_v57  ;;  %9653 = vmatmul.mubr.msk.f32.vlgmr.msra.gmra.mrb[4].mxu1 %vm636_vm3, %v10479_v23 }
 0x2bf   : > { %9655 = vmatpush1.msk.msra.mxu1 %vm640_vm2, %v10669_v8  ;;  %9711 = vmatprep.subr.msk.mxu0 %vm640_vm2, %v10773_v13 }
 0x2c0   : > { %6310 = vrot.lane.b32.xlu0 %v6302_v18, %s10114_s16  ;;  %9657 = vmatprep.subr.msk.mxu1 %vm640_vm2, %v10694_v49 }
 0x2c1   : > { %6402 = vrot.lane.b32.xlu1 %v6394_v32, %s10114_s16  ;;  %5479 = vmatprep.mubr.f32.mxu0 %v11750_v36 }
 0x2c2   : > { %4070 = vmatprep.mubr.f32.mxu1 %v11750_v36 }
 0x2c4   : > { %6400 = vrot.lane.b32.xlu0 %v6393_v17, %s10114_s16 }
 0x2c5   : > { %9710 = vmatmul.mubr.msk.f32.vlgmr.msra.gmra.mrb[4].mxu0 %vm636_vm3, %v10509_v55  ;;  %2260 = vperm.xlu1 %10090, %v404_v39  }
 0x2c6   : > { %9712 = vmatpush1.msk.msra.mxu0 %vm640_vm2, %v10776_v60  ;;  %9656 = vmatmul.mubr.msk.f32.vlgmr.msra.gmra.mrb[4].mxu1 %vm636_vm3, %v10509_v55 }
 0x2c7   : > { %9658 = vmatpush1.msk.msra.mxu1 %vm640_vm2, %v10686_v25  ;;  %9714 = vmatprep.subr.msk.mxu0 %vm640_vm2, %v10783_v30 }
 0x2c8   : > { %6398 = vrot.lane.b32.xlu0 %v6392_v40, %s10114_s16  ;;  %9660 = vmatprep.subr.msk.mxu1 %vm640_vm2, %v10801_v56  ;;  %v11756_v56 = vld [vmem:[#allocation15_spill] sm:$0xff] }
 0x2c9   : > { %5552 = vmatprep.mubr.f32.mxu0 %v11750_v36  ;;  %4143 = vmatprep.mubr.f32.mxu1 %v11750_v36 }
 0x2cd   : > { %9713 = vmatmul.mubr.msk.f32.vlgmr.msra.gmra.mrb[4].mxu0 %vm636_vm3, %v10537_v14 }
 0x2ce   : > { %9715 = vmatpush1.msk.msra.mxu0 %vm640_vm2, %v10791_v52  ;;  %9659 = vmatmul.mubr.msk.f32.vlgmr.msra.gmra.mrb[4].mxu1 %vm636_vm3, %v10537_v14 }
 0x2cf   : > { %9661 = vmatpush1.msk.msra.mxu1 %vm640_vm2, %v10804_v59  ;;  %9717 = vmatprep.subr.msk.mxu0 %vm640_vm2, %v10816_v53 }
 0x2d0   : > { %9663 = vmatprep.subr.msk.mxu1 %vm640_vm2, %v10835_v35  ;;  %5625 = vmatprep.mubr.f32.mxu0 %v11750_v36  ;;  %v4787_v35 = vpop.permute.xlu0 %4786 }
 0x2d1   : > { %4216 = vmatprep.mubr.f32.mxu1 %v11750_v36 }
 0x2d5   : > { %9716 = vmatmul.mubr.msk.f32.vlgmr.msra.gmra.mrb[4].mxu0 %vm636_vm3, %v10593_v11 }
 0x2d6   : > { %9718 = vmatpush1.msk.msra.mxu0 %vm640_vm2, %v10827_v50  ;;  %9662 = vmatmul.mubr.msk.f32.vlgmr.msra.gmra.mrb[4].mxu1 %vm636_vm3, %v10593_v11 }
 0x2d7   : > { %9664 = vmatpush1.msk.msra.mxu1 %vm640_vm2, %v10838_v31  ;;  %9720 = vmatprep.subr.msk.mxu0 %vm640_vm2, %v10849_v0 }
 0x2d8   : > { %9666 = vmatprep.subr.msk.mxu1 %vm640_vm2, %v10783_v30  ;;  %5698 = vmatprep.mubr.f32.mxu0 %v11750_v36 }
 0x2d9   : > { %4289 = vmatprep.mubr.f32.mxu1 %v11750_v36 }
 0x2dd   : > { %9719 = vmatmul.mubr.msk.f32.vlgmr.msra.gmra.mrb[4].mxu0 %vm636_vm3, %v10637_v62 }
 0x2de   : > { %9721 = vmatpush1.msk.msra.mxu0 %vm640_vm2, %v10864_v9  ;;  %9665 = vmatmul.mubr.msk.f32.vlgmr.msra.gmra.mrb[4].mxu1 %vm636_vm3, %v10637_v62 }
 0x2df   : > { %9667 = vmatpush1.msk.msra.mxu1 %vm640_vm2, %v10791_v52  ;;  %9723 = vmatprep.subr.msk.mxu0 %vm640_vm2, %v10876_v20 }
 0x2e0   : > { %9669 = vmatprep.subr.msk.mxu1 %vm640_vm2, %v10816_v53  ;;  %5771 = vmatprep.mubr.f32.mxu0 %v11750_v36 }
 0x2e1   : > { %4362 = vmatprep.mubr.f32.mxu1 %v11750_v36 }
 0x2e5   : > { %9722 = vmatmul.mubr.msk.f32.vlgmr.msra.gmra.mrb[4].mxu0 %vm636_vm3, %v10676_v15 }
 0x2e6   : > { %9724 = vmatpush1.msk.msra.mxu0 %vm640_vm2, %v10880_v46  ;;  %9668 = vmatmul.mubr.msk.f32.vlgmr.msra.gmra.mrb[4].mxu1 %vm636_vm3, %v10676_v15 }
 0x2e7   : > { %9670 = vmatpush1.msk.msra.mxu1 %vm640_vm2, %v10827_v50  ;;  %9726 = vmatprep.subr.msk.mxu0 %vm640_vm2, %v10894_v4  ;;  %v4785_v4 = vpop.permute.xlu1 %4784 }
 0x2e8   : > { %9672 = vmatprep.subr.msk.mxu1 %vm640_vm2, %v10849_v0  ;;  %5844 = vmatprep.mubr.f32.mxu0 %v11750_v36 }
 0x2e9   : > { %4435 = vmatprep.mubr.f32.mxu1 %v11750_v36 }
 0x2ed   : > { %9725 = vmatmul.mubr.msk.f32.vlgmr.msra.gmra.mrb[4].mxu0 %vm636_vm3, %v10715_v37 }
 0x2ee   : > { %9727 = vmatpush1.msk.msra.mxu0 %vm640_vm2, %v10906_v5  ;;  %9671 = vmatmul.mubr.msk.f32.vlgmr.msra.gmra.mrb[4].mxu1 %vm636_vm3, %v10715_v37  ;;  %v4790_v5 = vsel %vm4788_vm14, %v4785_v4, %v4787_v35 }
 0x2ef   : > { %9673 = vmatpush1.msk.msra.mxu1 %vm640_vm2, %v10864_v9  ;;  %9729 = vmatprep.subr.msk.mxu0 %vm640_vm2, %v10919_v16 }
 0x2f0   : > { %9675 = vmatprep.subr.msk.mxu1 %vm640_vm2, %v10876_v20  ;;  %5917 = vmatprep.mubr.f32.mxu0 %v11750_v36  ;;  %v4783_v20 = vpop.permute.xlu1 %4782 }
 0x2f1   : > { %4508 = vmatprep.mubr.f32.mxu1 %v11750_v36  ;;  %v4789_v41 = vsel %vm4788_vm14, %v4783_v20, %v4785_v4 }
 0x2f5   : > { %9728 = vmatmul.mubr.msk.f32.vlgmr.msra.gmra.mrb[4].mxu0 %vm636_vm3, %v10736_v45 }
 0x2f6   : > { %9730 = vmatpush1.msk.msra.mxu0 %vm640_vm2, %v10924_v24  ;;  %9674 = vmatmul.mubr.msk.f32.vlgmr.msra.gmra.mrb[4].mxu1 %vm636_vm3, %v10736_v45 }
 0x2f7   : > { %9676 = vmatpush1.msk.msra.mxu1 %vm640_vm2, %v10880_v46  ;;  %9732 = vmatprep.subr.msk.mxu0 %vm640_vm2, %v4790_v5  ;;  %v11757_v46 = vld [vmem:[#allocation16_spill] sm:$0xff] }
 0x2f8   : > { %5990 = vmatprep.mubr.f32.mxu0 %v11750_v36  ;;  %4581 = vmatprep.mubr.f32.mxu1 %v11750_v36 }
 0x2fd   : > { %9731 = vmatmul.mubr.msk.f32.vlgmr.msra.gmra.mrb[4].mxu0 %vm636_vm3, %v10752_v28 }
 0x2fe   : > { %9733 = vmatpush1.msk.msra.mxu0 %vm640_vm2, %v4789_v41  ;;  %9677 = vmatmul.mubr.msk.f32.vlgmr.msra.gmra.mrb[4].mxu1 %vm636_vm3, %v10752_v28 }
 0x2ff   : > { %6063 = vmatprep.mubr.f32.mxu0 %v11750_v36  ;;  %4682 = vmatprep.mubr.f32.mxu1 %v11750_v36 }
 0x305   : > { %9734 = vmatmul.mubr.msk.f32.vlgmr.msra.gmra.mrb[4].mxu0 %vm636_vm3, %v10798_v54 }
 0x306   : > { %6136 = vmatprep.mubr.f32.mxu0 %v11750_v36 }
 0x30d   : > { %v4610_v43 = vpop.permute.xlu1 %4609 }
 0x30f   : > { %v4608_v44 = vpop.permute.xlu0 %4607 }
 0x310   : > { %v4613_v47 = vsel %vm4611_vm15, %v4608_v44, %v4610_v43 }
 0x311   : > { %9678 = vmatprep.subr.msk.mxu1 %vm640_vm2, %v4613_v47  ;;  %v4871_v12 = vpop.permute.xlu1 %4870 }
 0x315   : > { %v4606_v16 = vpop.permute.xlu0 %4605 }
 0x316   : > { %v4612_v23 = vsel %vm4611_vm15, %v4606_v16, %v4608_v44  ;;  %v4869_v31 = vpop.permute.xlu1 %4868 }
 0x317   : > { %9679 = vmatpush1.msk.msra.mxu1 %vm640_vm2, %v4612_v23  ;;  %v4874_v7 = vsel %vm4788_vm14, %v4869_v31, %v4871_v12 }
 0x318   : > { %9680 = vmatmul.mubr.msk.f32.vlgmr.msra.gmra.mrb[4].mxu1 %vm636_vm3, %v10798_v54 }
 0x319   : > { %4773 = vmatprep.mubr.f32.mxu1 %v11750_v36 }
 0x31a   : > { %v4873_v55 = vpop.permute.xlu0 %4872 }
 0x31b   : > { %v4875_v14 = vsel %vm4788_vm14, %v4871_v12, %v4873_v55  ;;  %v4702_v61 = vpop.permute.xlu1 %4701 }
 0x31c   : > { %9735 = vmatprep.subr.msk.mxu0 %vm640_vm2, %v4875_v14 }
 0x31d   : > { %9736 = vmatpush1.msk.msra.mxu0 %vm640_vm2, %v4874_v7 }
 0x31e   : > { %v4700_v11 = vpop.permute.xlu0 %4699  ;;  %9737 = vmatmul.mubr.msk.f32.vlgmr.msra.gmra.mrb[4].mxu0 %vm636_vm3, %v11754_v22 }
 0x31f   : > { %v4704_v38 = vsel %vm4611_vm15, %v4700_v11, %v4702_v61  ;;  %v4956_v62 = vpop.permute.xlu1 %4955  ;;  %6209 = vmatprep.mubr.f32.mxu0 %v11750_v36 }
 0x320   : > { %9681 = vmatprep.subr.msk.mxu1 %vm640_vm2, %v4704_v38 }
 0x322   : > { %v4698_v3 = vpop.permute.xlu0 %4697 }
 0x323   : > { %v4703_v8 = vsel %vm4611_vm15, %v4698_v3, %v4700_v11  ;;  %v4954_v15 = vpop.permute.xlu1 %4953 }
 0x324   : > { %9682 = vmatpush1.msk.msra.mxu1 %vm640_vm2, %v4703_v8  ;;  %v4959_v45 = vsel %vm4788_vm14, %v4954_v15, %v4956_v62  ;;  %v11758_v8 = vld [vmem:[#allocation6_spill] sm:$0xff] }
 0x325   : > { %9683 = vmatmul.mubr.msk.f32.vlgmr.msra.gmra.mrb[4].mxu1 %vm636_vm3, %v11754_v22  ;;  %9684 = vmatprep.subr.msk.mxu1 %vm640_vm2, %v4790_v5 }
 0x326   : > { %v4958_v25 = vpop.permute.xlu0 %4957  ;;  %9685 = vmatpush1.msk.msra.mxu1 %vm640_vm2, %v4789_v41  ;;  %4859 = vmatprep.mubr.f32.mxu1 %v11750_v36 }
 0x327   : > { %v4960_v49 = vsel %vm4788_vm14, %v4956_v62, %v4958_v25  ;;  %9687 = vmatprep.subr.msk.mxu1 %vm640_vm2, %v4875_v14  ;;  %v5043_v37 = vpop.permute.xlu1 %5042 }
 0x328   : > { %9738 = vmatprep.subr.msk.mxu0 %vm640_vm2, %v4960_v49 }
 0x329   : > { %9739 = vmatpush1.msk.msra.mxu0 %vm640_vm2, %v4959_v45 }
 0x32a   : > { %v5041_v28 = vpop.permute.xlu0 %5040  ;;  %9740 = vmatmul.mubr.msk.f32.vlgmr.msra.gmra.mrb[4].mxu0 %vm636_vm3, %v11755_v42 }
 0x32b   : > { %v5045_v57 = vsel %vm4788_vm14, %v5041_v28, %v5043_v37  ;;  %v6309_v13 = vpop.permute.xlu1 %6308  ;;  %6282 = vmatprep.mubr.f32.mxu0 %v11750_v36 }
 0x32c   : > { %9741 = vmatprep.subr.msk.mxu0 %vm640_vm2, %v5045_v57 }
 0x32d   : > { %9686 = vmatmul.mubr.msk.f32.vlgmr.msra.gmra.mrb[4].mxu1 %vm636_vm3, %v11755_v42  ;;  %v11760_v42 = vld [vmem:[#allocation4_spill] sm:$0xff] }
 0x32e   : > { %9688 = vmatpush1.msk.msra.mxu1 %vm640_vm2, %v4874_v7  ;;  %v5039_v60 = vpop.permute.xlu0 %5038  ;;  %4944 = vmatprep.mubr.f32.mxu1 %v11750_v36 }
 0x32f   : > { %v5044_v30 = vsel %vm4788_vm14, %v5039_v60, %v5041_v28  ;;  %9690 = vmatprep.subr.msk.mxu1 %vm640_vm2, %v4960_v49  ;;  %v6307_v52 = vpop.permute.xlu1 %6306 }
 0x330   : > { %9742 = vmatpush1.msk.msra.mxu0 %vm640_vm2, %v5044_v30  ;;  %v6313_v53 = vsel %vm6312_vm0, %v6307_v52, %v6309_v13 }
 0x332   : > { %v6311_v54 = vpop.permute.xlu0 %6310  ;;  %9743 = vmatmul.mubr.msk.f32.vlgmr.msra.gmra.mrb[4].mxu0 %vm636_vm3, %v11756_v56 }
 0x333   : > { %v6314_v59 = vsel %vm6312_vm0, %v6309_v13, %v6311_v54  ;;  %6383 = vmatprep.mubr.f32.mxu0 %v11750_v36  ;;  %v6403_v29 = vpop.permute.xlu1 %6402 }
 0x334   : > { %9744 = vmatprep.subr.msk.mxu0 %vm640_vm2, %v6314_v59 }
 0x335   : > { %9689 = vmatmul.mubr.msk.f32.vlgmr.msra.gmra.mrb[4].mxu1 %vm636_vm3, %v11756_v56  ;;  %9745 = vmatpush1.msk.msra.mxu0 %vm640_vm2, %v6313_v53  ;;  %v11761_v56 = vld [vmem:[#allocation9_spill] sm:$0xff] }
 0x336   : > { %9691 = vmatpush1.msk.msra.mxu1 %vm640_vm2, %v4959_v45  ;;  %v6401_v50 = vpop.permute.xlu0 %6400  ;;  %5029 = vmatprep.mubr.f32.mxu1 %v11750_v36  ;;  %v11759_v45 = vld [vmem:[#allocation5_spill] sm:$0xff] }
 0x337   : > { %v6405_v0 = vsel %vm6312_vm0, %v6401_v50, %v6403_v29  ;;  %9693 = vmatprep.subr.msk.mxu1 %vm640_vm2, %v5045_v57 }
 0x338   : > { %9747 = vmatprep.subr.msk.mxu0 %vm640_vm2, %v6405_v0  ;;  %v11762_v0 = vld [vmem:[#allocation8_spill] sm:$0xff] }
 0x33a   : > { %v6399_v9 = vpop.permute.xlu0 %6398  ;;  %9746 = vmatmul.mubr.msk.f32.vlgmr.msra.gmra.mrb[4].mxu0 %vm636_vm3, %v11757_v46 }
 0x33b   : > { %v6404_v24 = vsel %vm6312_vm0, %v6399_v9, %v6401_v50  ;;  %6474 = vmatprep.mubr.f32.mxu0 %v11750_v36 }
 0x33c   : > { %9748 = vmatpush1.msk.msra.mxu0 %vm640_vm2, %v6404_v24 }
 0x33d   : > { %9692 = vmatmul.mubr.msk.f32.vlgmr.msra.gmra.mrb[4].mxu1 %vm636_vm3, %v11757_v46  ;;  %v11763_v46 = vld [vmem:[#allocation7_spill] sm:$0xff] }
 0x33e   : > { %9694 = vmatpush1.msk.msra.mxu1 %vm640_vm2, %v5044_v30  ;;  %5114 = vmatprep.mubr.f32.mxu1 %v11750_v36 }
 0x342   : > { %9749 = vmatmul.mubr.msk.f32.vlgmr.msra.gmra.mrb[4].mxu0 %vm636_vm3, %v10957_v19 }
 0x343   : > { %7412 = vmatprep.mubr.f32.mxu0 %v11750_v36 }
 0x344   : > { %v2261_v48 = vpop.permute.xlu1 %2260 }
 0x345   : > { %9695 = vmatmul.mubr.msk.f32.vlgmr.msra.gmra.mrb[4].mxu1 %vm636_vm3, %v10957_v19 }
 0x346   : > { %6618 = vmatprep.mubr.f32.mxu1 %v11750_v36 }
 0x373   : > { %v3707_v63 = vpop.f32.mrb[2].mxu0 }
 0x374   : > { %v2251_v58 = vpop.f32.mrb[2].mxu1  ;;  %v3709_v51 = vpop.f32.mrb[3].mxu0  ;;  %v3714_v47 = vadd.f32 %v3707_v63, %v2261_v48  ;;  %v11764_v63 = vld [vmem:[#allocation12_spill] sm:$0xff] }
 0x375   : > { %v2253_v2 = vpop.f32.mrb[3].mxu1  ;;  %v2263_v20 = vadd.f32 %v2261_v48, %v2251_v58  ;;  %v3715_v12 = vadd.f32 %v3709_v51, %v2261_v48  ;;  %v11765_v51 = vld [vmem:[#allocation10_spill] sm:$0xff] }
 0x376   : > { %v2264_v43 = vadd.f32 %v2261_v48, %v2253_v2  ;;  %v3716_v23 = vmax.f32 %v3714_v47, 0.0 }
 0x377   : > { %v2265_v44 = vmax.f32 %v2263_v20, 0.0  ;;  %v3717_v31 = vmax.f32 %v3715_v12, 0.0 }
 0x378   : > { %v2266_v16 = vmax.f32 %v2264_v43, 0.0 }
 0x415   : > { %v6476_v26 = vpop.f32.mrb[4].mxu0 }
 0x416   : > { %v6483_v27 = vadd.f32 %v6476_v26, %v2261_v48  ;;  %v6478_v18 = vpop.f32.mrb[5].mxu0 }
 0x417   : > { %v6484_v32 = vadd.f32 %v6478_v18, %v2261_v48 }
 0x418   : > { %v6485_v17 = vmax.f32 %v6483_v27, 0.0  ;;  %v5116_v39 = vpop.f32.mrb[4].mxu1 }
 0x419   : > { %v6486_v40 = vmax.f32 %v6484_v32, 0.0  ;;  %v5123_v35 = vadd.f32 %v5116_v39, %v2261_v48  ;;  %v5118_v4 = vpop.f32.mrb[5].mxu1 }
 0x41a   : > { %v5124_v5 = vadd.f32 %v5118_v4, %v2261_v48  ;;  %6525 = vrot.lane.b32.xlu0 %v6485_v17, %s10101_s29  ;;  %v11766_v48 = vld [vmem:[#allocation11_spill] sm:$0xff] }
 0x41b   : > { %v5125_v19 = vmax.f32 %v5123_v35, 0.0  ;;  %6527 = vrot.lane.b32.xlu1 %v6486_v40, %s10101_s29 }
 0x41c   : > { %v5126_v41 = vmax.f32 %v5124_v5, 0.0 }
 0x41e   : > { %6513 = vrot.lane.b32.xlu0 %v5125_v19, %s10101_s29 }
 0x41f   : > { %6515 = vrot.lane.b32.xlu1 %v5126_v41, %s10101_s29 }
 0x422   : > { %6489 = vrot.lane.b32.xlu0 %v2265_v44, %s10101_s29 }
 0x423   : > { %6491 = vrot.lane.b32.xlu1 %v2266_v16, %s10101_s29 }
 0x426   : > { %6501 = vrot.lane.b32.xlu0 %v3716_v23, %s10101_s29 }
 0x427   : > { %6503 = vrot.lane.b32.xlu1 %v3717_v31, %s10101_s29  ;;  %v11767_v31 = vld [vmem:[#allocation2_spill] sm:$0xff] }
 0x48c   : > { %v6526_v55 = vpop.permute.xlu0 %6525 }
 0x48d   : > { %v11273_v14 = vsel %vm518_vm1, 0.0, %v6526_v55  ;;  %v6528_v61 = vpop.permute.xlu1 %6527 }
 0x48e   : > { %6707 = vrot.lane.b32.xlu0 %v11273_v14, %s10104_s18  ;;  %v11278_v11 = vsel %vm518_vm1, %v6526_v55, %v6528_v61  ;;  %v6534_v3 = vsel %vm518_vm1, %v6528_v61, 0.0  ;;  %v7069_v18 = vmul.f32 %v11273_v14, %v11762_v0 }
 0x48f   : > { %v7070_v27 = vmul.f32 %v11278_v11, %v11761_v56  ;;  %v7071_v32 = vmul.f32 %v6534_v3, %v11763_v46  ;;  %v6536_v55 = vmul.f32 %v11278_v11, %v11767_v31 }
 0x490   : > { %v6514_v7 = vpop.permute.xlu0 %6513 }
 0x491   : > { %v6516_v22 = vpop.permute.xlu1 %6515  ;;  %v6521_v37 = vsel %vm518_vm1, 0.0, %v6514_v7 }
 0x492   : > { %v6517_v38 = vsel %vm518_vm1, %v6514_v7, %v6516_v22  ;;  %6709 = vrot.lane.b32.xlu0 %v11278_v11, %s10104_s18  ;;  %v6522_v62 = vsel %vm518_vm1, %v6516_v22, 0.0  ;;  %v7490_v28 = vmul.f32 %v6521_v37, %v11759_v45  ;;  %v7964_v39 = vmul.f32 %v6521_v37, %v11765_v51  ;;  %v11768_v7 = vld [vmem:[#allocation3_spill] sm:$0xff] }
 0x493   : > { %6541 = vrot.lane.b32.xlu1 %v6517_v38, %s10104_s18  ;;  %v7491_v15 = vmul.f32 %v6517_v38, %v11758_v8  ;;  %v7492_v57 = vmul.f32 %v6522_v62, %v11760_v42  ;;  %v7965_v17 = vmul.f32 %v6517_v38, %v11764_v63  ;;  %v7966_v40 = vmul.f32 %v6522_v62, %v11766_v48  ;;  %v11415_v45 = vld [vmem:[%s11708_s8 + $0x8] sm:$0xf] }
 0x494   : > { %v6490_v25 = vpop.permute.xlu0 %6489  ;;  %v6535_v22 = vmul.f32 %v11273_v14, %v11768_v7 }
 0x495   : > { %v6492_v49 = vpop.permute.xlu1 %6491  ;;  %v6497_v29 = vsel %vm518_vm1, 0.0, %v6490_v25 }
 0x496   : > { %6543 = vrot.lane.b32.xlu0 %v6522_v62, %s10104_s18  ;;  %v6498_v30 = vsel %vm518_vm1, %v6492_v49, 0.0  ;;  %v6493_v54 = vsel %vm518_vm1, %v6490_v25, %v6492_v49  ;;  %v7727_v2 = vmul.f32 %v6497_v29, %v11765_v51 }
 0x497   : > { %6711 = vrot.lane.b32.xlu1 %v6534_v3, %s10104_s18  ;;  %v7728_v58 = vmul.f32 %v6493_v54, %v11764_v63  ;;  %v7729_v26 = vmul.f32 %v6498_v30, %v11766_v48  ;;  %v9339_v19 = vmul.f32 %v6493_v54, %v11029_v6 }
 0x498   : > { %v6502_v13 = vpop.permute.xlu0 %6501 }
 0x499   : > { %v6504_v60 = vpop.permute.xlu1 %6503  ;;  %v6509_v53 = vsel %vm518_vm1, 0.0, %v6502_v13 }
 0x49a   : > { %7498 = vrot.lane.b32.xlu0 %v7491_v15, %s10106_s24  ;;  %v6505_v52 = vsel %vm518_vm1, %v6502_v13, %v6504_v60  ;;  %v6510_v50 = vsel %vm518_vm1, %v6504_v60, 0.0  ;;  %v6795_v9 = vmul.f32 %v6509_v53, %v11762_v0  ;;  %v8493_v4 = vmul.f32 %v6509_v53, %v10934_v10 }
 0x49b   : > { %6539 = vrot.lane.b32.xlu1 %v6521_v37, %s10104_s18  ;;  %v6796_v59 = vmul.f32 %v6505_v52, %v11761_v56  ;;  %v6797_v24 = vmul.f32 %v6510_v50, %v11763_v46  ;;  %v8494_v35 = vmul.f32 %v6505_v52, %v10944_v34  ;;  %v8495_v5 = vmul.f32 %v6510_v50, %v10926_v33  ;;  %v414_v33 = vld [vmem:[%s11709_s9] sm:$0xf]  ;;  %v11446_v56 = vld [vmem:[%s11708_s8 + $0xc] sm:$0xf]  ;;  %v11471_v46 = vld [vmem:[%s11708_s8 + $0x10] sm:$0xf] }
 0x49c   : > { %v9338_v34 = vmul.f32 %v6497_v29, %v11021_v1  ;;  %v9340_v10 = vmul.f32 %v6498_v30, %v11019_v21  ;;  %v11369_v21 = vld [vmem:[%s11708_s8 + $0x4] sm:$0xf] }
 0x49e   : > { %7496 = vrot.lane.b32.xlu0 %v7490_v28, %s10106_s24 }
 0x49f   : > { %7500 = vrot.lane.b32.xlu1 %v7492_v57, %s10106_s24 }
 0x4a2   : > { %6895 = vrot.lane.b32.xlu0 %v6498_v30, %s10107_s26 }
 0x4a3   : > { %6893 = vrot.lane.b32.xlu1 %v6493_v54, %s10107_s26 }
 0x4a6   : > { %6803 = vrot.lane.b32.xlu0 %v6796_v59, %s10108_s27 }
 0x4a7   : > { %6891 = vrot.lane.b32.xlu1 %v6497_v29, %s10107_s26 }
 0x4aa   : > { %6801 = vrot.lane.b32.xlu0 %v6795_v9, %s10108_s27 }
 0x4ab   : > { %6805 = vrot.lane.b32.xlu1 %v6797_v24, %s10108_s27 }
 0x4ae   : > { %6985 = vrot.lane.b32.xlu0 %v6510_v50, %s10107_s26 }
 0x4af   : > { %6983 = vrot.lane.b32.xlu1 %v6505_v52, %s10107_s26 }
 0x4b2   : > { %7735 = vrot.lane.b32.xlu0 %v7728_v58, %s10109_s15 }
 0x4b3   : > { %6981 = vrot.lane.b32.xlu1 %v6509_v53, %s10107_s26 }
 0x4b6   : > { %7733 = vrot.lane.b32.xlu0 %v7727_v2, %s10109_s15 }
 0x4b7   : > { %7737 = vrot.lane.b32.xlu1 %v7729_v26, %s10109_s15  ;;  %v11496_v26 = vld [vmem:[%s11708_s8 + $0x14] sm:$0xf] }
 0x4ba   : > { %7167 = vrot.lane.b32.xlu0 %v6522_v62, %s10107_s26 }
 0x4bb   : > { %7165 = vrot.lane.b32.xlu1 %v6517_v38, %s10107_s26 }
 0x4be   : > { %7077 = vrot.lane.b32.xlu0 %v7070_v27, %s10108_s27 }
 0x4bf   : > { %7163 = vrot.lane.b32.xlu1 %v6521_v37, %s10107_s26 }
 0x4c2   : > { %7075 = vrot.lane.b32.xlu0 %v7069_v18, %s10108_s27 }
 0x4c3   : > { %7079 = vrot.lane.b32.xlu1 %v7071_v32, %s10108_s27 }
 0x4c6   : > { %7255 = vrot.lane.b32.xlu0 %v6534_v3, %s10107_s26 }
 0x4c7   : > { %7253 = vrot.lane.b32.xlu1 %v11278_v11, %s10107_s26 }
 0x4ca   : > { %7972 = vrot.lane.b32.xlu0 %v7965_v17, %s10109_s15 }
 0x4cb   : > { %7251 = vrot.lane.b32.xlu1 %v11273_v14, %s10107_s26  ;;  %v11395_v14 = vld [vmem:[%s11708_s8] sm:$0xf] }
 0x4ce   : > { %7970 = vrot.lane.b32.xlu0 %v7964_v39, %s10109_s15 }
 0x4cf   : > { %7974 = vrot.lane.b32.xlu1 %v7966_v40, %s10109_s15  ;;  %s379_s15 = scalar_lea.vmem %s11710_s10, %s9860_s25 }
 0x4d2   : > { %8588 = vrot.lane.b32.xlu0 %v6498_v30, %s10112_s22 }
 0x4d3   : > { %8586 = vrot.lane.b32.xlu1 %v6493_v54, %s10112_s22 }
 0x4d6   : > { %8501 = vrot.lane.b32.xlu0 %v8494_v35, %s10113_s30 }
 0x4d7   : > { %8584 = vrot.lane.b32.xlu1 %v6497_v29, %s10112_s22 }
 0x4da   : > { %8499 = vrot.lane.b32.xlu0 %v8493_v4, %s10113_s30 }
 0x4db   : > { %8503 = vrot.lane.b32.xlu1 %v8495_v5, %s10113_s30  ;;  %v11524_v5 = vld [vmem:[%s11708_s8 + $0x18] sm:$0xf] }
 0x4de   : > { %8673 = vrot.lane.b32.xlu0 %v6510_v50, %s10112_s22 }
 0x4df   : > { %8671 = vrot.lane.b32.xlu1 %v6505_v52, %s10112_s22 }
 0x4e2   : > { %9346 = vrot.lane.b32.xlu0 %v9339_v19, %s10114_s16 }
 0x4e3   : > { %8669 = vrot.lane.b32.xlu1 %v6509_v53, %s10112_s22 }
 0x4e6   : > { %9344 = vrot.lane.b32.xlu0 %v9338_v34, %s10114_s16 }
 0x4e7   : > { %9348 = vrot.lane.b32.xlu1 %v9340_v10, %s10114_s16 }
 0x4eb   : > { %7341 = vperm.xlu1 %10090, %v414_v33  }
 0x500   : > { %v6708_v20 = vpop.permute.xlu0 %6707 }
 0x504   : > { %v6710_v41 = vpop.permute.xlu0 %6709 }
 0x505   : > { %v6542_v6 = vpop.permute.xlu1 %6541  ;;  %v6713_v12 = vsel %vm806_vm6, %v6708_v20, %v6710_v41 }
 0x508   : > { %v6544_v43 = vpop.permute.xlu0 %6543 }
 0x509   : > { %v6546_v44 = vsel %vm806_vm6, %v6542_v6, %v6544_v43  ;;  %v6712_v47 = vpop.permute.xlu1 %6711 }
 0x50a   : > { %v6714_v1 = vsel %vm806_vm6, %v6710_v41, %v6712_v47  ;;  %9750 = vmatprep.subr.msk.mxu1 %vm640_vm2, %v6546_v44 }
 0x50b   : > { %9777 = vmatprep.subr.msk.mxu0 %vm640_vm2, %v6714_v1 }
 0x50c   : > { %9778 = vmatpush1.msk.msra.mxu0 %vm640_vm2, %v6713_v12  ;;  %v7499_v16 = vpop.permute.xlu0 %7498 }
 0x50d   : > { %v6540_v23 = vpop.permute.xlu1 %6539  ;;  %9779 = vmatmul.mubr.msk.f32.vlgmr.msra.gmra.mrb[6].mxu0 %vm636_vm3, %v11369_v21  ;;  %9780 = vmatprep.subr.msk.mxu0 %vm640_vm2, %v6546_v44  ;;  %v11567_v44 = vld [vmem:[%s11708_s8 + $0x20] sm:$0xf] }
 0x50e   : > { %v6545_v61 = vsel %vm806_vm6, %v6540_v23, %v6542_v6  ;;  %7483 = vmatprep.mubr.f32.mxu0 %v11750_v36  ;;  %v11547_v6 = vld [vmem:[%s11708_s8 + $0x1c] sm:$0xf] }
 0x50f   : > { %9751 = vmatpush1.msk.msra.mxu1 %vm640_vm2, %v6545_v61  ;;  %9781 = vmatpush1.msk.msra.mxu0 %vm640_vm2, %v6545_v61 }
 0x510   : > { %9752 = vmatmul.mubr.msk.f32.vlgmr.msra.gmra.mrb[6].mxu1 %vm636_vm3, %v11369_v21  ;;  %9753 = vmatprep.subr.msk.mxu1 %vm640_vm2, %v6536_v55  ;;  %v7497_v38 = vpop.permute.xlu0 %7496 }
 0x511   : > { %v7501_v62 = vpop.permute.xlu1 %7500  ;;  %9754 = vmatpush1.msk.msra.mxu1 %vm640_vm2, %v6535_v22  ;;  %6698 = vmatprep.mubr.f32.mxu1 %v11750_v36  ;;  %v7502_v8 = vsel %vm2585_vm8, %v7497_v38, %v7499_v16 }
 0x512   : > { %v7503_v11 = vsel %vm2585_vm8, %v7499_v16, %v7501_v62  ;;  %9756 = vmatprep.subr.msk.mxu1 %vm640_vm2, %v6714_v1 }
 0x513   : > { %9783 = vmatprep.subr.msk.mxu0 %vm640_vm2, %v7503_v11 }
 0x514   : > { %v6896_v3 = vpop.permute.xlu0 %6895 }
 0x515   : > { %v6894_v15 = vpop.permute.xlu1 %6893  ;;  %9782 = vmatmul.mubr.msk.f32.vlgmr.msra.gmra.mrb[6].mxu0 %vm636_vm3, %v11395_v14 }
 0x516   : > { %v11402_v25 = vsel %vm1365_vm9, %v6894_v15, %v6896_v3  ;;  %9784 = vmatpush1.msk.msra.mxu0 %vm640_vm2, %v7502_v8  ;;  %7572 = vmatprep.mubr.f32.mxu0 %v11750_v36 }
 0x517   : > { %9786 = vmatprep.subr.msk.mxu0 %vm640_vm2, %v11402_v25 }
 0x518   : > { %9755 = vmatmul.mubr.msk.f32.vlgmr.msra.gmra.mrb[6].mxu1 %vm636_vm3, %v11395_v14  ;;  %v6804_v49 = vpop.permute.xlu0 %6803 }
 0x519   : > { %9757 = vmatpush1.msk.msra.mxu1 %vm640_vm2, %v6713_v12  ;;  %v6892_v37 = vpop.permute.xlu1 %6891  ;;  %6786 = vmatprep.mubr.f32.mxu1 %v11750_v36 }
 0x51a   : > { %v11418_v42 = vsel %vm1365_vm9, %v6892_v37, %v6894_v15 }
 0x51c   : > { %v6802_v28 = vpop.permute.xlu0 %6801 }
 0x51d   : > { %v6806_v57 = vpop.permute.xlu1 %6805  ;;  %9785 = vmatmul.mubr.msk.f32.vlgmr.msra.gmra.mrb[6].mxu0 %vm636_vm3, %v11415_v45  ;;  %v11431_v60 = vsel %vm1180_vm10, %v6802_v28, %v6804_v49 }
 0x51e   : > { %v11423_v13 = vsel %vm1180_vm10, %v6804_v49, %v6806_v57  ;;  %9787 = vmatpush1.msk.msra.mxu0 %vm640_vm2, %v11418_v42  ;;  %7645 = vmatprep.mubr.f32.mxu0 %v11750_v36 }
 0x51f   : > { %9759 = vmatprep.subr.msk.mxu1 %vm640_vm2, %v11423_v13 }
 0x520   : > { %9758 = vmatmul.mubr.msk.f32.vlgmr.msra.gmra.mrb[6].mxu1 %vm636_vm3, %v11415_v45  ;;  %v6986_v30 = vpop.permute.xlu0 %6985 }
 0x521   : > { %9760 = vmatpush1.msk.msra.mxu1 %vm640_vm2, %v11431_v60  ;;  %v6984_v52 = vpop.permute.xlu1 %6983  ;;  %6880 = vmatprep.mubr.f32.mxu1 %v11750_v36 }
 0x522   : > { %v11439_v54 = vsel %vm1365_vm9, %v6984_v52, %v6986_v30  ;;  %9762 = vmatprep.subr.msk.mxu1 %vm640_vm2, %v11402_v25 }
 0x523   : > { %9789 = vmatprep.subr.msk.mxu0 %vm640_vm2, %v11439_v54 }
 0x524   : > { %v7736_v59 = vpop.permute.xlu0 %7735 }
 0x525   : > { %v6982_v53 = vpop.permute.xlu1 %6981  ;;  %9788 = vmatmul.mubr.msk.f32.vlgmr.msra.gmra.mrb[6].mxu0 %vm636_vm3, %v11446_v56 }
 0x526   : > { %v11453_v29 = vsel %vm1365_vm9, %v6982_v53, %v6984_v52  ;;  %7718 = vmatprep.mubr.f32.mxu0 %v11750_v36 }
 0x527   : > { %9790 = vmatpush1.msk.msra.mxu0 %vm640_vm2, %v11453_v29 }
 0x528   : > { %9761 = vmatmul.mubr.msk.f32.vlgmr.msra.gmra.mrb[6].mxu1 %vm636_vm3, %v11446_v56  ;;  %v7734_v50 = vpop.permute.xlu0 %7733 }
 0x529   : > { %9763 = vmatpush1.msk.msra.mxu1 %vm640_vm2, %v11418_v42  ;;  %v7738_v0 = vpop.permute.xlu1 %7737  ;;  %6970 = vmatprep.mubr.f32.mxu1 %v11750_v36  ;;  %v11476_v63 = vsel %vm3069_vm11, %v7734_v50, %v7736_v59 }
 0x52a   : > { %v11464_v9 = vsel %vm3069_vm11, %v7736_v59, %v7738_v0  ;;  %9765 = vmatprep.subr.msk.mxu1 %vm640_vm2, %v11439_v54 }
 0x52b   : > { %9792 = vmatprep.subr.msk.mxu0 %vm640_vm2, %v11464_v9 }
 0x52c   : > { %v7168_v24 = vpop.permute.xlu0 %7167 }
 0x52d   : > { %v7166_v58 = vpop.permute.xlu1 %7165  ;;  %9791 = vmatmul.mubr.msk.f32.vlgmr.msra.gmra.mrb[6].mxu0 %vm636_vm3, %v11471_v46 }
 0x52e   : > { %v11481_v51 = vsel %vm1365_vm9, %v7166_v58, %v7168_v24  ;;  %9793 = vmatpush1.msk.msra.mxu0 %vm640_vm2, %v11476_v63  ;;  %7809 = vmatprep.mubr.f32.mxu0 %v11750_v36 }
 0x52f   : > { %9795 = vmatprep.subr.msk.mxu0 %vm640_vm2, %v11481_v51 }
 0x530   : > { %9764 = vmatmul.mubr.msk.f32.vlgmr.msra.gmra.mrb[6].mxu1 %vm636_vm3, %v11471_v46  ;;  %v7078_v2 = vpop.permute.xlu0 %7077 }
 0x531   : > { %9766 = vmatpush1.msk.msra.mxu1 %vm640_vm2, %v11453_v29  ;;  %v7164_v48 = vpop.permute.xlu1 %7163  ;;  %7060 = vmatprep.mubr.f32.mxu1 %v11750_v36 }
 0x532   : > { %v11499_v18 = vsel %vm1365_vm9, %v7164_v48, %v7166_v58 }
 0x534   : > { %v7076_v27 = vpop.permute.xlu0 %7075 }
 0x535   : > { %v7080_v32 = vpop.permute.xlu1 %7079  ;;  %9794 = vmatmul.mubr.msk.f32.vlgmr.msra.gmra.mrb[6].mxu0 %vm636_vm3, %v11496_v26  ;;  %v11509_v39 = vsel %vm1180_vm10, %v7076_v27, %v7078_v2 }
 0x536   : > { %v7082_v17 = vsel %vm1180_vm10, %v7078_v2, %v7080_v32  ;;  %9796 = vmatpush1.msk.msra.mxu0 %vm640_vm2, %v11499_v18  ;;  %7882 = vmatprep.mubr.f32.mxu0 %v11750_v36 }
 0x537   : > { %9768 = vmatprep.subr.msk.mxu1 %vm640_vm2, %v7082_v17 }
 0x538   : > { %9767 = vmatmul.mubr.msk.f32.vlgmr.msra.gmra.mrb[6].mxu1 %vm636_vm3, %v11496_v26  ;;  %v7256_v40 = vpop.permute.xlu0 %7255 }
 0x539   : > { %9769 = vmatpush1.msk.msra.mxu1 %vm640_vm2, %v11509_v39  ;;  %v7254_v35 = vpop.permute.xlu1 %7253  ;;  %7154 = vmatprep.mubr.f32.mxu1 %v11750_v36 }
 0x53a   : > { %v11517_v4 = vsel %vm1365_vm9, %v7254_v35, %v7256_v40  ;;  %9771 = vmatprep.subr.msk.mxu1 %vm640_vm2, %v11481_v51 }
 0x53b   : > { %9798 = vmatprep.subr.msk.mxu0 %vm640_vm2, %v11517_v4 }
 0x53c   : > { %v7973_v19 = vpop.permute.xlu0 %7972 }
 0x53d   : > { %v7252_v34 = vpop.permute.xlu1 %7251  ;;  %9797 = vmatmul.mubr.msk.f32.vlgmr.msra.gmra.mrb[6].mxu0 %vm636_vm3, %v11524_v5 }
 0x53e   : > { %v11531_v10 = vsel %vm1365_vm9, %v7252_v34, %v7254_v35  ;;  %7955 = vmatprep.mubr.f32.mxu0 %v11750_v36 }
 0x53f   : > { %9799 = vmatpush1.msk.msra.mxu0 %vm640_vm2, %v11531_v10 }
 0x540   : > { %9770 = vmatmul.mubr.msk.f32.vlgmr.msra.gmra.mrb[6].mxu1 %vm636_vm3, %v11524_v5  ;;  %v7971_v20 = vpop.permute.xlu0 %7970 }
 0x541   : > { %9772 = vmatpush1.msk.msra.mxu1 %vm640_vm2, %v11499_v18  ;;  %v7975_v33 = vpop.permute.xlu1 %7974  ;;  %7242 = vmatprep.mubr.f32.mxu1 %v11750_v36  ;;  %v7976_v43 = vsel %vm3069_vm11, %v7971_v20, %v7973_v19 }
 0x542   : > { %v7977_v41 = vsel %vm3069_vm11, %v7973_v19, %v7975_v33  ;;  %9774 = vmatprep.subr.msk.mxu1 %vm640_vm2, %v11517_v4 }
 0x543   : > { %9801 = vmatprep.subr.msk.mxu0 %vm640_vm2, %v7977_v41 }
 0x544   : > { %v8589_v1 = vpop.permute.xlu0 %8588 }
 0x545   : > { %9800 = vmatmul.mubr.msk.f32.vlgmr.msra.gmra.mrb[6].mxu0 %vm636_vm3, %v11547_v6  ;;  %v8587_v47 = vpop.permute.xlu1 %8586 }
 0x546   : > { %9802 = vmatpush1.msk.msra.mxu0 %vm640_vm2, %v7976_v43  ;;  %8046 = vmatprep.mubr.f32.mxu0 %v11750_v36  ;;  %v8591_v31 = vsel %vm4788_vm14, %v8587_v47, %v8589_v1 }
 0x547   : > { %9831 = vmatprep.subr.msk.mxu0 %vm640_vm2, %v11439_v54 }
 0x548   : > { %9773 = vmatmul.mubr.msk.f32.vlgmr.msra.gmra.mrb[6].mxu1 %vm636_vm3, %v11547_v6  ;;  %v8502_v12 = vpop.permute.xlu0 %8501 }
 0x549   : > { %9775 = vmatpush1.msk.msra.mxu1 %vm640_vm2, %v11531_v10  ;;  %7330 = vmatprep.mubr.f32.mxu1 %v11750_v36 }
 0x54a   : > { %9804 = vmatprep.subr.msk.mxu1 %vm640_vm2, %v11402_v25 }
 0x54c   : > { %v8500_v23 = vpop.permute.xlu0 %8499 }
 0x54d   : > { %9803 = vmatmul.mubr.msk.f32.vlgmr.msra.gmra.mrb[6].mxu0 %vm636_vm3, %v11567_v44  ;;  %v8505_v11 = vsel %vm4611_vm15, %v8500_v23, %v8502_v12 }
 0x54e   : > { %9832 = vmatpush1.msk.msra.mxu0 %vm640_vm2, %v11453_v29  ;;  %8822 = vmatprep.mubr.f32.mxu0 %v11750_v36 }
 0x54f   : > { %9834 = vmatprep.subr.msk.mxu0 %vm640_vm2, %v11402_v25 }
 0x550   : > { %9776 = vmatmul.mubr.msk.f32.vlgmr.msra.gmra.mrb[6].mxu1 %vm636_vm3, %v11567_v44  ;;  %v8674_v7 = vpop.permute.xlu0 %8673 }
 0x551   : > { %9805 = vmatpush1.msk.msra.mxu1 %vm640_vm2, %v11418_v42  ;;  %9833 = vmatmul.mubr.msk.f32.vlgmr.msra.gmra.mrb[8].mxu0 %vm636_vm3, %v11369_v21 }
 0x552   : > { %9807 = vmatprep.subr.msk.mxu1 %vm640_vm2, %v11423_v13  ;;  %9835 = vmatpush1.msk.msra.mxu0 %vm640_vm2, %v11418_v42 }
 0x553   : > { %9837 = vmatprep.subr.msk.mxu0 %vm640_vm2, %v11464_v9  ;;  %8123 = vmatprep.mubr.f32.mxu1 %v11750_v36 }
 0x554   : > { %9806 = vmatmul.mubr.msk.f32.vlgmr.msra.gmra.mrb[8].mxu1 %vm636_vm3, %v11369_v21  ;;  %8893 = vmatprep.mubr.f32.mxu0 %v11750_v36  ;;  %v8585_v21 = vpop.permute.xlu1 %8584  ;;  %v9347_v3 = vpop.permute.xlu0 %9346 }
 0x555   : > { %9808 = vmatpush1.msk.msra.mxu1 %vm640_vm2, %v11431_v60  ;;  %8194 = vmatprep.mubr.f32.mxu1 %v11750_v36  ;;  %v8590_v22 = vsel %vm4788_vm14, %v8585_v21, %v8587_v47 }
 0x556   : > { %9810 = vmatprep.subr.msk.mxu1 %vm640_vm2, %v11439_v54 }
 0x558   : > { %v8504_v16 = vpop.permute.xlu1 %8503  ;;  %v9345_v25 = vpop.permute.xlu0 %9344 }
 0x559   : > { %9836 = vmatmul.mubr.msk.f32.vlgmr.msra.gmra.mrb[8].mxu0 %vm636_vm3, %v11395_v14  ;;  %v8506_v61 = vsel %vm4611_vm15, %v8502_v12, %v8504_v16  ;;  %v9350_v49 = vsel %vm6312_vm0, %v9345_v25, %v9347_v3 }
 0x55a   : > { %9838 = vmatpush1.msk.msra.mxu0 %vm640_vm2, %v11476_v63  ;;  %8964 = vmatprep.mubr.f32.mxu0 %v11750_v36 }
 0x55b   : > { %9840 = vmatprep.subr.msk.mxu0 %vm640_vm2, %v11481_v51 }
 0x55c   : > { %9809 = vmatmul.mubr.msk.f32.vlgmr.msra.gmra.mrb[8].mxu1 %vm636_vm3, %v11395_v14  ;;  %v8672_v55 = vpop.permute.xlu1 %8671 }
 0x55d   : > { %9811 = vmatpush1.msk.msra.mxu1 %vm640_vm2, %v11453_v29  ;;  %8265 = vmatprep.mubr.f32.mxu1 %v11750_v36  ;;  %v8676_v62 = vsel %vm4788_vm14, %v8672_v55, %v8674_v7 }
 0x55e   : > { %9813 = vmatprep.subr.msk.mxu1 %vm640_vm2, %v7082_v17 }
 0x560   : > { %v8670_v38 = vpop.permute.xlu1 %8669 }
 0x561   : > { %9839 = vmatmul.mubr.msk.f32.vlgmr.msra.gmra.mrb[8].mxu0 %vm636_vm3, %v11415_v45  ;;  %v8675_v8 = vsel %vm4788_vm14, %v8670_v38, %v8672_v55 }
 0x562   : > { %9841 = vmatpush1.msk.msra.mxu0 %vm640_vm2, %v11499_v18  ;;  %9037 = vmatprep.mubr.f32.mxu0 %v11750_v36 }
 0x563   : > { %9843 = vmatprep.subr.msk.mxu0 %vm640_vm2, %v11517_v4 }
 0x564   : > { %9812 = vmatmul.mubr.msk.f32.vlgmr.msra.gmra.mrb[8].mxu1 %vm636_vm3, %v11415_v45  ;;  %v9349_v14 = vpop.permute.xlu1 %9348 }
 0x565   : > { %9814 = vmatpush1.msk.msra.mxu1 %vm640_vm2, %v11509_v39  ;;  %8338 = vmatprep.mubr.f32.mxu1 %v11750_v36  ;;  %v9351_v15 = vsel %vm6312_vm0, %v9347_v3, %v9349_v14 }
 0x566   : > { %9816 = vmatprep.subr.msk.mxu1 %vm640_vm2, %v11481_v51 }
 0x569   : > { %9842 = vmatmul.mubr.msk.f32.vlgmr.msra.gmra.mrb[8].mxu0 %vm636_vm3, %v11446_v56 }
 0x56a   : > { %9844 = vmatpush1.msk.msra.mxu0 %vm640_vm2, %v11531_v10  ;;  %9110 = vmatprep.mubr.f32.mxu0 %v11750_v36  ;;  %v7342_v37 = vpop.permute.xlu1 %7341 }
 0x56b   : > { %9846 = vmatprep.subr.msk.mxu0 %vm640_vm2, %v7977_v41 }
 0x56c   : > { %9815 = vmatmul.mubr.msk.f32.vlgmr.msra.gmra.mrb[8].mxu1 %vm636_vm3, %v11446_v56 }
 0x56d   : > { %9817 = vmatpush1.msk.msra.mxu1 %vm640_vm2, %v11499_v18  ;;  %8411 = vmatprep.mubr.f32.mxu1 %v11750_v36 }
 0x56e   : > { %9819 = vmatprep.subr.msk.mxu1 %vm640_vm2, %v11517_v4 }
 0x571   : > { %9845 = vmatmul.mubr.msk.f32.vlgmr.msra.gmra.mrb[8].mxu0 %vm636_vm3, %v11471_v46 }
 0x572   : > { %9847 = vmatpush1.msk.msra.mxu0 %vm640_vm2, %v7976_v43  ;;  %9183 = vmatprep.mubr.f32.mxu0 %v11750_v36 }
 0x573   : > { %9849 = vmatprep.subr.msk.mxu0 %vm640_vm2, %v8591_v31 }
 0x574   : > { %9818 = vmatmul.mubr.msk.f32.vlgmr.msra.gmra.mrb[8].mxu1 %vm636_vm3, %v11471_v46 }
 0x575   : > { %9820 = vmatpush1.msk.msra.mxu1 %vm640_vm2, %v11531_v10  ;;  %8484 = vmatprep.mubr.f32.mxu1 %v11750_v36 }
 0x576   : > { %9822 = vmatprep.subr.msk.mxu1 %vm640_vm2, %v8506_v61 }
 0x579   : > { %9848 = vmatmul.mubr.msk.f32.vlgmr.msra.gmra.mrb[8].mxu0 %vm636_vm3, %v11496_v26 }
 0x57a   : > { %9850 = vmatpush1.msk.msra.mxu0 %vm640_vm2, %v8590_v22  ;;  %9256 = vmatprep.mubr.f32.mxu0 %v11750_v36 }
 0x57b   : > { %9852 = vmatprep.subr.msk.mxu0 %vm640_vm2, %v8676_v62 }
 0x57c   : > { %9821 = vmatmul.mubr.msk.f32.vlgmr.msra.gmra.mrb[8].mxu1 %vm636_vm3, %v11496_v26 }
 0x57d   : > { %9823 = vmatpush1.msk.msra.mxu1 %vm640_vm2, %v8505_v11  ;;  %8575 = vmatprep.mubr.f32.mxu1 %v11750_v36 }
 0x57e   : > { %9825 = vmatprep.subr.msk.mxu1 %vm640_vm2, %v8591_v31 }
 0x581   : > { %9851 = vmatmul.mubr.msk.f32.vlgmr.msra.gmra.mrb[8].mxu0 %vm636_vm3, %v11524_v5 }
 0x582   : > { %9853 = vmatpush1.msk.msra.mxu0 %vm640_vm2, %v8675_v8  ;;  %9329 = vmatprep.mubr.f32.mxu0 %v11750_v36 }
 0x583   : > { %9855 = vmatprep.subr.msk.mxu0 %vm640_vm2, %v9351_v15 }
 0x584   : > { %9824 = vmatmul.mubr.msk.f32.vlgmr.msra.gmra.mrb[8].mxu1 %vm636_vm3, %v11524_v5 }
 0x585   : > { %9826 = vmatpush1.msk.msra.mxu1 %vm640_vm2, %v8590_v22  ;;  %8660 = vmatprep.mubr.f32.mxu1 %v11750_v36 }
 0x586   : > { %9828 = vmatprep.subr.msk.mxu1 %vm640_vm2, %v8676_v62 }
 0x589   : > { %9854 = vmatmul.mubr.msk.f32.vlgmr.msra.gmra.mrb[8].mxu0 %vm636_vm3, %v11547_v6 }
 0x58a   : > { %9856 = vmatpush1.msk.msra.mxu0 %vm640_vm2, %v9350_v49  ;;  %9420 = vmatprep.mubr.f32.mxu0 %v11750_v36 }
 0x58c   : > { %9827 = vmatmul.mubr.msk.f32.vlgmr.msra.gmra.mrb[8].mxu1 %vm636_vm3, %v11547_v6 }
 0x58d   : > { %9829 = vmatpush1.msk.msra.mxu1 %vm640_vm2, %v8675_v8  ;;  %8745 = vmatprep.mubr.f32.mxu1 %v11750_v36 }
 0x591   : > { %9857 = vmatmul.mubr.msk.f32.vlgmr.msra.gmra.mrb[8].mxu0 %vm636_vm3, %v11567_v44 }
 0x594   : > { %9830 = vmatmul.mubr.msk.f32.vlgmr.msra.gmra.mrb[8].mxu1 %vm636_vm3, %v11567_v44 }
 0x620   : > { %v8048_v45 = vpop.f32.mrb[6].mxu0 }
 0x621   : > { %v8055_v28 = vadd.f32 %v8048_v45, %v7342_v37  ;;  %v8050_v42 = vpop.f32.mrb[7].mxu0 }
 0x622   : > { %v8056_v57 = vadd.f32 %v8050_v42, %v7342_v37 }
 0x623   : > { %v8057_v13 = vmax.f32 %v8055_v28, 0.0  ;;  %v7332_v60 = vpop.f32.mrb[6].mxu1 }
 0x624   : > { %v8058_v30 = vmax.f32 %v8056_v57, 0.0  ;;  %v7344_v52 = vadd.f32 %v7342_v37, %v7332_v60  ;;  %v7334_v54 = vpop.f32.mrb[7].mxu1 }
 0x625   : > { %v9435_v56 = vrot.slane %v8057_v13, 4  ;;  %v7345_v59 = vadd.f32 %v7342_v37, %v7334_v54 }
 0x626   : > { %v9436_v36 = vrot.slane %v8058_v30, 4  ;;  %v7346_v53 = vmax.f32 %v7344_v52, 0.0 }
 0x627   : > { %v7347_v29 = vmax.f32 %v7345_v59, 0.0 }
 0x628   : > { %v9445_v50 = vsel %vm640_vm2, %v7346_v53, %v9435_v56 }
 0x629   : > { %9449 = vst [vmem:[%s379_s15] sm:$0xff] %v9445_v50  ;;  %v9446_v0 = vsel %vm640_vm2, %v7347_v29, %v9436_v36 }
 0x62a   : > { %9450 = vst [vmem:[%s379_s15 + $0x8] sm:$0xff] %v9446_v0 }
 0x664   : > { %v9422_v9 = vpop.f32.mrb[8].mxu0 }
 0x665   : > { %v9429_v46 = vadd.f32 %v9422_v9, %v7342_v37  ;;  %v9424_v24 = vpop.f32.mrb[9].mxu0 }
 0x666   : > { %v9430_v63 = vadd.f32 %v9424_v24, %v7342_v37 }
 0x667   : > { %v9431_v58 = vmax.f32 %v9429_v46, 0.0  ;;  %v8747_v51 = vpop.f32.mrb[8].mxu1 }
 0x668   : > { %v9432_v2 = vmax.f32 %v9430_v63, 0.0  ;;  %v8754_v48 = vadd.f32 %v8747_v51, %v7342_v37  ;;  %v8749_v26 = vpop.f32.mrb[9].mxu1 }
 0x669   : > { %v9441_v27 = vrot.slane %v9431_v58, 4  ;;  %v8755_v18 = vadd.f32 %v8749_v26, %v7342_v37 }
 0x66a   : > { %v9442_v32 = vrot.slane %v9432_v2, 4  ;;  %v8756_v17 = vmax.f32 %v8754_v48, 0.0 }
 0x66b   : > { %v8757_v39 = vmax.f32 %v8755_v18, 0.0 }
 0x66c   : > { %v9447_v40 = vsel %vm640_vm2, %v8756_v17, %v9441_v27 }
 0x66d   : > { %9451 = vst [vmem:[%s379_s15 + $0x10] sm:$0xff] %v9447_v40  ;;  %v9448_v35 = vsel %vm640_vm2, %v8757_v39, %v9442_v32 }
 0x66e   : > { %9452 = vst [vmem:[%s379_s15 + $0x18] sm:$0xff] %v9448_v35 }
 0x66f PF: > { %s20_s13 = sadd.s32 1, %s10097_s13  }
 0x670   : > { %p17_p4 = scmp.ge.s32.totalorder %s20_s13, 4  }
 0x672   :  { %19 = sbr.rel (!%p17_p4) target bundleno = 1 (0x1), region = 94 }

</bundles_post_ra>
